<compile_context>
chip_gen: v7x
topology: tpu7x:2x2x1
jax: 0.10.0
libtpu: 0.0.40
codegen_flags: <defaults>
</compile_context>

<pallas_src>
import functools

import jax
import jax.numpy as jnp
import numpy as np
from jax.experimental import pallas as pl
from jax.experimental.pallas import tpu as pltpu

NUM_MODES = 6
TRAJ_LEN = 29                                   # +1 endpoint -> 30 points
PRED_W = NUM_MODES * (TRAJ_LEN + 1) * 2         # 360
OUT_W = 384                                     # 360 preds + 6 probs + 18 pad = 3 vregs


def _ln(h, g, b):
    mu = jnp.mean(h, axis=-1, keepdims=True)
    var = jnp.mean(jnp.square(h - mu), axis=-1, keepdims=True)
    return (h - mu) * jax.lax.rsqrt(var + 1e-5) * g + b


def decoder_kernel(x_ref, vec_ref,
                   ep_w1, ep_w2h, ep_w2x,
                   er_w1x, er_w1e, er_w2h, er_w2x, er_w2e,
                   gt_w1x, gt_w1e, gt_w2h, gt_w2x, gt_w2e,
                   c_w1x, c_w1e, c_w2,
                   out_ref, *, D):
    Dp2 = D + 2
    x = x_ref[...]                                   # (T, D)
    T = x.shape[0]
    vec = vec_ref[...]                               # (20, VW) packed row vectors

    def row(i, w):
        return vec[i:i + 1, :w]                      # (1, w)

    # ---- endpoint_predictor: residual MLP D -> 12 (split layer-2 weight) ----
    h = jnp.dot(x, ep_w1[...], preferred_element_type=jnp.float32) + row(0, D)
    h = jnp.maximum(_ln(h, row(1, D), row(2, D)), 0.0)
    ep = (jnp.dot(h, ep_w2h[...], preferred_element_type=jnp.float32)
          + jnp.dot(x, ep_w2x[...], preferred_element_type=jnp.float32)
          + row(3, 2 * NUM_MODES))                   # (T, 12)
    ep = ep.reshape(T, NUM_MODES, 2)                 # (T, 6, 2)

    def ep_mix(e, w_ref):
        # e: (T,6,2) x (2, out)  ->  (T,6,out) as two VPU broadcast-mults
        w = w_ref[...]
        return e[..., 0:1] * w[0:1, :] + e[..., 1:2] * w[1:2, :]

    def residual_head(e, w1x, w1e, b1, g, be, w2h, w2x, w2e, b2, out_w):
        # Residual MLP on cat([x, e], -1), hidden Dp2, output out_w.
        # x-dependent matmuls computed once per agent, broadcast over 6 modes.
        base1 = jnp.dot(x, w1x[...], preferred_element_type=jnp.float32)   # (T, Dp2)
        hpre = base1[:, None, :] + ep_mix(e, w1e) + b1                     # (T,6,Dp2)
        hh = jnp.maximum(_ln(hpre, g, be), 0.0)
        out = jnp.dot(hh.reshape(T * NUM_MODES, Dp2), w2h[...],
                      preferred_element_type=jnp.float32)
        out = out.reshape(T, NUM_MODES, out_w)
        out = out + jnp.dot(x, w2x[...], preferred_element_type=jnp.float32)[:, None, :]
        out = out + ep_mix(e, w2e) + b2
        return out                                                         # (T,6,out_w)

    # ---- endpoint_refiner: refines endpoints ----
    off = residual_head(ep, er_w1x, er_w1e, row(4, Dp2), row(5, Dp2), row(6, Dp2),
                        er_w2h, er_w2x, er_w2e, row(7, 2), 2)
    ep = ep + off                                    # (T, 6, 2)

    # ---- get_trajectory: -> 29*2 per mode ----
    traj = residual_head(ep, gt_w1x, gt_w1e, row(8, Dp2), row(9, Dp2), row(10, Dp2),
                         gt_w2h, gt_w2x, gt_w2e, row(11, 2 * TRAJ_LEN), 2 * TRAJ_LEN)
    # (T, 6, 58)

    # ---- cls head: Linear/LN/ReLU x2 + Linear(.,1) + softmax over modes ----
    cbase = jnp.dot(x, c_w1x[...], preferred_element_type=jnp.float32)     # (T, Dp2)
    c = cbase[:, None, :] + ep_mix(ep, c_w1e) + row(12, Dp2)               # (T,6,Dp2)
    c = jnp.maximum(_ln(c, row(13, Dp2), row(14, Dp2)), 0.0)
    c = jnp.dot(c.reshape(T * NUM_MODES, Dp2), c_w2[...],
                preferred_element_type=jnp.float32).reshape(T, NUM_MODES, Dp2)
    c = c + row(15, Dp2)
    c = jnp.maximum(_ln(c, row(16, Dp2), row(17, Dp2)), 0.0)
    # final Linear(., 1): VPU multiply + lane reduce instead of an N=1 matmul
    logit = jnp.sum(c * row(18, Dp2), axis=-1) + row(19, 1)                # (T, 6)
    m = jnp.max(logit, axis=-1, keepdims=True)
    e = jnp.exp(logit - m)
    probs = e * pl.reciprocal(jnp.sum(e, axis=-1, keepdims=True), approx=True)

    # ---- lane-dense fused output slab: (T, 384) ----
    parts = []
    for mode in range(NUM_MODES):
        parts.append(traj[:, mode, :])               # (T, 58)
        parts.append(ep[:, mode, :])                 # (T, 2)
    parts.append(probs)                              # (T, 6)
    parts.append(jnp.zeros((T, OUT_W - PRED_W - NUM_MODES), jnp.float32))  # (T, 18)
    out_ref[...] = jnp.concatenate(parts, axis=-1)


def make_params(key, D):
    """Deterministic synthetic parameters (PyTorch-Linear-like uniform init)."""
    Dp2 = D + 2
    keys = iter(jax.random.split(key, 64))

    def lin(fan_in, fan_out):
        kw, kb = next(keys), next(keys)
        s = 1.0 / np.sqrt(fan_in)
        w = jax.random.uniform(kw, (fan_in, fan_out), jnp.float32, -s, s)
        b = jax.random.uniform(kb, (1, fan_out), jnp.float32, -s, s)
        return w, b

    def lnp(dim):
        return jnp.ones((1, dim), jnp.float32), jnp.zeros((1, dim), jnp.float32)

    params = []
    # endpoint_predictor: MLP(D -> 12, hidden D, residual)
    w1, b1 = lin(D, D); g, be = lnp(D); w2, b2 = lin(2 * D, NUM_MODES * 2)
    params += [w1, b1, g, be, w2, b2]
    # endpoint_refiner: MLP(D+2 -> 2, hidden D+2, residual)
    w1, b1 = lin(Dp2, Dp2); g, be = lnp(Dp2); w2, b2 = lin(2 * Dp2, 2)
    params += [w1, b1, g, be, w2, b2]
    # get_trajectory: MLP(D+2 -> 58, hidden D+2, residual)
    w1, b1 = lin(Dp2, Dp2); g, be = lnp(Dp2); w2, b2 = lin(2 * Dp2, TRAJ_LEN * 2)
    params += [w1, b1, g, be, w2, b2]
    # cls: Linear/LN/ReLU, Linear/LN/ReLU, Linear(.,1)
    w1, b1 = lin(Dp2, Dp2); g1, be1 = lnp(Dp2)
    w2, b2 = lin(Dp2, Dp2); g2, be2 = lnp(Dp2)
    w3, b3 = lin(Dp2, 1)
    params += [w1, b1, g1, be1, w2, b2, g2, be2, w3, b3]
    return params


def _split_and_pack(params, D):
    """Split residual/layer-1 weights into x / endpoint / hidden row blocks and
    pack all biases / LN params / cls-w3 into one (20, VW) array."""
    (ep_w1, ep_b1, ep_g, ep_be, ep_w2, ep_b2,
     er_w1, er_b1, er_g, er_be, er_w2, er_b2,
     gt_w1, gt_b1, gt_g, gt_be, gt_w2, gt_b2,
     c_w1, c_b1, c_g1, c_be1, c_w2, c_b2, c_g2, c_be2, c_w3, c_b3) = params
    Dp2 = D + 2

    weights = [
        ep_w1, ep_w2[:D], ep_w2[D:],                             # ep: w1, w2_h, w2_x
        er_w1[:D], er_w1[D:],                                    # er: w1_x, w1_e
        er_w2[:Dp2], er_w2[Dp2:Dp2 + D], er_w2[Dp2 + D:],        # er: w2_h, w2_x, w2_e
        gt_w1[:D], gt_w1[D:],                                    # gt: w1_x, w1_e
        gt_w2[:Dp2], gt_w2[Dp2:Dp2 + D], gt_w2[Dp2 + D:],        # gt: w2_h, w2_x, w2_e
        c_w1[:D], c_w1[D:],                                      # cls: w1_x, w1_e
        c_w2,                                                    # cls: w2
    ]

    VW = max(2 * TRAJ_LEN, Dp2)
    rows = [ep_b1, ep_g, ep_be, ep_b2,
            er_b1, er_g, er_be, er_b2,
            gt_b1, gt_g, gt_be, gt_b2,
            c_b1, c_g1, c_be1, c_b2, c_g2, c_be2,
            c_w3.T, c_b3]
    vec = jnp.concatenate(
        [jnp.pad(r.reshape(1, -1), ((0, 0), (0, VW - r.size))) for r in rows], axis=0)
    return vec, weights


def trajectory_decoder_final(agent_features, params, TB=256):
    N, M, D = agent_features.shape
    B = N * M
    tb = min(TB, ((B + 7) // 8) * 8)           # big tile by default, shrink for tiny B
    Bp = ((B + tb - 1) // tb) * tb
    x = agent_features.reshape(B, D).astype(jnp.float32)
    x = jnp.pad(x, ((0, Bp - B), (0, 0)))

    vec, weights = _split_and_pack(params, D)

    in_specs = [pl.BlockSpec((tb, D), lambda i: (i, 0)),
                pl.BlockSpec(vec.shape, lambda i: (0, 0))]
    in_specs += [pl.BlockSpec(w.shape, lambda i: (0, 0)) for w in weights]

    slab = pl.pallas_call(
        functools.partial(decoder_kernel, D=D),
        grid=(Bp // tb,),
        in_specs=in_specs,
        out_specs=pl.BlockSpec((tb, OUT_W), lambda i: (i, 0)),
        out_shape=jax.ShapeDtypeStruct((Bp, OUT_W), jnp.float32),
        compiler_params=pltpu.CompilerParams(
            dimension_semantics=("parallel",),
            vmem_limit_bytes=32 * 1024 * 1024),
    )(x, vec, *weights)

    slab = slab[:B]
    preds = slab[:, :PRED_W].reshape(N, M, NUM_MODES, TRAJ_LEN + 1, 2)
    probs = slab[:, PRED_W:PRED_W + NUM_MODES].reshape(N, M, NUM_MODES)
    return preds, probs


# ---------------- pure-JAX reference (mirrors the PyTorch forward) ------------
def _ref_forward(agent_features, params):
    (ep_w1, ep_b1, ep_g, ep_be, ep_w2, ep_b2,
     er_w1, er_b1, er_g, er_be, er_w2, er_b2,
     gt_w1, gt_b1, gt_g, gt_be, gt_w2, gt_b2,
     c_w1, c_b1, c_g1, c_be1, c_w2, c_b2, c_g2, c_be2, c_w3, c_b3) = params

    def mlp(x, w1, b1, g, be, w2, b2):
        h = jnp.maximum(_ln(x @ w1 + b1, g, be), 0.0)
        return jnp.concatenate([h, x], axis=-1) @ w2 + b2

    N, M, D = agent_features.shape
    ep = mlp(agent_features, ep_w1, ep_b1, ep_g, ep_be, ep_w2, ep_b2).reshape(N, M, 6, 2)
    x_exp = jnp.broadcast_to(agent_features[:, :, None, :], (N, M, 6, D))
    off = mlp(jnp.concatenate([x_exp, ep], -1), er_w1, er_b1, er_g, er_be, er_w2, er_b2)
    ep = ep + off
    afe = jnp.concatenate([x_exp, ep], -1)
    traj = mlp(afe, gt_w1, gt_b1, gt_g, gt_be, gt_w2, gt_b2).reshape(N, M, 6, 29, 2)
    c = jnp.maximum(_ln(afe @ c_w1 + c_b1, c_g1, c_be1), 0.0)
    c = jnp.maximum(_ln(c @ c_w2 + c_b2, c_g2, c_be2), 0.0)
    logits = jax.nn.softmax((c @ c_w3 + c_b3).reshape(N, M, 6), axis=2)
    preds = jnp.concatenate([traj, ep[:, :, :, None, :]], axis=-2)
    return preds, logits


if __name__ == "__main__":
    key = jax.random.PRNGKey(0)
    k_param, k_x1, k_x2 = jax.random.split(key, 3)

    D = 32  # hidden_size
    params = make_params(k_param, D)

    # Small smoke-test shape (tiny tile path).
    N, M = 2, 3
    agent_features = jax.random.normal(k_x1, (N, M, D), jnp.float32)
    preds, probs = trajectory_decoder_final(agent_features, params)
    jax.block_until_ready((preds, probs))
    assert preds.shape == (N, M, 6, 30, 2)
    assert probs.shape == (N, M, 6)
    ref_preds, ref_probs = _ref_forward(agent_features, params)
    np.testing.assert_allclose(np.asarray(preds), np.asarray(ref_preds), rtol=5e-4, atol=5e-4)
    np.testing.assert_allclose(np.asarray(probs), np.asarray(ref_probs), rtol=2e-3, atol=2e-3)

    # Larger shape exercising the default 256-row tile, multi-iteration grid
    # and row padding.
    N2, M2 = 48, 11
    agent_features2 = jax.random.normal(k_x2, (N2, M2, D), jnp.float32)
    preds2, probs2 = trajectory_decoder_final(agent_features2, params)
    jax.block_until_ready((preds2, probs2))
    ref_preds2, ref_probs2 = _ref_forward(agent_features2, params)
    np.testing.assert_allclose(np.asarray(preds2), np.asarray(ref_preds2), rtol=5e-4, atol=5e-4)
    np.testing.assert_allclose(np.asarray(probs2), np.asarray(ref_probs2), rtol=2e-3, atol=2e-3)

    print("KERNEL_OK")
</pallas_src>

<mosaic_0001>
module attributes {stable_mosaic.version = 11 : i64} {
  func.func @decoder_kernel(%arg0: i32, %arg1: memref<8x32xf32, #tpu.memory_space<vmem>>, %arg2: memref<20x58xf32, #tpu.memory_space<vmem>>, %arg3: memref<32x32xf32, #tpu.memory_space<vmem>>, %arg4: memref<32x12xf32, #tpu.memory_space<vmem>>, %arg5: memref<32x12xf32, #tpu.memory_space<vmem>>, %arg6: memref<32x34xf32, #tpu.memory_space<vmem>>, %arg7: memref<2x34xf32, #tpu.memory_space<vmem>>, %arg8: memref<34x2xf32, #tpu.memory_space<vmem>>, %arg9: memref<32x2xf32, #tpu.memory_space<vmem>>, %arg10: memref<2x2xf32, #tpu.memory_space<vmem>>, %arg11: memref<32x34xf32, #tpu.memory_space<vmem>>, %arg12: memref<2x34xf32, #tpu.memory_space<vmem>>, %arg13: memref<34x58xf32, #tpu.memory_space<vmem>>, %arg14: memref<32x58xf32, #tpu.memory_space<vmem>>, %arg15: memref<2x58xf32, #tpu.memory_space<vmem>>, %arg16: memref<32x34xf32, #tpu.memory_space<vmem>>, %arg17: memref<2x34xf32, #tpu.memory_space<vmem>>, %arg18: memref<34x34xf32, #tpu.memory_space<vmem>>, %arg19: memref<8x384xf32, #tpu.memory_space<vmem>>) attributes {dimension_semantics = [#tpu.dimension_semantics<parallel>], iteration_bounds = array<i64: 1>, scalar_prefetch = 0 : i64, scratch_operands = 0 : i64, tpu.core_type = #tpu.core_type<tc>, window_params = [{transform_indices = @transform_0, window_bounds = array<i64: 8, 32>}, {pipeline_mode = #tpu.pipeline_mode<synchronous>, transform_indices = @transform_1, window_bounds = array<i64: 20, 58>}, {pipeline_mode = #tpu.pipeline_mode<synchronous>, transform_indices = @transform_2, window_bounds = array<i64: 32, 32>}, {pipeline_mode = #tpu.pipeline_mode<synchronous>, transform_indices = @transform_3, window_bounds = array<i64: 32, 12>}, {pipeline_mode = #tpu.pipeline_mode<synchronous>, transform_indices = @transform_4, window_bounds = array<i64: 32, 12>}, {pipeline_mode = #tpu.pipeline_mode<synchronous>, transform_indices = @transform_5, window_bounds = array<i64: 32, 34>}, {pipeline_mode = #tpu.pipeline_mode<synchronous>, transform_indices = @transform_6, window_bounds = array<i64: 2, 34>}, {pipeline_mode = #tpu.pipeline_mode<synchronous>, transform_indices = @transform_7, window_bounds = array<i64: 34, 2>}, {pipeline_mode = #tpu.pipeline_mode<synchronous>, transform_indices = @transform_8, window_bounds = array<i64: 32, 2>}, {pipeline_mode = #tpu.pipeline_mode<synchronous>, transform_indices = @transform_9, window_bounds = array<i64: 2, 2>}, {pipeline_mode = #tpu.pipeline_mode<synchronous>, transform_indices = @transform_10, window_bounds = array<i64: 32, 34>}, {pipeline_mode = #tpu.pipeline_mode<synchronous>, transform_indices = @transform_11, window_bounds = array<i64: 2, 34>}, {pipeline_mode = #tpu.pipeline_mode<synchronous>, transform_indices = @transform_12, window_bounds = array<i64: 34, 58>}, {pipeline_mode = #tpu.pipeline_mode<synchronous>, transform_indices = @transform_13, window_bounds = array<i64: 32, 58>}, {pipeline_mode = #tpu.pipeline_mode<synchronous>, transform_indices = @transform_14, window_bounds = array<i64: 2, 58>}, {pipeline_mode = #tpu.pipeline_mode<synchronous>, transform_indices = @transform_15, window_bounds = array<i64: 32, 34>}, {pipeline_mode = #tpu.pipeline_mode<synchronous>, transform_indices = @transform_16, window_bounds = array<i64: 2, 34>}, {pipeline_mode = #tpu.pipeline_mode<synchronous>, transform_indices = @transform_17, window_bounds = array<i64: 34, 34>}, {transform_indices = @transform_18, window_bounds = array<i64: 8, 384>}]} {
    %c0 = arith.constant 0 : index
    %c0_0 = arith.constant 0 : index
    %0 = vector.load %arg1[%c0, %c0_0] : memref<8x32xf32, #tpu.memory_space<vmem>>, vector<8x32xf32>
    %c0_1 = arith.constant 0 : index
    %c0_2 = arith.constant 0 : index
    %1 = vector.load %arg2[%c0_1, %c0_2] : memref<20x58xf32, #tpu.memory_space<vmem>>, vector<20x58xf32>
    %c0_3 = arith.constant 0 : index
    %c0_4 = arith.constant 0 : index
    %2 = vector.load %arg3[%c0_3, %c0_4] : memref<32x32xf32, #tpu.memory_space<vmem>>, vector<32x32xf32>
    %cst = arith.constant dense<0.000000e+00> : vector<8x32xf32>
    %3 = tpu.matmul %0, %2, %cst {dimension_numbers = #tpu.dot_dimension_numbers<[1], [0], [0], [1], [0, 0, 1, 1], [], []>} : vector<8x32xf32>, vector<32x32xf32>, vector<8x32xf32> -> vector<8x32xf32>
    %4 = vector.extract_strided_slice %1 {offsets = [0, 0], sizes = [1, 32], strides = [1, 1]} : vector<20x58xf32> to vector<1x32xf32>
    %5 = vector.broadcast %4 : vector<1x32xf32> to vector<8x32xf32>
    %6 = arith.addf %3, %5 : vector<8x32xf32>
    %7 = vector.extract_strided_slice %1 {offsets = [1, 0], sizes = [1, 32], strides = [1, 1]} : vector<20x58xf32> to vector<1x32xf32>
    %8 = vector.extract_strided_slice %1 {offsets = [2, 0], sizes = [1, 32], strides = [1, 1]} : vector<20x58xf32> to vector<1x32xf32>
    %cst_5 = arith.constant dense<0.000000e+00> : vector<8xf32>
    %9 = vector.multi_reduction <add>, %6, %cst_5 [1] : vector<8x32xf32> to vector<8xf32>
    %10 = vector.shape_cast %9 : vector<8xf32> to vector<8x1xf32>
    %cst_6 = arith.constant 3.200000e+01 : f32
    %11 = vector.broadcast %cst_6 : f32 to vector<8x1xf32>
    %12 = arith.divf %10, %11 : vector<8x1xf32>
    %13 = vector.broadcast %12 : vector<8x1xf32> to vector<8x32xf32>
    %14 = arith.subf %6, %13 : vector<8x32xf32>
    %15 = arith.mulf %14, %14 : vector<8x32xf32>
    %cst_7 = arith.constant dense<0.000000e+00> : vector<8xf32>
    %16 = vector.multi_reduction <add>, %15, %cst_7 [1] : vector<8x32xf32> to vector<8xf32>
    %17 = vector.shape_cast %16 : vector<8xf32> to vector<8x1xf32>
    %cst_8 = arith.constant 3.200000e+01 : f32
    %18 = vector.broadcast %cst_8 : f32 to vector<8x1xf32>
    %19 = arith.divf %17, %18 : vector<8x1xf32>
    %20 = vector.broadcast %12 : vector<8x1xf32> to vector<8x32xf32>
    %21 = arith.subf %6, %20 : vector<8x32xf32>
    %cst_9 = arith.constant 9.99999974E-6 : f32
    %22 = vector.broadcast %cst_9 : f32 to vector<8x1xf32>
    %23 = arith.addf %19, %22 : vector<8x1xf32>
    %24 = math.rsqrt %23 : vector<8x1xf32>
    %25 = vector.broadcast %24 : vector<8x1xf32> to vector<8x32xf32>
    %26 = arith.mulf %21, %25 : vector<8x32xf32>
    %27 = vector.broadcast %7 : vector<1x32xf32> to vector<8x32xf32>
    %28 = arith.mulf %26, %27 : vector<8x32xf32>
    %29 = vector.broadcast %8 : vector<1x32xf32> to vector<8x32xf32>
    %30 = arith.addf %28, %29 : vector<8x32xf32>
    %cst_10 = arith.constant 0.000000e+00 : f32
    %31 = vector.broadcast %cst_10 : f32 to vector<8x32xf32>
    %32 = arith.maximumf %30, %31 : vector<8x32xf32>
    %c0_11 = arith.constant 0 : index
    %c0_12 = arith.constant 0 : index
    %33 = vector.load %arg4[%c0_11, %c0_12] : memref<32x12xf32, #tpu.memory_space<vmem>>, vector<32x12xf32>
    %cst_13 = arith.constant dense<0.000000e+00> : vector<8x12xf32>
    %34 = tpu.matmul %32, %33, %cst_13 {dimension_numbers = #tpu.dot_dimension_numbers<[1], [0], [0], [1], [0, 0, 1, 1], [], []>} : vector<8x32xf32>, vector<32x12xf32>, vector<8x12xf32> -> vector<8x12xf32>
    %c0_14 = arith.constant 0 : index
    %c0_15 = arith.constant 0 : index
    %35 = vector.load %arg5[%c0_14, %c0_15] : memref<32x12xf32, #tpu.memory_space<vmem>>, vector<32x12xf32>
    %cst_16 = arith.constant dense<0.000000e+00> : vector<8x12xf32>
    %36 = tpu.matmul %0, %35, %cst_16 {dimension_numbers = #tpu.dot_dimension_numbers<[1], [0], [0], [1], [0, 0, 1, 1], [], []>} : vector<8x32xf32>, vector<32x12xf32>, vector<8x12xf32> -> vector<8x12xf32>
    %37 = arith.addf %34, %36 : vector<8x12xf32>
    %38 = vector.extract_strided_slice %1 {offsets = [3, 0], sizes = [1, 12], strides = [1, 1]} : vector<20x58xf32> to vector<1x12xf32>
    %39 = vector.broadcast %38 : vector<1x12xf32> to vector<8x12xf32>
    %40 = arith.addf %37, %39 : vector<8x12xf32>
    %41 = vector.shape_cast %40 : vector<8x12xf32> to vector<8x6x2xf32>
    %42 = vector.extract_strided_slice %1 {offsets = [4, 0], sizes = [1, 34], strides = [1, 1]} : vector<20x58xf32> to vector<1x34xf32>
    %43 = vector.extract_strided_slice %1 {offsets = [5, 0], sizes = [1, 34], strides = [1, 1]} : vector<20x58xf32> to vector<1x34xf32>
    %44 = vector.extract_strided_slice %1 {offsets = [6, 0], sizes = [1, 34], strides = [1, 1]} : vector<20x58xf32> to vector<1x34xf32>
    %45 = vector.extract_strided_slice %1 {offsets = [7, 0], sizes = [1, 2], strides = [1, 1]} : vector<20x58xf32> to vector<1x2xf32>
    %c0_17 = arith.constant 0 : index
    %c0_18 = arith.constant 0 : index
    %46 = vector.load %arg6[%c0_17, %c0_18] : memref<32x34xf32, #tpu.memory_space<vmem>>, vector<32x34xf32>
    %cst_19 = arith.constant dense<0.000000e+00> : vector<8x34xf32>
    %47 = tpu.matmul %0, %46, %cst_19 {dimension_numbers = #tpu.dot_dimension_numbers<[1], [0], [0], [1], [0, 0, 1, 1], [], []>} : vector<8x32xf32>, vector<32x34xf32>, vector<8x34xf32> -> vector<8x34xf32>
    %48 = vector.shape_cast %47 : vector<8x34xf32> to vector<8x1x34xf32>
    %c0_20 = arith.constant 0 : index
    %c0_21 = arith.constant 0 : index
    %49 = vector.load %arg7[%c0_20, %c0_21] : memref<2x34xf32, #tpu.memory_space<vmem>>, vector<2x34xf32>
    %50 = vector.extract_strided_slice %41 {offsets = [0, 0, 0], sizes = [8, 6, 1], strides = [1, 1, 1]} : vector<8x6x2xf32> to vector<8x6x1xf32>
    %51 = vector.extract_strided_slice %49 {offsets = [0, 0], sizes = [1, 34], strides = [1, 1]} : vector<2x34xf32> to vector<1x34xf32>
    %52 = vector.shape_cast %51 : vector<1x34xf32> to vector<1x1x34xf32>
    %53 = vector.broadcast %50 : vector<8x6x1xf32> to vector<8x6x34xf32>
    %54 = vector.broadcast %52 : vector<1x1x34xf32> to vector<8x6x34xf32>
    %55 = arith.mulf %53, %54 : vector<8x6x34xf32>
    %56 = vector.extract_strided_slice %41 {offsets = [0, 0, 1], sizes = [8, 6, 1], strides = [1, 1, 1]} : vector<8x6x2xf32> to vector<8x6x1xf32>
    %57 = vector.extract_strided_slice %49 {offsets = [1, 0], sizes = [1, 34], strides = [1, 1]} : vector<2x34xf32> to vector<1x34xf32>
    %58 = vector.shape_cast %57 : vector<1x34xf32> to vector<1x1x34xf32>
    %59 = vector.broadcast %56 : vector<8x6x1xf32> to vector<8x6x34xf32>
    %60 = vector.broadcast %58 : vector<1x1x34xf32> to vector<8x6x34xf32>
    %61 = arith.mulf %59, %60 : vector<8x6x34xf32>
    %62 = arith.addf %55, %61 : vector<8x6x34xf32>
    %63 = vector.broadcast %48 : vector<8x1x34xf32> to vector<8x6x34xf32>
    %64 = arith.addf %63, %62 : vector<8x6x34xf32>
    %65 = vector.shape_cast %42 : vector<1x34xf32> to vector<1x1x34xf32>
    %66 = vector.broadcast %65 : vector<1x1x34xf32> to vector<8x6x34xf32>
    %67 = arith.addf %64, %66 : vector<8x6x34xf32>
    %cst_22 = arith.constant dense<0.000000e+00> : vector<8x6xf32>
    %68 = vector.multi_reduction <add>, %67, %cst_22 [2] : vector<8x6x34xf32> to vector<8x6xf32>
    %69 = vector.shape_cast %68 : vector<8x6xf32> to vector<8x6x1xf32>
    %cst_23 = arith.constant 3.400000e+01 : f32
    %70 = vector.broadcast %cst_23 : f32 to vector<8x6x1xf32>
    %71 = arith.divf %69, %70 : vector<8x6x1xf32>
    %72 = vector.broadcast %71 : vector<8x6x1xf32> to vector<8x6x34xf32>
    %73 = arith.subf %67, %72 : vector<8x6x34xf32>
    %74 = arith.mulf %73, %73 : vector<8x6x34xf32>
    %cst_24 = arith.constant dense<0.000000e+00> : vector<8x6xf32>
    %75 = vector.multi_reduction <add>, %74, %cst_24 [2] : vector<8x6x34xf32> to vector<8x6xf32>
    %76 = vector.shape_cast %75 : vector<8x6xf32> to vector<8x6x1xf32>
    %cst_25 = arith.constant 3.400000e+01 : f32
    %77 = vector.broadcast %cst_25 : f32 to vector<8x6x1xf32>
    %78 = arith.divf %76, %77 : vector<8x6x1xf32>
    %79 = vector.broadcast %71 : vector<8x6x1xf32> to vector<8x6x34xf32>
    %80 = arith.subf %67, %79 : vector<8x6x34xf32>
    %cst_26 = arith.constant 9.99999974E-6 : f32
    %81 = vector.broadcast %cst_26 : f32 to vector<8x6x1xf32>
    %82 = arith.addf %78, %81 : vector<8x6x1xf32>
    %83 = math.rsqrt %82 : vector<8x6x1xf32>
    %84 = vector.broadcast %83 : vector<8x6x1xf32> to vector<8x6x34xf32>
    %85 = arith.mulf %80, %84 : vector<8x6x34xf32>
    %86 = vector.shape_cast %43 : vector<1x34xf32> to vector<1x1x34xf32>
    %87 = vector.broadcast %86 : vector<1x1x34xf32> to vector<8x6x34xf32>
    %88 = arith.mulf %85, %87 : vector<8x6x34xf32>
    %89 = vector.shape_cast %44 : vector<1x34xf32> to vector<1x1x34xf32>
    %90 = vector.broadcast %89 : vector<1x1x34xf32> to vector<8x6x34xf32>
    %91 = arith.addf %88, %90 : vector<8x6x34xf32>
    %cst_27 = arith.constant 0.000000e+00 : f32
    %92 = vector.broadcast %cst_27 : f32 to vector<8x6x34xf32>
    %93 = arith.maximumf %91, %92 : vector<8x6x34xf32>
    %94 = vector.shape_cast %93 : vector<8x6x34xf32> to vector<48x34xf32>
    %c0_28 = arith.constant 0 : index
    %c0_29 = arith.constant 0 : index
    %95 = vector.load %arg8[%c0_28, %c0_29] : memref<34x2xf32, #tpu.memory_space<vmem>>, vector<34x2xf32>
    %cst_30 = arith.constant dense<0.000000e+00> : vector<48x2xf32>
    %96 = tpu.matmul %94, %95, %cst_30 {dimension_numbers = #tpu.dot_dimension_numbers<[1], [0], [0], [1], [0, 0, 1, 1], [], []>} : vector<48x34xf32>, vector<34x2xf32>, vector<48x2xf32> -> vector<48x2xf32>
    %97 = vector.shape_cast %96 : vector<48x2xf32> to vector<8x6x2xf32>
    %c0_31 = arith.constant 0 : index
    %c0_32 = arith.constant 0 : index
    %98 = vector.load %arg9[%c0_31, %c0_32] : memref<32x2xf32, #tpu.memory_space<vmem>>, vector<32x2xf32>
    %cst_33 = arith.constant dense<0.000000e+00> : vector<8x2xf32>
    %99 = tpu.matmul %0, %98, %cst_33 {dimension_numbers = #tpu.dot_dimension_numbers<[1], [0], [0], [1], [0, 0, 1, 1], [], []>} : vector<8x32xf32>, vector<32x2xf32>, vector<8x2xf32> -> vector<8x2xf32>
    %100 = vector.shape_cast %99 : vector<8x2xf32> to vector<8x1x2xf32>
    %101 = vector.broadcast %100 : vector<8x1x2xf32> to vector<8x6x2xf32>
    %102 = arith.addf %97, %101 : vector<8x6x2xf32>
    %c0_34 = arith.constant 0 : index
    %c0_35 = arith.constant 0 : index
    %103 = vector.load %arg10[%c0_34, %c0_35] : memref<2x2xf32, #tpu.memory_space<vmem>>, vector<2x2xf32>
    %104 = vector.extract_strided_slice %41 {offsets = [0, 0, 0], sizes = [8, 6, 1], strides = [1, 1, 1]} : vector<8x6x2xf32> to vector<8x6x1xf32>
    %105 = vector.extract_strided_slice %103 {offsets = [0, 0], sizes = [1, 2], strides = [1, 1]} : vector<2x2xf32> to vector<1x2xf32>
    %106 = vector.shape_cast %105 : vector<1x2xf32> to vector<1x1x2xf32>
    %107 = vector.broadcast %104 : vector<8x6x1xf32> to vector<8x6x2xf32>
    %108 = vector.broadcast %106 : vector<1x1x2xf32> to vector<8x6x2xf32>
    %109 = arith.mulf %107, %108 : vector<8x6x2xf32>
    %110 = vector.extract_strided_slice %41 {offsets = [0, 0, 1], sizes = [8, 6, 1], strides = [1, 1, 1]} : vector<8x6x2xf32> to vector<8x6x1xf32>
    %111 = vector.extract_strided_slice %103 {offsets = [1, 0], sizes = [1, 2], strides = [1, 1]} : vector<2x2xf32> to vector<1x2xf32>
    %112 = vector.shape_cast %111 : vector<1x2xf32> to vector<1x1x2xf32>
    %113 = vector.broadcast %110 : vector<8x6x1xf32> to vector<8x6x2xf32>
    %114 = vector.broadcast %112 : vector<1x1x2xf32> to vector<8x6x2xf32>
    %115 = arith.mulf %113, %114 : vector<8x6x2xf32>
    %116 = arith.addf %109, %115 : vector<8x6x2xf32>
    %117 = arith.addf %102, %116 : vector<8x6x2xf32>
    %118 = vector.shape_cast %45 : vector<1x2xf32> to vector<1x1x2xf32>
    %119 = vector.broadcast %118 : vector<1x1x2xf32> to vector<8x6x2xf32>
    %120 = arith.addf %117, %119 : vector<8x6x2xf32>
    %121 = arith.addf %41, %120 : vector<8x6x2xf32>
    %122 = vector.extract_strided_slice %1 {offsets = [8, 0], sizes = [1, 34], strides = [1, 1]} : vector<20x58xf32> to vector<1x34xf32>
    %123 = vector.extract_strided_slice %1 {offsets = [9, 0], sizes = [1, 34], strides = [1, 1]} : vector<20x58xf32> to vector<1x34xf32>
    %124 = vector.extract_strided_slice %1 {offsets = [10, 0], sizes = [1, 34], strides = [1, 1]} : vector<20x58xf32> to vector<1x34xf32>
    %125 = vector.extract_strided_slice %1 {offsets = [11, 0], sizes = [1, 58], strides = [1, 1]} : vector<20x58xf32> to vector<1x58xf32>
    %c0_36 = arith.constant 0 : index
    %c0_37 = arith.constant 0 : index
    %126 = vector.load %arg11[%c0_36, %c0_37] : memref<32x34xf32, #tpu.memory_space<vmem>>, vector<32x34xf32>
    %cst_38 = arith.constant dense<0.000000e+00> : vector<8x34xf32>
    %127 = tpu.matmul %0, %126, %cst_38 {dimension_numbers = #tpu.dot_dimension_numbers<[1], [0], [0], [1], [0, 0, 1, 1], [], []>} : vector<8x32xf32>, vector<32x34xf32>, vector<8x34xf32> -> vector<8x34xf32>
    %128 = vector.shape_cast %127 : vector<8x34xf32> to vector<8x1x34xf32>
    %c0_39 = arith.constant 0 : index
    %c0_40 = arith.constant 0 : index
    %129 = vector.load %arg12[%c0_39, %c0_40] : memref<2x34xf32, #tpu.memory_space<vmem>>, vector<2x34xf32>
    %130 = vector.extract_strided_slice %121 {offsets = [0, 0, 0], sizes = [8, 6, 1], strides = [1, 1, 1]} : vector<8x6x2xf32> to vector<8x6x1xf32>
    %131 = vector.extract_strided_slice %129 {offsets = [0, 0], sizes = [1, 34], strides = [1, 1]} : vector<2x34xf32> to vector<1x34xf32>
    %132 = vector.shape_cast %131 : vector<1x34xf32> to vector<1x1x34xf32>
    %133 = vector.broadcast %130 : vector<8x6x1xf32> to vector<8x6x34xf32>
    %134 = vector.broadcast %132 : vector<1x1x34xf32> to vector<8x6x34xf32>
    %135 = arith.mulf %133, %134 : vector<8x6x34xf32>
    %136 = vector.extract_strided_slice %121 {offsets = [0, 0, 1], sizes = [8, 6, 1], strides = [1, 1, 1]} : vector<8x6x2xf32> to vector<8x6x1xf32>
    %137 = vector.extract_strided_slice %129 {offsets = [1, 0], sizes = [1, 34], strides = [1, 1]} : vector<2x34xf32> to vector<1x34xf32>
    %138 = vector.shape_cast %137 : vector<1x34xf32> to vector<1x1x34xf32>
    %139 = vector.broadcast %136 : vector<8x6x1xf32> to vector<8x6x34xf32>
    %140 = vector.broadcast %138 : vector<1x1x34xf32> to vector<8x6x34xf32>
    %141 = arith.mulf %139, %140 : vector<8x6x34xf32>
    %142 = arith.addf %135, %141 : vector<8x6x34xf32>
    %143 = vector.broadcast %128 : vector<8x1x34xf32> to vector<8x6x34xf32>
    %144 = arith.addf %143, %142 : vector<8x6x34xf32>
    %145 = vector.shape_cast %122 : vector<1x34xf32> to vector<1x1x34xf32>
    %146 = vector.broadcast %145 : vector<1x1x34xf32> to vector<8x6x34xf32>
    %147 = arith.addf %144, %146 : vector<8x6x34xf32>
    %cst_41 = arith.constant dense<0.000000e+00> : vector<8x6xf32>
    %148 = vector.multi_reduction <add>, %147, %cst_41 [2] : vector<8x6x34xf32> to vector<8x6xf32>
    %149 = vector.shape_cast %148 : vector<8x6xf32> to vector<8x6x1xf32>
    %cst_42 = arith.constant 3.400000e+01 : f32
    %150 = vector.broadcast %cst_42 : f32 to vector<8x6x1xf32>
    %151 = arith.divf %149, %150 : vector<8x6x1xf32>
    %152 = vector.broadcast %151 : vector<8x6x1xf32> to vector<8x6x34xf32>
    %153 = arith.subf %147, %152 : vector<8x6x34xf32>
    %154 = arith.mulf %153, %153 : vector<8x6x34xf32>
    %cst_43 = arith.constant dense<0.000000e+00> : vector<8x6xf32>
    %155 = vector.multi_reduction <add>, %154, %cst_43 [2] : vector<8x6x34xf32> to vector<8x6xf32>
    %156 = vector.shape_cast %155 : vector<8x6xf32> to vector<8x6x1xf32>
    %cst_44 = arith.constant 3.400000e+01 : f32
    %157 = vector.broadcast %cst_44 : f32 to vector<8x6x1xf32>
    %158 = arith.divf %156, %157 : vector<8x6x1xf32>
    %159 = vector.broadcast %151 : vector<8x6x1xf32> to vector<8x6x34xf32>
    %160 = arith.subf %147, %159 : vector<8x6x34xf32>
    %cst_45 = arith.constant 9.99999974E-6 : f32
    %161 = vector.broadcast %cst_45 : f32 to vector<8x6x1xf32>
    %162 = arith.addf %158, %161 : vector<8x6x1xf32>
    %163 = math.rsqrt %162 : vector<8x6x1xf32>
    %164 = vector.broadcast %163 : vector<8x6x1xf32> to vector<8x6x34xf32>
    %165 = arith.mulf %160, %164 : vector<8x6x34xf32>
    %166 = vector.shape_cast %123 : vector<1x34xf32> to vector<1x1x34xf32>
    %167 = vector.broadcast %166 : vector<1x1x34xf32> to vector<8x6x34xf32>
    %168 = arith.mulf %165, %167 : vector<8x6x34xf32>
    %169 = vector.shape_cast %124 : vector<1x34xf32> to vector<1x1x34xf32>
    %170 = vector.broadcast %169 : vector<1x1x34xf32> to vector<8x6x34xf32>
    %171 = arith.addf %168, %170 : vector<8x6x34xf32>
    %cst_46 = arith.constant 0.000000e+00 : f32
    %172 = vector.broadcast %cst_46 : f32 to vector<8x6x34xf32>
    %173 = arith.maximumf %171, %172 : vector<8x6x34xf32>
    %174 = vector.shape_cast %173 : vector<8x6x34xf32> to vector<48x34xf32>
    %c0_47 = arith.constant 0 : index
    %c0_48 = arith.constant 0 : index
    %175 = vector.load %arg13[%c0_47, %c0_48] : memref<34x58xf32, #tpu.memory_space<vmem>>, vector<34x58xf32>
    %cst_49 = arith.constant dense<0.000000e+00> : vector<48x58xf32>
    %176 = tpu.matmul %174, %175, %cst_49 {dimension_numbers = #tpu.dot_dimension_numbers<[1], [0], [0], [1], [0, 0, 1, 1], [], []>} : vector<48x34xf32>, vector<34x58xf32>, vector<48x58xf32> -> vector<48x58xf32>
    %177 = vector.shape_cast %176 : vector<48x58xf32> to vector<8x6x58xf32>
    %c0_50 = arith.constant 0 : index
    %c0_51 = arith.constant 0 : index
    %178 = vector.load %arg14[%c0_50, %c0_51] : memref<32x58xf32, #tpu.memory_space<vmem>>, vector<32x58xf32>
    %cst_52 = arith.constant dense<0.000000e+00> : vector<8x58xf32>
    %179 = tpu.matmul %0, %178, %cst_52 {dimension_numbers = #tpu.dot_dimension_numbers<[1], [0], [0], [1], [0, 0, 1, 1], [], []>} : vector<8x32xf32>, vector<32x58xf32>, vector<8x58xf32> -> vector<8x58xf32>
    %180 = vector.shape_cast %179 : vector<8x58xf32> to vector<8x1x58xf32>
    %181 = vector.broadcast %180 : vector<8x1x58xf32> to vector<8x6x58xf32>
    %182 = arith.addf %177, %181 : vector<8x6x58xf32>
    %c0_53 = arith.constant 0 : index
    %c0_54 = arith.constant 0 : index
    %183 = vector.load %arg15[%c0_53, %c0_54] : memref<2x58xf32, #tpu.memory_space<vmem>>, vector<2x58xf32>
    %184 = vector.extract_strided_slice %121 {offsets = [0, 0, 0], sizes = [8, 6, 1], strides = [1, 1, 1]} : vector<8x6x2xf32> to vector<8x6x1xf32>
    %185 = vector.extract_strided_slice %183 {offsets = [0, 0], sizes = [1, 58], strides = [1, 1]} : vector<2x58xf32> to vector<1x58xf32>
    %186 = vector.shape_cast %185 : vector<1x58xf32> to vector<1x1x58xf32>
    %187 = vector.broadcast %184 : vector<8x6x1xf32> to vector<8x6x58xf32>
    %188 = vector.broadcast %186 : vector<1x1x58xf32> to vector<8x6x58xf32>
    %189 = arith.mulf %187, %188 : vector<8x6x58xf32>
    %190 = vector.extract_strided_slice %121 {offsets = [0, 0, 1], sizes = [8, 6, 1], strides = [1, 1, 1]} : vector<8x6x2xf32> to vector<8x6x1xf32>
    %191 = vector.extract_strided_slice %183 {offsets = [1, 0], sizes = [1, 58], strides = [1, 1]} : vector<2x58xf32> to vector<1x58xf32>
    %192 = vector.shape_cast %191 : vector<1x58xf32> to vector<1x1x58xf32>
    %193 = vector.broadcast %190 : vector<8x6x1xf32> to vector<8x6x58xf32>
    %194 = vector.broadcast %192 : vector<1x1x58xf32> to vector<8x6x58xf32>
    %195 = arith.mulf %193, %194 : vector<8x6x58xf32>
    %196 = arith.addf %189, %195 : vector<8x6x58xf32>
    %197 = arith.addf %182, %196 : vector<8x6x58xf32>
    %198 = vector.shape_cast %125 : vector<1x58xf32> to vector<1x1x58xf32>
    %199 = vector.broadcast %198 : vector<1x1x58xf32> to vector<8x6x58xf32>
    %200 = arith.addf %197, %199 : vector<8x6x58xf32>
    %c0_55 = arith.constant 0 : index
    %c0_56 = arith.constant 0 : index
    %201 = vector.load %arg16[%c0_55, %c0_56] : memref<32x34xf32, #tpu.memory_space<vmem>>, vector<32x34xf32>
    %cst_57 = arith.constant dense<0.000000e+00> : vector<8x34xf32>
    %202 = tpu.matmul %0, %201, %cst_57 {dimension_numbers = #tpu.dot_dimension_numbers<[1], [0], [0], [1], [0, 0, 1, 1], [], []>} : vector<8x32xf32>, vector<32x34xf32>, vector<8x34xf32> -> vector<8x34xf32>
    %203 = vector.shape_cast %202 : vector<8x34xf32> to vector<8x1x34xf32>
    %c0_58 = arith.constant 0 : index
    %c0_59 = arith.constant 0 : index
    %204 = vector.load %arg17[%c0_58, %c0_59] : memref<2x34xf32, #tpu.memory_space<vmem>>, vector<2x34xf32>
    %205 = vector.extract_strided_slice %121 {offsets = [0, 0, 0], sizes = [8, 6, 1], strides = [1, 1, 1]} : vector<8x6x2xf32> to vector<8x6x1xf32>
    %206 = vector.extract_strided_slice %204 {offsets = [0, 0], sizes = [1, 34], strides = [1, 1]} : vector<2x34xf32> to vector<1x34xf32>
    %207 = vector.shape_cast %206 : vector<1x34xf32> to vector<1x1x34xf32>
    %208 = vector.broadcast %205 : vector<8x6x1xf32> to vector<8x6x34xf32>
    %209 = vector.broadcast %207 : vector<1x1x34xf32> to vector<8x6x34xf32>
    %210 = arith.mulf %208, %209 : vector<8x6x34xf32>
    %211 = vector.extract_strided_slice %121 {offsets = [0, 0, 1], sizes = [8, 6, 1], strides = [1, 1, 1]} : vector<8x6x2xf32> to vector<8x6x1xf32>
    %212 = vector.extract_strided_slice %204 {offsets = [1, 0], sizes = [1, 34], strides = [1, 1]} : vector<2x34xf32> to vector<1x34xf32>
    %213 = vector.shape_cast %212 : vector<1x34xf32> to vector<1x1x34xf32>
    %214 = vector.broadcast %211 : vector<8x6x1xf32> to vector<8x6x34xf32>
    %215 = vector.broadcast %213 : vector<1x1x34xf32> to vector<8x6x34xf32>
    %216 = arith.mulf %214, %215 : vector<8x6x34xf32>
    %217 = arith.addf %210, %216 : vector<8x6x34xf32>
    %218 = vector.broadcast %203 : vector<8x1x34xf32> to vector<8x6x34xf32>
    %219 = arith.addf %218, %217 : vector<8x6x34xf32>
    %220 = vector.extract_strided_slice %1 {offsets = [12, 0], sizes = [1, 34], strides = [1, 1]} : vector<20x58xf32> to vector<1x34xf32>
    %221 = vector.shape_cast %220 : vector<1x34xf32> to vector<1x1x34xf32>
    %222 = vector.broadcast %221 : vector<1x1x34xf32> to vector<8x6x34xf32>
    %223 = arith.addf %219, %222 : vector<8x6x34xf32>
    %224 = vector.extract_strided_slice %1 {offsets = [13, 0], sizes = [1, 34], strides = [1, 1]} : vector<20x58xf32> to vector<1x34xf32>
    %225 = vector.extract_strided_slice %1 {offsets = [14, 0], sizes = [1, 34], strides = [1, 1]} : vector<20x58xf32> to vector<1x34xf32>
    %cst_60 = arith.constant dense<0.000000e+00> : vector<8x6xf32>
    %226 = vector.multi_reduction <add>, %223, %cst_60 [2] : vector<8x6x34xf32> to vector<8x6xf32>
    %227 = vector.shape_cast %226 : vector<8x6xf32> to vector<8x6x1xf32>
    %cst_61 = arith.constant 3.400000e+01 : f32
    %228 = vector.broadcast %cst_61 : f32 to vector<8x6x1xf32>
    %229 = arith.divf %227, %228 : vector<8x6x1xf32>
    %230 = vector.broadcast %229 : vector<8x6x1xf32> to vector<8x6x34xf32>
    %231 = arith.subf %223, %230 : vector<8x6x34xf32>
    %232 = arith.mulf %231, %231 : vector<8x6x34xf32>
    %cst_62 = arith.constant dense<0.000000e+00> : vector<8x6xf32>
    %233 = vector.multi_reduction <add>, %232, %cst_62 [2] : vector<8x6x34xf32> to vector<8x6xf32>
    %234 = vector.shape_cast %233 : vector<8x6xf32> to vector<8x6x1xf32>
    %cst_63 = arith.constant 3.400000e+01 : f32
    %235 = vector.broadcast %cst_63 : f32 to vector<8x6x1xf32>
    %236 = arith.divf %234, %235 : vector<8x6x1xf32>
    %237 = vector.broadcast %229 : vector<8x6x1xf32> to vector<8x6x34xf32>
    %238 = arith.subf %223, %237 : vector<8x6x34xf32>
    %cst_64 = arith.constant 9.99999974E-6 : f32
    %239 = vector.broadcast %cst_64 : f32 to vector<8x6x1xf32>
    %240 = arith.addf %236, %239 : vector<8x6x1xf32>
    %241 = math.rsqrt %240 : vector<8x6x1xf32>
    %242 = vector.broadcast %241 : vector<8x6x1xf32> to vector<8x6x34xf32>
    %243 = arith.mulf %238, %242 : vector<8x6x34xf32>
    %244 = vector.shape_cast %224 : vector<1x34xf32> to vector<1x1x34xf32>
    %245 = vector.broadcast %244 : vector<1x1x34xf32> to vector<8x6x34xf32>
    %246 = arith.mulf %243, %245 : vector<8x6x34xf32>
    %247 = vector.shape_cast %225 : vector<1x34xf32> to vector<1x1x34xf32>
    %248 = vector.broadcast %247 : vector<1x1x34xf32> to vector<8x6x34xf32>
    %249 = arith.addf %246, %248 : vector<8x6x34xf32>
    %cst_65 = arith.constant 0.000000e+00 : f32
    %250 = vector.broadcast %cst_65 : f32 to vector<8x6x34xf32>
    %251 = arith.maximumf %249, %250 : vector<8x6x34xf32>
    %252 = vector.shape_cast %251 : vector<8x6x34xf32> to vector<48x34xf32>
    %c0_66 = arith.constant 0 : index
    %c0_67 = arith.constant 0 : index
    %253 = vector.load %arg18[%c0_66, %c0_67] : memref<34x34xf32, #tpu.memory_space<vmem>>, vector<34x34xf32>
    %cst_68 = arith.constant dense<0.000000e+00> : vector<48x34xf32>
    %254 = tpu.matmul %252, %253, %cst_68 {dimension_numbers = #tpu.dot_dimension_numbers<[1], [0], [0], [1], [0, 0, 1, 1], [], []>} : vector<48x34xf32>, vector<34x34xf32>, vector<48x34xf32> -> vector<48x34xf32>
    %255 = vector.shape_cast %254 : vector<48x34xf32> to vector<8x6x34xf32>
    %256 = vector.extract_strided_slice %1 {offsets = [15, 0], sizes = [1, 34], strides = [1, 1]} : vector<20x58xf32> to vector<1x34xf32>
    %257 = vector.shape_cast %256 : vector<1x34xf32> to vector<1x1x34xf32>
    %258 = vector.broadcast %257 : vector<1x1x34xf32> to vector<8x6x34xf32>
    %259 = arith.addf %255, %258 : vector<8x6x34xf32>
    %260 = vector.extract_strided_slice %1 {offsets = [16, 0], sizes = [1, 34], strides = [1, 1]} : vector<20x58xf32> to vector<1x34xf32>
    %261 = vector.extract_strided_slice %1 {offsets = [17, 0], sizes = [1, 34], strides = [1, 1]} : vector<20x58xf32> to vector<1x34xf32>
    %cst_69 = arith.constant dense<0.000000e+00> : vector<8x6xf32>
    %262 = vector.multi_reduction <add>, %259, %cst_69 [2] : vector<8x6x34xf32> to vector<8x6xf32>
    %263 = vector.shape_cast %262 : vector<8x6xf32> to vector<8x6x1xf32>
    %cst_70 = arith.constant 3.400000e+01 : f32
    %264 = vector.broadcast %cst_70 : f32 to vector<8x6x1xf32>
    %265 = arith.divf %263, %264 : vector<8x6x1xf32>
    %266 = vector.broadcast %265 : vector<8x6x1xf32> to vector<8x6x34xf32>
    %267 = arith.subf %259, %266 : vector<8x6x34xf32>
    %268 = arith.mulf %267, %267 : vector<8x6x34xf32>
    %cst_71 = arith.constant dense<0.000000e+00> : vector<8x6xf32>
    %269 = vector.multi_reduction <add>, %268, %cst_71 [2] : vector<8x6x34xf32> to vector<8x6xf32>
    %270 = vector.shape_cast %269 : vector<8x6xf32> to vector<8x6x1xf32>
    %cst_72 = arith.constant 3.400000e+01 : f32
    %271 = vector.broadcast %cst_72 : f32 to vector<8x6x1xf32>
    %272 = arith.divf %270, %271 : vector<8x6x1xf32>
    %273 = vector.broadcast %265 : vector<8x6x1xf32> to vector<8x6x34xf32>
    %274 = arith.subf %259, %273 : vector<8x6x34xf32>
    %cst_73 = arith.constant 9.99999974E-6 : f32
    %275 = vector.broadcast %cst_73 : f32 to vector<8x6x1xf32>
    %276 = arith.addf %272, %275 : vector<8x6x1xf32>
    %277 = math.rsqrt %276 : vector<8x6x1xf32>
    %278 = vector.broadcast %277 : vector<8x6x1xf32> to vector<8x6x34xf32>
    %279 = arith.mulf %274, %278 : vector<8x6x34xf32>
    %280 = vector.shape_cast %260 : vector<1x34xf32> to vector<1x1x34xf32>
    %281 = vector.broadcast %280 : vector<1x1x34xf32> to vector<8x6x34xf32>
    %282 = arith.mulf %279, %281 : vector<8x6x34xf32>
    %283 = vector.shape_cast %261 : vector<1x34xf32> to vector<1x1x34xf32>
    %284 = vector.broadcast %283 : vector<1x1x34xf32> to vector<8x6x34xf32>
    %285 = arith.addf %282, %284 : vector<8x6x34xf32>
    %cst_74 = arith.constant 0.000000e+00 : f32
    %286 = vector.broadcast %cst_74 : f32 to vector<8x6x34xf32>
    %287 = arith.maximumf %285, %286 : vector<8x6x34xf32>
    %288 = vector.extract_strided_slice %1 {offsets = [18, 0], sizes = [1, 34], strides = [1, 1]} : vector<20x58xf32> to vector<1x34xf32>
    %289 = vector.shape_cast %288 : vector<1x34xf32> to vector<1x1x34xf32>
    %290 = vector.broadcast %289 : vector<1x1x34xf32> to vector<8x6x34xf32>
    %291 = arith.mulf %287, %290 : vector<8x6x34xf32>
    %cst_75 = arith.constant dense<0.000000e+00> : vector<8x6xf32>
    %292 = vector.multi_reduction <add>, %291, %cst_75 [2] : vector<8x6x34xf32> to vector<8x6xf32>
    %293 = vector.extract_strided_slice %1 {offsets = [19, 0], sizes = [1, 1], strides = [1, 1]} : vector<20x58xf32> to vector<1x1xf32>
    %294 = vector.broadcast %293 : vector<1x1xf32> to vector<8x6xf32>
    %295 = arith.addf %292, %294 : vector<8x6xf32>
    %cst_76 = arith.constant dense<0xFF800000> : vector<8xf32>
    %296 = vector.multi_reduction <maximumf>, %295, %cst_76 [1] : vector<8x6xf32> to vector<8xf32>
    %297 = vector.shape_cast %296 : vector<8xf32> to vector<8x1xf32>
    %298 = vector.broadcast %297 : vector<8x1xf32> to vector<8x6xf32>
    %299 = arith.subf %295, %298 : vector<8x6xf32>
    %300 = math.exp %299 : vector<8x6xf32>
    %cst_77 = arith.constant dense<0.000000e+00> : vector<8xf32>
    %301 = vector.multi_reduction <add>, %300, %cst_77 [1] : vector<8x6xf32> to vector<8xf32>
    %302 = vector.shape_cast %301 : vector<8xf32> to vector<8x1xf32>
    %303 = tpu.reciprocal %302 {approx = true} : vector<8x1xf32> -> vector<8x1xf32>
    %304 = vector.broadcast %303 : vector<8x1xf32> to vector<8x6xf32>
    %305 = arith.mulf %300, %304 : vector<8x6xf32>
    %306 = vector.extract_strided_slice %200 {offsets = [0, 0, 0], sizes = [8, 1, 58], strides = [1, 1, 1]} : vector<8x6x58xf32> to vector<8x1x58xf32>
    %307 = vector.shape_cast %306 : vector<8x1x58xf32> to vector<8x58xf32>
    %308 = vector.extract_strided_slice %121 {offsets = [0, 0, 0], sizes = [8, 1, 2], strides = [1, 1, 1]} : vector<8x6x2xf32> to vector<8x1x2xf32>
    %309 = vector.shape_cast %308 : vector<8x1x2xf32> to vector<8x2xf32>
    %310 = vector.extract_strided_slice %200 {offsets = [0, 1, 0], sizes = [8, 1, 58], strides = [1, 1, 1]} : vector<8x6x58xf32> to vector<8x1x58xf32>
    %311 = vector.shape_cast %310 : vector<8x1x58xf32> to vector<8x58xf32>
    %312 = vector.extract_strided_slice %121 {offsets = [0, 1, 0], sizes = [8, 1, 2], strides = [1, 1, 1]} : vector<8x6x2xf32> to vector<8x1x2xf32>
    %313 = vector.shape_cast %312 : vector<8x1x2xf32> to vector<8x2xf32>
    %314 = vector.extract_strided_slice %200 {offsets = [0, 2, 0], sizes = [8, 1, 58], strides = [1, 1, 1]} : vector<8x6x58xf32> to vector<8x1x58xf32>
    %315 = vector.shape_cast %314 : vector<8x1x58xf32> to vector<8x58xf32>
    %316 = vector.extract_strided_slice %121 {offsets = [0, 2, 0], sizes = [8, 1, 2], strides = [1, 1, 1]} : vector<8x6x2xf32> to vector<8x1x2xf32>
    %317 = vector.shape_cast %316 : vector<8x1x2xf32> to vector<8x2xf32>
    %318 = vector.extract_strided_slice %200 {offsets = [0, 3, 0], sizes = [8, 1, 58], strides = [1, 1, 1]} : vector<8x6x58xf32> to vector<8x1x58xf32>
    %319 = vector.shape_cast %318 : vector<8x1x58xf32> to vector<8x58xf32>
    %320 = vector.extract_strided_slice %121 {offsets = [0, 3, 0], sizes = [8, 1, 2], strides = [1, 1, 1]} : vector<8x6x2xf32> to vector<8x1x2xf32>
    %321 = vector.shape_cast %320 : vector<8x1x2xf32> to vector<8x2xf32>
    %322 = vector.extract_strided_slice %200 {offsets = [0, 4, 0], sizes = [8, 1, 58], strides = [1, 1, 1]} : vector<8x6x58xf32> to vector<8x1x58xf32>
    %323 = vector.shape_cast %322 : vector<8x1x58xf32> to vector<8x58xf32>
    %324 = vector.extract_strided_slice %121 {offsets = [0, 4, 0], sizes = [8, 1, 2], strides = [1, 1, 1]} : vector<8x6x2xf32> to vector<8x1x2xf32>
    %325 = vector.shape_cast %324 : vector<8x1x2xf32> to vector<8x2xf32>
    %326 = vector.extract_strided_slice %200 {offsets = [0, 5, 0], sizes = [8, 1, 58], strides = [1, 1, 1]} : vector<8x6x58xf32> to vector<8x1x58xf32>
    %327 = vector.shape_cast %326 : vector<8x1x58xf32> to vector<8x58xf32>
    %328 = vector.extract_strided_slice %121 {offsets = [0, 5, 0], sizes = [8, 1, 2], strides = [1, 1, 1]} : vector<8x6x2xf32> to vector<8x1x2xf32>
    %329 = vector.shape_cast %328 : vector<8x1x2xf32> to vector<8x2xf32>
    %cst_78 = arith.constant 0.000000e+00 : f32
    %330 = vector.broadcast %cst_78 : f32 to vector<8x18xf32>
    %331 = tpu.concatenate %307, %309, %311, %313, %315, %317, %319, %321, %323, %325, %327, %329, %305, %330 in 1 : vector<8x58xf32>, vector<8x2xf32>, vector<8x58xf32>, vector<8x2xf32>, vector<8x58xf32>, vector<8x2xf32>, vector<8x58xf32>, vector<8x2xf32>, vector<8x58xf32>, vector<8x2xf32>, vector<8x58xf32>, vector<8x2xf32>, vector<8x6xf32>, vector<8x18xf32> -> vector<8x384xf32>
    %c0_79 = arith.constant 0 : index
    %c0_80 = arith.constant 0 : index
    %332 = vector.load %arg19[%c0_79, %c0_80] : memref<8x384xf32, #tpu.memory_space<vmem>>, vector<8x384xf32>
    tpu.vector_store %arg19[%c0_79, %c0_80], %331 {strides = array<i32>} : memref<8x384xf32, #tpu.memory_space<vmem>>, vector<8x384xf32>,
    return
  }
  func.func @transform_0(%arg0: i32) -> (i32, i32) {
    %c0_i32 = arith.constant 0 : i32
    %c0_i32_0 = arith.constant 0 : i32
    return %arg0, %c0_i32 : i32, i32
  }
  func.func @transform_1(%arg0: i32) -> (i32, i32) {
    %c0_i32 = arith.constant 0 : i32
    %c0_i32_0 = arith.constant 0 : i32
    %c0_i32_1 = arith.constant 0 : i32
    return %c0_i32, %c0_i32_0 : i32, i32
  }
  func.func @transform_2(%arg0: i32) -> (i32, i32) {
    %c0_i32 = arith.constant 0 : i32
    %c0_i32_0 = arith.constant 0 : i32
    %c0_i32_1 = arith.constant 0 : i32
    return %c0_i32, %c0_i32_0 : i32, i32
  }
  func.func @transform_3(%arg0: i32) -> (i32, i32) {
    %c0_i32 = arith.constant 0 : i32
    %c0_i32_0 = arith.constant 0 : i32
    %c0_i32_1 = arith.constant 0 : i32
    return %c0_i32, %c0_i32_0 : i32, i32
  }
  func.func @transform_4(%arg0: i32) -> (i32, i32) {
    %c0_i32 = arith.constant 0 : i32
    %c0_i32_0 = arith.constant 0 : i32
    %c0_i32_1 = arith.constant 0 : i32
    return %c0_i32, %c0_i32_0 : i32, i32
  }
  func.func @transform_5(%arg0: i32) -> (i32, i32) {
    %c0_i32 = arith.constant 0 : i32
    %c0_i32_0 = arith.constant 0 : i32
    %c0_i32_1 = arith.constant 0 : i32
    return %c0_i32, %c0_i32_0 : i32, i32
  }
  func.func @transform_6(%arg0: i32) -> (i32, i32) {
    %c0_i32 = arith.constant 0 : i32
    %c0_i32_0 = arith.constant 0 : i32
    %c0_i32_1 = arith.constant 0 : i32
    return %c0_i32, %c0_i32_0 : i32, i32
  }
  func.func @transform_7(%arg0: i32) -> (i32, i32) {
    %c0_i32 = arith.constant 0 : i32
    %c0_i32_0 = arith.constant 0 : i32
    %c0_i32_1 = arith.constant 0 : i32
    return %c0_i32, %c0_i32_0 : i32, i32
  }
  func.func @transform_8(%arg0: i32) -> (i32, i32) {
    %c0_i32 = arith.constant 0 : i32
    %c0_i32_0 = arith.constant 0 : i32
    %c0_i32_1 = arith.constant 0 : i32
    return %c0_i32, %c0_i32_0 : i32, i32
  }
  func.func @transform_9(%arg0: i32) -> (i32, i32) {
    %c0_i32 = arith.constant 0 : i32
    %c0_i32_0 = arith.constant 0 : i32
    %c0_i32_1 = arith.constant 0 : i32
    return %c0_i32, %c0_i32_0 : i32, i32
  }
  func.func @transform_10(%arg0: i32) -> (i32, i32) {
    %c0_i32 = arith.constant 0 : i32
    %c0_i32_0 = arith.constant 0 : i32
    %c0_i32_1 = arith.constant 0 : i32
    return %c0_i32, %c0_i32_0 : i32, i32
  }
  func.func @transform_11(%arg0: i32) -> (i32, i32) {
    %c0_i32 = arith.constant 0 : i32
    %c0_i32_0 = arith.constant 0 : i32
    %c0_i32_1 = arith.constant 0 : i32
    return %c0_i32, %c0_i32_0 : i32, i32
  }
  func.func @transform_12(%arg0: i32) -> (i32, i32) {
    %c0_i32 = arith.constant 0 : i32
    %c0_i32_0 = arith.constant 0 : i32
    %c0_i32_1 = arith.constant 0 : i32
    return %c0_i32, %c0_i32_0 : i32, i32
  }
  func.func @transform_13(%arg0: i32) -> (i32, i32) {
    %c0_i32 = arith.constant 0 : i32
    %c0_i32_0 = arith.constant 0 : i32
    %c0_i32_1 = arith.constant 0 : i32
    return %c0_i32, %c0_i32_0 : i32, i32
  }
  func.func @transform_14(%arg0: i32) -> (i32, i32) {
    %c0_i32 = arith.constant 0 : i32
    %c0_i32_0 = arith.constant 0 : i32
    %c0_i32_1 = arith.constant 0 : i32
    return %c0_i32, %c0_i32_0 : i32, i32
  }
  func.func @transform_15(%arg0: i32) -> (i32, i32) {
    %c0_i32 = arith.constant 0 : i32
    %c0_i32_0 = arith.constant 0 : i32
    %c0_i32_1 = arith.constant 0 : i32
    return %c0_i32, %c0_i32_0 : i32, i32
  }
  func.func @transform_16(%arg0: i32) -> (i32, i32) {
    %c0_i32 = arith.constant 0 : i32
    %c0_i32_0 = arith.constant 0 : i32
    %c0_i32_1 = arith.constant 0 : i32
    return %c0_i32, %c0_i32_0 : i32, i32
  }
  func.func @transform_17(%arg0: i32) -> (i32, i32) {
    %c0_i32 = arith.constant 0 : i32
    %c0_i32_0 = arith.constant 0 : i32
    %c0_i32_1 = arith.constant 0 : i32
    return %c0_i32, %c0_i32_0 : i32, i32
  }
  func.func @transform_18(%arg0: i32) -> (i32, i32) {
    %c0_i32 = arith.constant 0 : i32
    %c0_i32_0 = arith.constant 0 : i32
    return %arg0, %c0_i32 : i32, i32
  }
}

</mosaic_0001>

<bundles_post_ra>
// kernel: tpu_custom_call.1
= control target key start
LH: loop header
LB: loop body
LE: loop exit
PB: predicated region body
PF: predicated region fallthrough
CT: control target
= control target key end

     0   :  { %s9996_s0 = inlined_call_operand.hbm [shape: f32[8,32], index: 0, kind: input, shape index: {}]   ;;  %s9997_s1 = inlined_call_operand.hbm [shape: f32[20,58], index: 1, kind: input, shape index: {}]   ;;  %s9998_s2 = inlined_call_operand.vmem [shape: f32[32,32], index: 2, kind: input, shape index: {}]   ;;  %s9999_s3 = inlined_call_operand.vmem [shape: f32[32,12], index: 3, kind: input, shape index: {}]   ;;  %s10000_s4 = inlined_call_operand.vmem [shape: f32[32,12], index: 4, kind: input, shape index: {}]   ;;  %s10001_s5 = inlined_call_operand.vmem [shape: f32[32,34], index: 5, kind: input, shape index: {}]   ;;  %s10002_s6 = inlined_call_operand.hbm [shape: f32[2,34], index: 6, kind: input, shape index: {}]   ;;  %s10003_s7 = inlined_call_operand.vmem [shape: f32[34,2], index: 7, kind: input, shape index: {}]   ;;  %s10004_s8 = inlined_call_operand.vmem [shape: f32[32,2], index: 8, kind: input, shape index: {}]   ;;  %s10005_s9 = inlined_call_operand.hbm [shape: f32[2,2], index: 9, kind: input, shape index: {}]   ;;  %s10006_s10 = inlined_call_operand.vmem [shape: f32[32,34], index: 10, kind: input, shape index: {}]   ;;  %s10007_s11 = inlined_call_operand.vmem [shape: f32[2,34], index: 11, kind: input, shape index: {}]   ;;  %s10008_s12 = inlined_call_operand.vmem [shape: f32[34,58], index: 12, kind: input, shape index: {}]   ;;  %s10009_s13 = inlined_call_operand.vmem [shape: f32[32,58], index: 13, kind: input, shape index: {}]   ;;  %s10010_s14 = inlined_call_operand.vmem [shape: f32[2,58], index: 14, kind: input, shape index: {}]   ;;  %s10011_s15 = inlined_call_operand.hbm [shape: f32[32,34], index: 15, kind: input, shape index: {}]   ;;  %s10012_s16 = inlined_call_operand.vmem [shape: f32[2,34], index: 16, kind: input, shape index: {}]   ;;  %s10013_s17 = inlined_call_operand.vmem [shape: f32[34,34], index: 17, kind: input, shape index: {}]   ;;  %s10014_s18 = inlined_call_operand.hbm [shape: f32[8,384], index: 18, kind: output, shape index: {}]  }
   0x1   :  { %10055 = sst [smem:[#allocation35_spill]] %s9996_s0 }
   0x2   :  { %10056 = sst [smem:[#allocation36_spill]] %s9997_s1 }
   0x3   :  { %10057 = sst [smem:[#allocation37_spill]] %s9998_s2 }
   0x4   :  { %10058 = sst [smem:[#allocation38_spill]] %s10013_s17 }
   0x5   :  { %10059 = sst [smem:[#allocation39_spill]] %s10014_s18 }
   0x6   :  { %23 = vsyncpa [#allocation3], 0 }
   0x7   :  { %24 = vsyncpa [#allocation6], 0 }
   0x8   :  { %25 = vsyncpa [#allocation9], 0 }
   0x9   :  { %26 = vsyncpa [#allocation4], 0  ;;  %s7188_s27 = smov [#allocation5]   ;;  %s10060_s0 = sld [smem:[#allocation36_spill]] }
   0xa   :  { %s42_s28 = sshll.u32 %s7188_s27, 4  ;;  %s43_s28 = int_to_ptr.vmem [resolvable:$true] %s42_s28 }
   0xf   :  { %s7048_s19 = scalar_lea.hbm %s10060_s0, 384 }
  0x10   :  { %p7049_p0 = scmp.ne.s32.totalorder %s10060_s0, %s7048_s19  ;;  %p7052_p1 = scmp.lt.u32.totalorder %s7048_s19, %s10060_s0 }
  0x12   :  { %p7054_p2 = pnand %p7052_p1, %p7049_p0 }
  0x14   :  { %7057 = shalt.err (!%p7054_p2)
}
  0x15   :  { %s7058_s2 = scalar_lea.vmem %s43_s28, 384  ;;  %p7063_p4 = scmp.lt.s32.totalorder %s43_s28, %s43_s28 }
  0x16   :  { %p7059_p3 = scmp.ne.s32.totalorder %s43_s28, %s7058_s2  ;;  %p7064_p5 = scmp.lt.s32.totalorder %s7058_s2, %s7058_s2 }
  0x18   :  { %p7065_p6 = por %p7064_p5, %p7063_p4 }
  0x1a   :  { %p7066_p7 = pnand %p7065_p6, %p7059_p3 }
  0x1c   :  { %7069 = shalt.err (!%p7066_p7)
}
  0x1d   :  { %s7189_s23 = smov 128   ;;  %s7190_s24 = smov 8  }
  0x1e   :  { %48 = dma.hbm_to_vmem [thread:$0]  %s10060_s0, 384, %s43_s28, [#allocation6], %s7189_s23, %s7189_s23, %s7190_s24  }
  0x1f   :  { %s7191_s27 = smov [#allocation8]   ;;  %s7192_s30 = smov [#allocation2]  }
  0x20   :  { %s77_s29 = sshll.u32 %s7191_s27, 4  ;;  %s33_s19 = sshll.u32 %s7192_s30, 4  ;;  %s78_s29 = int_to_ptr.vmem [resolvable:$true] %s77_s29  ;;  %s34_s19 = int_to_ptr.vmem [resolvable:$true] %s33_s19 }
  0x21   :  { %s7070_s21 = scalar_lea.hbm %s10005_s9, 32 }
  0x22   :  { %p7071_p8 = scmp.ne.s32.totalorder %s10005_s9, %s7070_s21  ;;  %p7074_p9 = scmp.lt.u32.totalorder %s7070_s21, %s10005_s9 }
  0x24   :  { %p7076_p10 = pnand %p7074_p9, %p7071_p8 }
  0x26   :  { %7079 = shalt.err (!%p7076_p10)
}
  0x27   :  { %s7080_s28 = scalar_lea.vmem %s78_s29, 32  ;;  %p7085_p12 = scmp.lt.s32.totalorder %s78_s29, %s78_s29 }
  0x28   :  { %p7081_p11 = scmp.ne.s32.totalorder %s78_s29, %s7080_s28  ;;  %p7086_p13 = scmp.lt.s32.totalorder %s7080_s28, %s7080_s28 }
  0x2a   :  { %p7087_p0 = por %p7086_p13, %p7085_p12 }
  0x2c   :  { %p7088_p1 = pnand %p7087_p0, %p7081_p11 }
  0x2e   :  { %7091 = shalt.err (!%p7088_p1)
}
  0x2f   :  { %80 = dma.hbm_to_vmem [thread:$0]  %s10005_s9, 32, %s78_s29, [#allocation9]  }
  0x30   :  { %s10061_s30 = sld [smem:[#allocation35_spill]] }
  0x36   :  { %s7092_s1 = scalar_lea.hbm %s10061_s30, 128 }
  0x37   :  { %p7093_p2 = scmp.ne.s32.totalorder %s10061_s30, %s7092_s1  ;;  %p7096_p3 = scmp.lt.u32.totalorder %s7092_s1, %s10061_s30 }
  0x39   :  { %p7098_p4 = pnand %p7096_p3, %p7093_p2 }
  0x3b   :  { %7101 = shalt.err (!%p7098_p4)
}
  0x3c   :  { %s7102_s22 = scalar_lea.vmem %s34_s19, 128  ;;  %p7107_p6 = scmp.lt.s32.totalorder %s34_s19, %s34_s19 }
  0x3d   :  { %p7103_p5 = scmp.ne.s32.totalorder %s34_s19, %s7102_s22  ;;  %p7108_p7 = scmp.lt.s32.totalorder %s7102_s22, %s7102_s22 }
  0x3f   :  { %p7109_p8 = por %p7108_p7, %p7107_p6 }
  0x41   :  { %p7110_p9 = pnand %p7109_p8, %p7103_p5 }
  0x43   :  { %7113 = shalt.err (!%p7110_p9)
}
  0x44   :  { %36 = dma.hbm_to_vmem [thread:$0]  %s10061_s30, 128, %s34_s19, [#allocation3]  }
  0x45   :  { %s7193_s2 = smov [#allocation7]   ;;  %s7194_s0 = smov [#allocation10]  }
  0x46   :  { %s63_s28 = sshll.u32 %s7193_s2, 4  ;;  %s96_s25 = sshll.u32 %s7194_s0, 4  ;;  %s64_s28 = int_to_ptr.vmem [resolvable:$true] %s63_s28  ;;  %s97_s25 = int_to_ptr.vmem [resolvable:$true] %s96_s25 }
  0x47   :  { %s7114_s1 = scalar_lea.hbm %s10002_s6, 32 }
  0x48   :  { %p7115_p10 = scmp.ne.s32.totalorder %s10002_s6, %s7114_s1  ;;  %p7118_p11 = scmp.lt.u32.totalorder %s7114_s1, %s10002_s6 }
  0x4a   :  { %p7120_p12 = pnand %p7118_p11, %p7115_p10 }
  0x4c   :  { %7123 = shalt.err (!%p7120_p12)
}
  0x4d   :  { %s7124_s19 = scalar_lea.vmem %s64_s28, 32  ;;  %p7129_p0 = scmp.lt.s32.totalorder %s64_s28, %s64_s28 }
  0x4e   :  { %p7125_p13 = scmp.ne.s32.totalorder %s64_s28, %s7124_s19  ;;  %p7130_p1 = scmp.lt.s32.totalorder %s7124_s19, %s7124_s19 }
  0x50   :  { %p7131_p2 = por %p7130_p1, %p7129_p0 }
  0x52   :  { %p7132_p3 = pnand %p7131_p2, %p7125_p13 }
  0x54   :  { %7135 = shalt.err (!%p7132_p3)
}
  0x55   :  { %66 = dma.hbm_to_vmem [thread:$0]  %s10002_s6, 32, %s64_s28, [#allocation6]  }
  0x56   :  { %s7136_s2 = scalar_lea.hbm %s10011_s15, 512 }
  0x57   :  { %p7137_p4 = scmp.ne.s32.totalorder %s10011_s15, %s7136_s2  ;;  %p7140_p5 = scmp.lt.u32.totalorder %s7136_s2, %s10011_s15 }
  0x59   :  { %p7142_p6 = pnand %p7140_p5, %p7137_p4 }
  0x5b   :  { %7145 = shalt.err (!%p7142_p6)
}
  0x5c   :  { %s7146_s17 = scalar_lea.vmem %s97_s25, 512  ;;  %p7151_p8 = scmp.lt.s32.totalorder %s97_s25, %s97_s25 }
  0x5d   :  { %p7147_p7 = scmp.ne.s32.totalorder %s97_s25, %s7146_s17  ;;  %p7152_p9 = scmp.lt.s32.totalorder %s7146_s17, %s7146_s17 }
  0x5f   :  { %p7153_p10 = por %p7152_p9, %p7151_p8 }
  0x61   :  { %p7154_p11 = pnand %p7153_p10, %p7147_p7 }
  0x63   :  { %7157 = shalt.err (!%p7154_p11)
}
  0x64   :  { %102 = dma.hbm_to_vmem [thread:$0]  %s10011_s15, 512, %s97_s25, [#allocation9], %s7189_s23, %s7189_s23, %s7190_s24  }
  0x65   :  { %7180 = dma.done.wait [#allocation3], 128  }
  0x66   :  { %7181 = vsyncadd [#allocation3], 4294967168 }
  0x67   :  { %7182 = dma.done.wait [#allocation6], 416  }
  0x68   :  { %7183 = vsyncadd [#allocation6], 4294966880 }
  0x69   :  { %7184 = dma.done.wait [#allocation9], 544  }
  0x6a   :  { %7185 = vsyncadd [#allocation9], 4294966752  ;;  %v7195_v0 = vmov 0.0|0.0   ;;  %vm7196_vm0 = vmmov 0   ;;  %v7197_v1 = vmov 0.0   ;;  %s10062_s24 = sld [smem:[#allocation37_spill]]  ;;  %v10020_v9 = vlaneseq }
  0x6b   :  { %6840 = vmatprep.subr.bf16.mxu1 %v7195_v0  ;;  %6703 = vmatprep.mubr.msk.f32.mxu1 %vm7196_vm0, %v7197_v1  ;;  %v7401_v8 = vld [vmem:[#allocation2] sm:$0xff]  ;;  %vm134_vm1 = vcmask 261120   ;;  %v7414_v12 = vld [vmem:[#allocation5] sm:$0xff]  ;;  %v239_v28 = vld [vmem:[%s10000_s4 + $0x10] sm:$0xff]  ;;  %s7199_s29 = smov 126   ;;  %s7200_s2 = smov 124  }
  0x6c   :  { %6852 = vmatprep.subr.bf16.mxu0 %v7195_v0  ;;  %6725 = vmatprep.mubr.msk.f32.mxu0 %vm7196_vm0, %v7197_v1  ;;  %v7409_v10 = vshrl.u32 %v10020_v9, 7  ;;  %v237_v23 = vld [vmem:[%s10000_s4] sm:$0xff]  ;;  %v238_v24 = vld [vmem:[%s10000_s4 + $0x8] sm:$0xff]  ;;  %v240_v29 = vld [vmem:[%s10000_s4 + $0x18] sm:$0xff]  ;;  %v10021_v61 = vmov 1   ;;  %v10023_v62 = vmov 0  }
  0x6d   :  { %v233_v25 = vld [vmem:[%s9999_s3] sm:$0xff]  ;;  %v6847_v26 = vpack.c.bf16 %v238_v24, %v237_v23  ;;  %v234_v27 = vld [vmem:[%s9999_s3 + $0x8] sm:$0xff]  ;;  %v235_v31 = vld [vmem:[%s9999_s3 + $0x10] sm:$0xff]  ;;  %v6850_v33 = vpack.c.bf16 %v240_v29, %v239_v28  ;;  %6950 = vset.pattern.permute.xlu0 %v10021_v61  ;;  %6947 = vset.pattern.permute.xlu1 %v10023_v62  ;;  %s7203_s0 = smov 120   ;;  %s7204_s26 = smov 118   ;;  %vm828_vm2 = vcmask 275456  }
  0x6e   :  { %10063 = vst [vmem:[#allocation16_spill] sm:$0xff] %v7409_v10  ;;  %v7412_v11 = vsub.s32 0, %v7409_v10  ;;  %v6853_v30 = vpack.c.bf16 %v234_v27, %v233_v25  ;;  %v236_v32 = vld [vmem:[%s9999_s3 + $0x18] sm:$0xff]  ;;  %v7452_v38 = vsub.s32 1, %v7409_v10  ;;  %v7455_v39 = vsub.s32 2, %v7409_v10  ;;  %v539_v49 = vld [vmem:[%s10001_s5] sm:$0xff] }
  0x6f   :  { %v6856_v34 = vpack.c.bf16 %v236_v32, %v235_v31  ;;  %v540_v50 = vld [vmem:[%s10001_s5 + $0x8] sm:$0xff]  ;;  %v541_v51 = vld [vmem:[%s10001_s5 + $0x10] sm:$0xff]  ;;  %v542_v53 = vld [vmem:[%s10001_s5 + $0x18] sm:$0xff]  ;;  %v7481_v55 = vsub.s32 3, %v7409_v10  ;;  %s7198_s5 = smov 122   ;;  %vm1222_vm3 = vcmask 1041408  }
  0x70   :  { %v126_v2 = vld [vmem:[%s10062_s24] sm:$0xff]  ;;  %v127_v3 = vld [vmem:[%s10062_s24 + $0x8] sm:$0xff]  ;;  %v128_v4 = vld [vmem:[%s10062_s24 + $0x10] sm:$0xff]  ;;  %10064 = vst [vmem:[#allocation17_spill] sm:$0xff] %v7412_v11  ;;  %v133_v13 = vrot.slane %v7414_v12, %v7412_v11  ;;  %6854 = vmatpush3.bf16.msra.mxu0 %v6853_v30  ;;  %v225_v40 = vrot.slane %v7414_v12, %v7452_v38  ;;  %v230_v43 = vrot.slane %v7414_v12, %v7455_v39  ;;  %v7205_v63 = vmov 1983009808  }
  0x71   :  { %v6841_v5 = vpack.c.bf16 %v127_v3, %v126_v2  ;;  %v129_v6 = vld [vmem:[%s10062_s24 + $0x18] sm:$0xff]  ;;  %6855 = vmatprep.subr.bf16.mxu0 %v7195_v0  ;;  %10065 = vst [vmem:[#allocation18_spill] sm:$0xff] %v7452_v38  ;;  %10066 = vst [vmem:[#allocation19_spill] sm:$0xff] %v7455_v39  ;;  %v6859_v52 = vpack.c.bf16 %v540_v50, %v539_v49  ;;  %v6862_v54 = vpack.c.bf16 %v542_v53, %v541_v51  ;;  %vm1209_vm4 = vcmask 277504   ;;  %s10102_s17 = sld [smem:[#allocation38_spill]]  ;;  %s7211_s18 = smov 112  }
  0x72   :  { %v6844_v7 = vpack.c.bf16 %v129_v6, %v128_v4  ;;  %10067 = vst [vmem:[#allocation20_spill] sm:$0xff] %v7481_v55  ;;  %v387_v56 = vrot.slane %v7414_v12, %v7481_v55  ;;  %v408_v2 = vunpack.c.l.s4 %v7205_v63  ;;  %vm5890_vm5 = vcmask 1041409   ;;  %s7213_s3 = smov 50   ;;  %s7214_s4 = smov 44  }
  0x73   :  { %6842 = vmatpush3.bf16.msra.mxu1 %v6841_v5  ;;  %vm5892_vm6 = vcmask 1042434   ;;  %vm5894_vm7 = vcmask 1043459   ;;  %vm5896_vm8 = vcmask 1044484   ;;  %vm5898_vm9 = vcmask 1045509   ;;  %s7216_s20 = smov 60  }
  0x74   :  { %6843 = vmatprep.subr.bf16.mxu1 %v7195_v0  ;;  %6857 = vmatpush3.bf16.msra.mxu0 %v6856_v34  ;;  %v409_v4 = vunpack.c.0.s8 %v408_v2  ;;  %v7207_v2 = vmov 1966171168   ;;  %vm5900_vm10 = vcmask 1046534   ;;  %vm5902_vm11 = vcmask 1047559  }
  0x75   :  { %vm5905_vm12 = vcmask 48128   ;;  %vm6564_vm13 = vcmask 343040   ;;  %vm6566_vm14 = vcmask 359424   ;;  %vm6568_vm15 = vcmask 834560  }
  0x77   :  { %6845 = vmatpush3.bf16.msra.mxu1 %v6844_v7  ;;  %v7206_v7 = vmov 1934713408  }
  0x78   :  { %6846 = vmatprep.subr.bf16.mxu1 %v7195_v0 }
  0x7a   :  { %6704 = vmatmul.mubr.msk.f32.vlgmr.msra.gmra.mrb[0].mxu1 %vm134_vm1, %v7401_v8 }
  0x7b   :  { %6714 = vmatprep.mubr.msk.f32.mxu1 %vm7196_vm0, %v7197_v1  ;;  %6848 = vmatpush3.bf16.msra.mxu1 %v6847_v26 }
  0x7c   :  { %6849 = vmatprep.subr.bf16.mxu1 %v7195_v0 }
  0x7f   :  { %6851 = vmatpush3.bf16.msra.mxu1 %v6850_v33 }
  0x80   :  { %6858 = vmatprep.subr.bf16.mxu1 %v7195_v0 }
  0x82   :  { %6715 = vmatmul.mubr.msk.f32.vlgmr.msra.gmra.mrb[2].mxu1 %vm134_vm1, %v7401_v8 }
  0x83   :  { %6736 = vmatprep.mubr.msk.f32.mxu1 %vm7196_vm0, %v7197_v1  ;;  %6860 = vmatpush3.bf16.msra.mxu1 %v6859_v52 }
  0x84   :  { %6861 = vmatprep.subr.bf16.mxu1 %v7195_v0 }
  0x87   :  { %6863 = vmatpush3.bf16.msra.mxu1 %v6862_v54 }
  0x88   :  { %6872 = vmatprep.subr.bf16.mxu1 %v7195_v0 }
  0x8a   :  { %6737 = vmatmul.mubr.msk.f32.vlgmr.msra.gmra.mrb[4].mxu1 %vm134_vm1, %v7401_v8 }
  0x8b   :  { %6766 = vmatprep.mubr.msk.f32.mxu1 %vm7196_vm0, %v7197_v1 }
 0x14d   :  { %v204_v14 = vpop.f32.mrb[0].mxu1 }
 0x14e   :  { %v205_v15 = vadd.f32 %v204_v14, %v133_v13  ;;  %v6705_v16 = vpop.f32.mrb[1].mxu1  ;;  %v470_v13 = vunpack.c.l.s4 %v7206_v7  ;;  %v663_v7 = vld [vmem:[#allocation7] sm:$0x3] }
 0x150   :  { %v208_v17 = vsel %vm134_vm1, %v205_v15, 0.0 }
 0x151   :  { %209 = vadd.xlane.f32.xlu0 %v208_v17 }
 0x155   :  { %v307_v47 = vpop.f32.mrb[2].mxu1 }
 0x156   :  { %v6716_v48 = vpop.f32.mrb[3].mxu1 }
 0x1de   :  { %v210_v18 = vpop.xlane.xlu0 %209 }
 0x1df   :  { %v212_v19 = vmul.f32 0.03125, %v210_v18 }
 0x1e1   :  { %v213_v20 = vsub.f32 %v205_v15, %v212_v19  ;;  %v7490_v15 = vsub.s32 %v409_v4, %v7409_v10  ;;  %v471_v19 = vunpack.c.0.s8 %v470_v13 }
 0x1e3   :  { %v214_v21 = vmul.f32 %v213_v20, %v213_v20  ;;  %v474_v24 = vsub.s32 %v471_v19, %v7409_v10  ;;  %v7558_v19 = vsub.s32 4, %v7409_v10 }
 0x1e5   :  { %v215_v22 = vsel %vm134_vm1, %v214_v21, 0.0  ;;  %10070 = vst [vmem:[#allocation23_spill] sm:$0xff] %v7558_v19 }
 0x1e6   :  { %216 = vadd.xlane.f32.xlu0 %v215_v22 }
 0x273   :  { %v217_v35 = vpop.xlane.xlu0 %216 }
 0x274   :  { %v218_v36 = vmul.f32 0.03125, %v217_v35 }
 0x276   :  { %v219_v37 = vadd.f32 1e-05, %v218_v36 }
 0x278   :  { %6962 = vrsqrt.f32 %v219_v37 }
 0x282   :  { %v6963_v41 = vpop.eup %6962 }
 0x283   :  { %v221_v42 = vmul.f32 %v6963_v41, %v213_v20 }
 0x285   :  { %v226_v44 = vmul.f32 %v225_v40, %v221_v42 }
 0x287   :  { %v231_v45 = vadd.f32 %v230_v43, %v226_v44 }
 0x289   :  { %v232_v46 = vmax.f32 %v231_v45, 0.0 }
 0x28b   :  { %6726 = vmatmul.mubr.msk.f32.vlgmr.msra.gmra.mrb[0].mxu0 %vm134_vm1, %v232_v46 }
 0x35e   :  { %v380_v57 = vpop.f32.mrb[0].mxu0 }
 0x35f   :  { %v381_v58 = vadd.f32 %v380_v57, %v307_v47  ;;  %v6727_v59 = vpop.f32.mrb[1].mxu0  ;;  %v7509_v47 = vpop.f32.mrb[4].mxu1 }
 0x360   :  { %v6738_v48 = vpop.f32.mrb[5].mxu1 }
 0x361   :  { %v388_v60 = vadd.f32 %v387_v56, %v381_v58 }
 0x363   :  { %396 = vrot.lane.b32.xlu0 %v388_v60, %s7198_s5  ;;  %390 = vrot.lane.b32.xlu1 %v388_v60, %s7199_s29 }
 0x367   :  { %393 = vrot.lane.b32.xlu1 %v388_v60, %s7200_s2 }
 0x36b   :  { %399 = vrot.lane.b32.xlu1 %v388_v60, %s7203_s0 }
 0x36f   :  { %402 = vrot.lane.b32.xlu1 %v388_v60, %s7204_s26 }
 0x3d5   :  { %v391_v3 = vpop.permute.xlu1 %390  ;;  %v397_v5 = vpop.permute.xlu0 %396 }
 0x3d6   :  { %v421_v16 = vcombine.low %v391_v3, %v397_v5  ;;  %v422_v29 = vcombine.high %v391_v3, %v397_v5  ;;  %v616_v3 = vunpack.c.l.s4 %v7207_v2 }
 0x3d8   :  { %v429_v20 = vrot.slane %v421_v16, %v7490_v15  ;;  %v436_v40 = vrot.slane %v422_v29, %v7490_v15  ;;  %v617_v4 = vunpack.c.0.s8 %v616_v3 }
 0x3d9   :  { %v394_v6 = vpop.permute.xlu1 %393 }
 0x3da   :  { %v405_v14 = vcombine.low %v388_v60, %v394_v6  ;;  %v406_v21 = vcombine.high %v388_v60, %v394_v6  ;;  %v7544_v5 = vsub.s32 %v617_v4, %v7409_v10 }
 0x3dc   :  { %v413_v17 = vrot.slane %v405_v14, %v7490_v15  ;;  %v420_v33 = vrot.slane %v406_v21, %v7490_v15  ;;  %10069 = vst [vmem:[#allocation22_spill] sm:$0xff] %v7544_v5  ;;  %v621_v6 = vrot.slane %v7509_v47, %v7544_v5  ;;  %v7551_v14 = vrot.slane %v663_v7, %v7412_v11 }
 0x3dd   :  { %v400_v18 = vpop.permute.xlu1 %399 }
 0x3de   :  { %v467_v22 = vcombine.low %v413_v17, %v429_v20  ;;  %v437_v25 = vcombine.high %v400_v18, %v7197_v1  ;;  %v444_v26 = vrot.slane %v400_v18, %v7490_v15  ;;  %v468_v34 = vcombine.high %v413_v17, %v429_v20 }
 0x3df   :  { %v483_v45 = vcombine.low %v420_v33, %v436_v40  ;;  %v484_v54 = vcombine.high %v420_v33, %v436_v40  ;;  %v637_v16 = vrot.slane %v621_v6, %v7544_v5  ;;  %v7555_v17 = vrot.slane %v663_v7, %v7452_v38 }
 0x3e0   :  { %v451_v35 = vrot.slane %v437_v25, %v7490_v15  ;;  %v475_v36 = vrot.slane %v467_v22, %v474_v24  ;;  %v482_v46 = vrot.slane %v468_v34, %v474_v24  ;;  %v629_v18 = vcombine.high %v621_v6, %v621_v6 }
 0x3e1   :  { %v403_v23 = vpop.permute.xlu1 %402  ;;  %v491_v51 = vrot.slane %v483_v45, %v474_v24  ;;  %v498_v59 = vrot.slane %v484_v54, %v474_v24  ;;  %v771_v22 = vrot.slane %v637_v16, %v7412_v11 }
 0x3e2   :  { %v452_v27 = vcombine.high %v403_v23, %v7197_v1  ;;  %v459_v28 = vrot.slane %v403_v23, %v7490_v15  ;;  %v651_v25 = vrot.slane %v629_v18, %v7544_v5 }
 0x3e4   :  { %v466_v30 = vrot.slane %v452_v27, %v7490_v15  ;;  %v499_v31 = vcombine.low %v444_v26, %v459_v28  ;;  %v500_v32 = vcombine.high %v444_v26, %v459_v28  ;;  %v7572_v27 = vrot.slane %v7414_v12, %v7558_v19 }
 0x3e5   :  { %v775_v33 = vrot.slane %v651_v25, %v7412_v11  ;;  %v661_v2 = vcombine.high %v651_v25, %v651_v25 }
 0x3e6   :  { %v507_v37 = vrot.slane %v499_v31, %v474_v24  ;;  %v515_v41 = vcombine.low %v451_v35, %v466_v30  ;;  %v514_v44 = vrot.slane %v500_v32, %v474_v24  ;;  %v516_v52 = vcombine.high %v451_v35, %v466_v30 }
 0x3e8   :  { %v7503_v42 = vcombine.high %v475_v36, %v507_v37  ;;  %v7505_v43 = vcombine.low %v475_v36, %v507_v37  ;;  %v7511_v49 = vcombine.high %v482_v46, %v514_v44  ;;  %v523_v50 = vrot.slane %v515_v41, %v474_v24 }
 0x3e9   :  { %v530_v57 = vrot.slane %v516_v52, %v474_v24  ;;  %v7524_v58 = vcombine.low %v482_v46, %v514_v44  ;;  %v659_v41 = vcombine.high %v637_v16, %v637_v16  ;;  %v614_v46 = vcombine.high %v7509_v47, %v7509_v47 }
 0x3ea   :  { %721 = vperm.xlu0 %6950, %v7503_v42   ;;  %666 = vperm.xlu1 %6947, %v7505_v43   ;;  %v7516_v53 = vcombine.low %v491_v51, %v523_v50  ;;  %v7521_v56 = vcombine.high %v491_v51, %v523_v50 }
 0x3eb   :  { %v7527_v60 = vcombine.low %v498_v59, %v530_v57  ;;  %v7531_v63 = vcombine.high %v498_v59, %v530_v57  ;;  %v779_v57 = vrot.slane %v659_v41, %v7412_v11  ;;  %v628_v59 = vrot.slane %v614_v46, %v7544_v5 }
 0x3ed   :  { %10068 = vst [vmem:[#allocation21_spill] sm:$0xff] %v7527_v60 }
 0x3ee   :  { %729 = vperm.xlu0 %6950, %v7511_v49   ;;  %6948 = vset.pattern.permute.xlu1 %v10021_v61 }
 0x3ef   :  { %717 = vperm.xlu1 %6948, %v7505_v43  }
 0x3f2   :  { %733 = vperm.xlu0 %6950, %v7516_v53  }
 0x3f3   :  { %6949 = vset.pattern.permute.xlu1 %v10023_v62 }
 0x3f4   :  { %671 = vperm.xlu1 %6949, %v7503_v42  }
 0x3f6   :  { %737 = vperm.xlu0 %6950, %v7521_v56  }
 0x3f8   :  { %676 = vperm.xlu1 %6949, %v7524_v58  }
 0x3fa   :  { %741 = vperm.xlu0 %6950, %v7527_v60  }
 0x3fc   :  { %6951 = vset.pattern.permute.xlu1 %v10021_v61 }
 0x3fd   :  { %725 = vperm.xlu1 %6951, %v7524_v58  }
 0x3fe   :  { %745 = vperm.xlu0 %6950, %v7531_v63  }
 0x401   :  { %6952 = vset.pattern.permute.xlu1 %v10023_v62 }
 0x402   :  { %681 = vperm.xlu1 %6952, %v7511_v49   ;;  %6953 = vset.pattern.permute.xlu0 %v10023_v62 }
 0x406   :  { %686 = vperm.xlu1 %6952, %v7516_v53  }
 0x40a   :  { %691 = vperm.xlu1 %6952, %v7521_v56  }
 0x40e   :  { %696 = vperm.xlu1 %6952, %v7527_v60  }
 0x412   :  { %701 = vperm.xlu1 %6952, %v7531_v63  }
 0x416   :  { %6954 = vset.pattern.permute.xlu1 %v10021_v61 }
 0x469   :  { %v7548_v13 = vpop.permute.xlu1 %666  ;;  %v7567_v24 = vpop.permute.xlu0 %721 }
 0x46a   :  { %v708_v21 = vmul.f32 %v7551_v14, %v7548_v13  ;;  %v753_v30 = vmul.f32 %v7555_v17, %v7567_v24 }
 0x46d   :  { %v7584_v35 = vpop.permute.xlu0 %729 }
 0x46e   :  { %v7560_v20 = vpop.permute.xlu1 %717  ;;  %v755_v4 = vmul.f32 %v7555_v17, %v7584_v35 }
 0x46f   :  { %v752_v23 = vmul.f32 %v7555_v17, %v7560_v20 }
 0x471   :  { %v760_v26 = vadd.f32 %v752_v23, %v708_v21  ;;  %v7597_v48 = vpop.permute.xlu0 %733  ;;  %v630_v21 = vcombine.high %v628_v59, %v628_v59 }
 0x473   :  { %v7574_v28 = vpop.permute.xlu1 %671  ;;  %v808_v29 = vadd.f32 %v771_v22, %v760_v26  ;;  %v644_v22 = vrot.slane %v628_v59, %v7544_v5  ;;  %v783_v26 = vrot.slane %v661_v2, %v7412_v11 }
 0x474   :  { %v709_v31 = vmul.f32 %v7551_v14, %v7574_v28 }
 0x475   :  { %v7581_v32 = vadd.f32 %v7572_v27, %v808_v29  ;;  %v7613_v7 = vpop.permute.xlu0 %737  ;;  %v756_v29 = vmul.f32 %v7555_v17, %v7597_v48  ;;  %v787_v46 = vrot.slane %v644_v22, %v7412_v11  ;;  %v660_v59 = vcombine.high %v644_v22, %v644_v22 }
 0x476   :  { %v761_v34 = vadd.f32 %v753_v30, %v709_v31 }
 0x477   :  { %v7586_v36 = vpop.permute.xlu1 %676  ;;  %v829_v37 = vsel %vm828_vm2, %v7581_v32, 0.0 }
 0x478   :  { %830 = vadd.xlane.f32.xlu1 %v829_v37  ;;  %v809_v40 = vadd.f32 %v775_v33, %v761_v34  ;;  %v710_v50 = vmul.f32 %v7551_v14, %v7586_v36  ;;  %v658_v34 = vrot.slane %v630_v21, %v7544_v5 }
 0x479   :  { %v7629_v37 = vpop.permute.xlu0 %741 }
 0x47a   :  { %v7591_v44 = vadd.f32 %v7572_v27, %v809_v40  ;;  %v662_v22 = vcombine.high %v658_v34, %v658_v34 }
 0x47c   :  { %v7593_v45 = vpop.permute.xlu1 %725  ;;  %v832_v52 = vsel %vm828_vm2, %v7591_v44, 0.0 }
 0x47d   :  { %v754_v51 = vmul.f32 %v7555_v17, %v7593_v45  ;;  %833 = vadd.xlane.f32.xlu0 %v832_v52  ;;  %v7648_v21 = vpop.permute.xlu0 %745 }
 0x47f   :  { %v762_v54 = vadd.f32 %v754_v51, %v710_v50  ;;  %v757_v50 = vmul.f32 %v7555_v17, %v7613_v7 }
 0x481   :  { %v7607_v3 = vpop.permute.xlu1 %681  ;;  %v810_v47 = vadd.f32 %v779_v57, %v762_v54 }
 0x482   :  { %v711_v6 = vmul.f32 %v7551_v14, %v7607_v3 }
 0x483   :  { %v7616_v16 = vadd.f32 %v7572_v27, %v810_v47 }
 0x484   :  { %v763_v18 = vadd.f32 %v755_v4, %v711_v6  ;;  %v791_v4 = vrot.slane %v658_v34, %v7412_v11  ;;  %v758_v6 = vmul.f32 %v7555_v17, %v7629_v37 }
 0x485   :  { %v7619_v23 = vpop.permute.xlu1 %686  ;;  %v835_v25 = vsel %vm828_vm2, %v7616_v16, 0.0 }
 0x486   :  { %v712_v30 = vmul.f32 %v7551_v14, %v7619_v23  ;;  %836 = vadd.xlane.f32.xlu0 %v835_v25  ;;  %v811_v31 = vadd.f32 %v783_v26, %v763_v18 }
 0x488   :  { %v764_v33 = vadd.f32 %v756_v29, %v712_v30  ;;  %v823_v41 = vadd.f32 %v7572_v27, %v811_v31 }
 0x489   :  { %v7631_v40 = vpop.permute.xlu1 %691 }
 0x48a   :  { %v713_v51 = vmul.f32 %v7551_v14, %v7631_v40  ;;  %v838_v52 = vsel %vm828_vm2, %v823_v41, 0.0  ;;  %v812_v54 = vadd.f32 %v787_v46, %v764_v33  ;;  %v795_v33 = vrot.slane %v660_v59, %v7412_v11 }
 0x48b   :  { %839 = vadd.xlane.f32.xlu1 %v838_v52  ;;  %v759_v46 = vmul.f32 %v7555_v17, %v7648_v21 }
 0x48c   :  { %v765_v57 = vadd.f32 %v757_v50, %v713_v51  ;;  %v824_v47 = vadd.f32 %v7572_v27, %v812_v54 }
 0x48d   :  { %v7640_v2 = vpop.permute.xlu1 %696 }
 0x48e   :  { %v714_v18 = vmul.f32 %v7551_v14, %v7640_v2  ;;  %v841_v25 = vsel %vm828_vm2, %v824_v47, 0.0  ;;  %v813_v26 = vadd.f32 %v791_v4, %v765_v57  ;;  %v799_v57 = vrot.slane %v662_v22, %v7412_v11 }
 0x48f   :  { %842 = vadd.xlane.f32.xlu0 %v841_v25 }
 0x490   :  { %v766_v29 = vadd.f32 %v758_v6, %v714_v18  ;;  %v825_v31 = vadd.f32 %v7572_v27, %v813_v26 }
 0x491   :  { %v7651_v30 = vpop.permute.xlu1 %701 }
 0x492   :  { %v715_v50 = vmul.f32 %v7551_v14, %v7651_v30  ;;  %v844_v51 = vsel %vm828_vm2, %v825_v31, 0.0  ;;  %v814_v52 = vadd.f32 %v795_v33, %v766_v29 }
 0x493   :  { %845 = vadd.xlane.f32.xlu1 %v844_v51 }
 0x494   :  { %v767_v54 = vadd.f32 %v759_v46, %v715_v50  ;;  %v826_v34 = vadd.f32 %v7572_v27, %v814_v52 }
 0x496   :  { %v815_v4 = vadd.f32 %v799_v57, %v767_v54  ;;  %v847_v6 = vsel %vm828_vm2, %v826_v34, 0.0 }
 0x497   :  { %848 = vadd.xlane.f32.xlu0 %v847_v6 }
 0x498   :  { %v827_v59 = vadd.f32 %v7572_v27, %v815_v4 }
 0x49a   :  { %v850_v17 = vsel %vm828_vm2, %v827_v59, 0.0 }
 0x49b   :  { %851 = vadd.xlane.f32.xlu1 %v850_v17 }
 0x505   :  { %v831_v18 = vpop.xlane.xlu1 %830 }
 0x506   :  { %v854_v14 = vmul.f32 0.029411765, %v831_v18 }
 0x508   :  { %v7666_v25 = vsub.f32 %v7581_v32, %v854_v14 }
 0x50a   :  { %v870_v26 = vmul.f32 %v7666_v25, %v7666_v25  ;;  %v834_v29 = vpop.xlane.xlu0 %833 }
 0x50b   :  { %v855_v22 = vmul.f32 0.029411765, %v834_v29 }
 0x50c   :  { %v878_v33 = vsel %vm828_vm2, %v870_v26, 0.0 }
 0x50d   :  { %879 = vadd.xlane.f32.xlu0 %v878_v33  ;;  %v7672_v46 = vsub.f32 %v7591_v44, %v855_v22 }
 0x50f   :  { %v871_v27 = vmul.f32 %v7672_v46, %v7672_v46 }
 0x511   :  { %v881_v50 = vsel %vm828_vm2, %v871_v27, 0.0 }
 0x512   :  { %882 = vadd.xlane.f32.xlu1 %v881_v50 }
 0x513   :  { %v837_v51 = vpop.xlane.xlu0 %836 }
 0x514   :  { %v856_v32 = vmul.f32 0.029411765, %v837_v51 }
 0x516   :  { %v7678_v52 = vsub.f32 %v7616_v16, %v856_v32 }
 0x518   :  { %v872_v54 = vmul.f32 %v7678_v52, %v7678_v52  ;;  %v840_v57 = vpop.xlane.xlu1 %839 }
 0x519   :  { %v857_v4 = vmul.f32 0.029411765, %v840_v57 }
 0x51a   :  { %v884_v6 = vsel %vm828_vm2, %v872_v54, 0.0 }
 0x51b   :  { %885 = vadd.xlane.f32.xlu0 %v884_v6  ;;  %v7683_v44 = vsub.f32 %v823_v41, %v857_v4 }
 0x51c   :  { %v843_v17 = vpop.xlane.xlu0 %842 }
 0x51d   :  { %v858_v18 = vmul.f32 0.029411765, %v843_v17  ;;  %v873_v14 = vmul.f32 %v7683_v44, %v7683_v44 }
 0x51f   :  { %v7687_v26 = vsub.f32 %v824_v47, %v858_v18  ;;  %v887_v16 = vsel %vm828_vm2, %v873_v14, 0.0 }
 0x520   :  { %v846_v29 = vpop.xlane.xlu1 %845  ;;  %888 = vadd.xlane.f32.xlu1 %v887_v16  ;;  %v1454_v16 = vld [vmem:[%s10004_s8 + $0x8] sm:$0xff] }
 0x521   :  { %v859_v22 = vmul.f32 0.029411765, %v846_v29  ;;  %v874_v33 = vmul.f32 %v7687_v26, %v7687_v26 }
 0x523   :  { %v7692_v27 = vsub.f32 %v825_v31, %v859_v22  ;;  %v890_v41 = vsel %vm828_vm2, %v874_v33, 0.0  ;;  %v1456_v22 = vld [vmem:[%s10004_s8 + $0x18] sm:$0xff] }
 0x524   :  { %891 = vadd.xlane.f32.xlu0 %v890_v41  ;;  %v849_v50 = vpop.xlane.xlu0 %848  ;;  %v1102_v41 = vld [vmem:[%s10003_s7] sm:$0xff] }
 0x525   :  { %v860_v51 = vmul.f32 0.029411765, %v849_v50  ;;  %v875_v32 = vmul.f32 %v7692_v27, %v7692_v27  ;;  %v1103_v50 = vld [vmem:[%s10003_s7 + $0x8] sm:$0xff] }
 0x527   :  { %v7697_v47 = vsub.f32 %v826_v34, %v860_v51  ;;  %v893_v54 = vsel %vm828_vm2, %v875_v32, 0.0  ;;  %v1453_v34 = vld [vmem:[%s10004_s8] sm:$0xff]  ;;  %v6864_v51 = vpack.c.bf16 %v1103_v50, %v1102_v41  ;;  %v1104_v32 = vld [vmem:[%s10003_s7 + $0x10] sm:$0xff]  ;;  %v3131_v41 = vld [vmem:[%s10009_s13 + $0x18] sm:$0xff] }
 0x528   :  { %v852_v57 = vpop.xlane.xlu1 %851  ;;  %894 = vadd.xlane.f32.xlu1 %v893_v54  ;;  %v6873_v29 = vpack.c.bf16 %v1454_v16, %v1453_v34  ;;  %v1105_v54 = vld [vmem:[%s10003_s7 + $0x18] sm:$0xff] }
 0x529   :  { %v861_v4 = vmul.f32 0.029411765, %v852_v57  ;;  %v876_v6 = vmul.f32 %v7697_v47, %v7697_v47  ;;  %6865 = vmatprep.subr.bf16.mxu0 %v6864_v51  ;;  %v6868_v57 = vpack.c.bf16 %v1105_v54, %v1104_v32  ;;  %v2221_v34 = vld [vmem:[%s10006_s10 + $0x18] sm:$0xff]  ;;  %v3726_v32 = vld [vmem:[#allocation10 + $0x8] sm:$0xff] }
 0x52a   :  { %6874 = vmatpush3.bf16.msra.mxu1 %v6873_v29  ;;  %6867 = vmatpush3.bf16.msra.mxu0 %v6864_v51  ;;  %v3128_v29 = vld [vmem:[%s10009_s13] sm:$0xff] }
 0x52b   :  { %v7702_v31 = vsub.f32 %v827_v59, %v861_v4  ;;  %v896_v17 = vsel %vm828_vm2, %v876_v6, 0.0  ;;  %6875 = vmatprep.subr.bf16.mxu1 %v7195_v0  ;;  %v1455_v59 = vld [vmem:[%s10004_s8 + $0x10] sm:$0xff]  ;;  %6869 = vmatprep.subr.bf16.mxu0 %v6868_v57  ;;  %v1106_v4 = vld [vmem:[%s10003_s7 + $0x20] sm:$0x3]  ;;  %v3725_v51 = vld [vmem:[#allocation10] sm:$0xff] }
 0x52c   :  { %897 = vadd.xlane.f32.xlu0 %v896_v17  ;;  %v6876_v33 = vpack.c.bf16 %v1456_v22, %v1455_v59  ;;  %v2218_v6 = vld [vmem:[%s10006_s10] sm:$0xff]  ;;  %v2219_v17 = vld [vmem:[%s10006_s10 + $0x8] sm:$0xff]  ;;  %v6899_v54 = vpack.c.bf16 %v3726_v32, %v3725_v51 }
 0x52d   :  { %v877_v18 = vmul.f32 %v7702_v31, %v7702_v31  ;;  %v3129_v59 = vld [vmem:[%s10009_s13 + $0x8] sm:$0xff] }
 0x52e   :  { %6877 = vmatpush3.bf16.msra.mxu1 %v6876_v33  ;;  %6871 = vmatpush3.bf16.msra.mxu0 %v6868_v57  ;;  %v6893_v22 = vpack.c.bf16 %v3129_v59, %v3128_v29  ;;  %v3130_v33 = vld [vmem:[%s10009_s13 + $0x10] sm:$0xff]  ;;  %v7783_v59 = vsub.s32 5, %v7409_v10  ;;  %s7212_s13 = smov 58  }
 0x52f   :  { %v899_v14 = vsel %vm828_vm2, %v877_v18, 0.0  ;;  %6878 = vmatprep.subr.bf16.mxu1 %v7195_v0  ;;  %6747 = vmatprep.subr.msk.mxu0 %vm1222_vm3, %v1106_v4  ;;  %v2220_v18 = vld [vmem:[%s10006_s10 + $0x10] sm:$0xff]  ;;  %v6896_v50 = vpack.c.bf16 %v3131_v41, %v3130_v33 }
 0x530   :  { %900 = vadd.xlane.f32.xlu1 %v899_v14  ;;  %v6879_v14 = vpack.c.bf16 %v2219_v17, %v2218_v6  ;;  %v6882_v16 = vpack.c.bf16 %v2221_v34, %v2220_v18  ;;  %v3727_v57 = vld [vmem:[#allocation10 + $0x10] sm:$0xff]  ;;  %10071 = vst [vmem:[#allocation24_spill] sm:$0xff] %v7783_v59 }
 0x531   :  { %6767 = vmatmul.mubr.msk.f32.vlgmr.msra.gmra.mrb[6].mxu1 %vm134_vm1, %v7401_v8 }
 0x532   :  { %6777 = vmatprep.mubr.msk.f32.mxu1 %vm7196_vm0, %v7197_v1  ;;  %6748 = vmatpush3.msk.msra.mxu0 %vm1222_vm3, %v1106_v4  ;;  %v3728_v4 = vld [vmem:[#allocation10 + $0x18] sm:$0xff] }
 0x533   :  { %6880 = vmatpush3.bf16.msra.mxu1 %v6879_v14  ;;  %v6902_v6 = vpack.c.bf16 %v3728_v4, %v3727_v57 }
 0x534   :  { %6881 = vmatprep.subr.bf16.mxu1 %v7195_v0 }
 0x537   :  { %6883 = vmatpush3.bf16.msra.mxu1 %v6882_v16 }
 0x538   :  { %6892 = vmatprep.subr.bf16.mxu1 %v7195_v0 }
 0x53a   :  { %6778 = vmatmul.mubr.msk.f32.vlgmr.msra.gmra.mrb[8].mxu1 %vm134_vm1, %v7401_v8 }
 0x53b   :  { %6894 = vmatpush3.bf16.msra.mxu1 %v6893_v22  ;;  %6807 = vmatprep.mubr.msk.f32.mxu1 %vm7196_vm0, %v7197_v1  ;;  %v7786_v22 = vsub.s32 6, %v7409_v10 }
 0x53c   :  { %6895 = vmatprep.subr.bf16.mxu1 %v7195_v0 }
 0x53d   :  { %10072 = vst [vmem:[#allocation25_spill] sm:$0xff] %v7786_v22  ;;  %v7794_v41 = vrot.slane %v7414_v12, %v7786_v22 }
 0x53f   :  { %6897 = vmatpush3.bf16.msra.mxu1 %v6896_v50 }
 0x540   :  { %6898 = vmatprep.subr.bf16.mxu1 %v7195_v0 }
 0x542   :  { %6808 = vmatmul.mubr.msk.f32.vlgmr.msra.gmra.mrb[10].mxu1 %vm134_vm1, %v7401_v8 }
 0x543   :  { %6900 = vmatpush3.bf16.msra.mxu1 %v6899_v54  ;;  %6818 = vmatprep.mubr.msk.f32.mxu1 %vm7196_vm0, %v7197_v1  ;;  %vm6556_vm0 = vcmask 408576  }
 0x544   :  { %6901 = vmatprep.subr.bf16.mxu1 %v7195_v0  ;;  %v7790_v0 = vrot.slane %v7414_v12, %v7783_v59 }
 0x547   :  { %6903 = vmatpush3.bf16.msra.mxu1 %v6902_v6 }
 0x54a   :  { %6819 = vmatmul.mubr.msk.f32.vlgmr.msra.gmra.mrb[12].mxu1 %vm134_vm1, %v7401_v8  ;;  %vm6570_vm1 = vcmask 850944  }
 0x59a   :  { %v880_v17 = vpop.xlane.xlu0 %879 }
 0x59b   :  { %v902_v18 = vmul.f32 0.029411765, %v880_v17 }
 0x59d   :  { %v910_v14 = vadd.f32 1e-05, %v902_v18 }
 0x59f   :  { %6964 = vrsqrt.f32 %v910_v14  ;;  %v883_v34 = vpop.xlane.xlu1 %882 }
 0x5a0   :  { %v903_v16 = vmul.f32 0.029411765, %v883_v34 }
 0x5a2   :  { %v911_v29 = vadd.f32 1e-05, %v903_v16 }
 0x5a4   :  { %6966 = vrsqrt.f32 %v911_v29 }
 0x5a8   :  { %v886_v1 = vpop.xlane.xlu0 %885 }
 0x5a9   :  { %v6965_v8 = vpop.eup %6964  ;;  %v904_v33 = vmul.f32 0.029411765, %v886_v1 }
 0x5aa   :  { %v926_v50 = vmul.f32 %v6965_v8, %v7666_v25 }
 0x5ab   :  { %v912_v51 = vadd.f32 1e-05, %v904_v33 }
 0x5ac   :  { %v938_v32 = vmul.f32 %v7790_v0, %v926_v50 }
 0x5ad   :  { %6968 = vrsqrt.f32 %v912_v51  ;;  %v889_v54 = vpop.xlane.xlu1 %888 }
 0x5ae   :  { %v950_v57 = vadd.f32 %v7794_v41, %v938_v32  ;;  %v6967_v4 = vpop.eup %6966  ;;  %v905_v6 = vmul.f32 0.029411765, %v889_v54 }
 0x5af   :  { %v927_v17 = vmul.f32 %v6967_v4, %v7672_v46 }
 0x5b0   :  { %v958_v18 = vmax.f32 %v950_v57, 0.0  ;;  %v913_v14 = vadd.f32 1e-05, %v905_v6 }
 0x5b1   :  { %v939_v34 = vmul.f32 %v7790_v0, %v927_v17  ;;  %v892_v16 = vpop.xlane.xlu0 %891 }
 0x5b2   :  { %v981_v12 = vrot.slane %v958_v18, %v7490_v15  ;;  %6970 = vrsqrt.f32 %v913_v14  ;;  %v906_v25 = vmul.f32 0.029411765, %v892_v16  ;;  %v974_v1 = vcombine.high %v958_v18, %v958_v18 }
 0x5b3   :  { %v951_v29 = vadd.f32 %v7794_v41, %v939_v34 }
 0x5b4   :  { %v989_v8 = vcombine.high %v981_v12, %v981_v12  ;;  %v914_v33 = vadd.f32 1e-05, %v906_v25  ;;  %v988_v57 = vrot.slane %v974_v1, %v7490_v15 }
 0x5b5   :  { %v895_v50 = vpop.xlane.xlu1 %894  ;;  %v959_v51 = vmax.f32 %v951_v29, 0.0 }
 0x5b6   :  { %6972 = vrsqrt.f32 %v914_v33  ;;  %v907_v54 = vmul.f32 0.029411765, %v895_v50  ;;  %v1107_v6 = vcombine.low %v981_v12, %v989_v8 }
 0x5b7   :  { %v6969_v32 = vpop.eup %6968  ;;  %v997_v4 = vrot.slane %v959_v51, %v7490_v15  ;;  %v990_v14 = vcombine.high %v959_v51, %v959_v51 }
 0x5b8   :  { %v928_v46 = vmul.f32 %v6969_v32, %v7678_v52  ;;  %v915_v17 = vadd.f32 1e-05, %v907_v54  ;;  %v1115_v33 = vrot.slane %v1107_v6, %v7490_v15 }
 0x5b9   :  { %v898_v34 = vpop.xlane.xlu0 %897  ;;  %v1108_v18 = vcombine.low %v988_v57, %v997_v4  ;;  %v1005_v9 = vcombine.high %v997_v4, %v997_v4  ;;  %v1004_v12 = vrot.slane %v990_v14, %v7490_v15 }
 0x5ba   :  { %v940_v16 = vmul.f32 %v7790_v0, %v928_v46  ;;  %6974 = vrsqrt.f32 %v915_v17  ;;  %v908_v25 = vmul.f32 0.029411765, %v898_v34 }
 0x5bb   :  { %v1122_v50 = vrot.slane %v1108_v18, %v7490_v15  ;;  %v1124_v34 = vcombine.low %v1005_v9, %v1004_v12 }
 0x5bc   :  { %v952_v29 = vadd.f32 %v7794_v41, %v940_v16  ;;  %v6971_v52 = vpop.eup %6970  ;;  %v916_v32 = vadd.f32 1e-05, %v908_v25 }
 0x5bd   :  { %v901_v1 = vpop.xlane.xlu1 %900  ;;  %v929_v51 = vmul.f32 %v6971_v52, %v7683_v44  ;;  %v1123_v46 = vcombine.low %v1115_v33, %v1122_v50  ;;  %v1132_v52 = vrot.slane %v1124_v34, %v7490_v15 }
 0x5be   :  { %v960_v8 = vmax.f32 %v952_v29, 0.0  ;;  %v909_v54 = vmul.f32 0.029411765, %v901_v1  ;;  %6976 = vrsqrt.f32 %v916_v32 }
 0x5bf   :  { %v941_v57 = vmul.f32 %v7790_v0, %v929_v51  ;;  %6749 = vmatprep.mubr.msk.f32.mxu0 %vm1209_vm4, %v1123_v46 }
 0x5c0   :  { %v917_v17 = vadd.f32 1e-05, %v909_v54  ;;  %v1013_v6 = vrot.slane %v960_v8, %v7490_v15  ;;  %v6973_v16 = vpop.eup %6972  ;;  %v1006_v25 = vcombine.high %v960_v8, %v960_v8 }
 0x5c1   :  { %v930_v4 = vmul.f32 %v6973_v16, %v7687_v26  ;;  %v953_v14 = vadd.f32 %v7794_v41, %v941_v57 }
 0x5c2   :  { %6978 = vrsqrt.f32 %v917_v17  ;;  %v1021_v18 = vcombine.high %v1013_v6, %v1013_v6  ;;  %v1020_v26 = vrot.slane %v1006_v25, %v7490_v15 }
 0x5c3   :  { %v942_v44 = vmul.f32 %v7790_v0, %v930_v4  ;;  %v961_v33 = vmax.f32 %v953_v14, 0.0 }
 0x5c4   :  { %v1125_v29 = vcombine.low %v1013_v6, %v1021_v18  ;;  %v6975_v50 = vpop.eup %6974 }
 0x5c5   :  { %v931_v32 = vmul.f32 %v6975_v50, %v7692_v27  ;;  %v1022_v51 = vcombine.high %v961_v33, %v961_v33  ;;  %v1029_v9 = vrot.slane %v961_v33, %v7490_v15  ;;  %v954_v12 = vadd.f32 %v7794_v41, %v942_v44 }
 0x5c6   :  { %v1139_v1 = vrot.slane %v1125_v29, %v7490_v15 }
 0x5c7   :  { %v943_v8 = vmul.f32 %v7790_v0, %v931_v32  ;;  %v1036_v46 = vrot.slane %v1022_v51, %v7490_v15  ;;  %v1037_v57 = vcombine.high %v1029_v9, %v1029_v9  ;;  %v1141_v6 = vcombine.low %v1020_v26, %v1029_v9 }
 0x5c8   :  { %v1140_v54 = vcombine.low %v1132_v52, %v1139_v1  ;;  %v6977_v17 = vpop.eup %6976  ;;  %v962_v16 = vmax.f32 %v954_v12, 0.0 }
 0x5c9   :  { %v932_v27 = vmul.f32 %v6977_v17, %v7697_v47  ;;  %v1142_v34 = vcombine.low %v1037_v57, %v1036_v46  ;;  %v955_v4 = vadd.f32 %v7794_v41, %v943_v8  ;;  %v1149_v29 = vrot.slane %v1141_v6, %v7490_v15 }
 0x5ca   :  { %6750 = vmatmul.mubr.msk.f32.vlgmr.msra.gmra.mrb[2].mxu0 %vm1209_vm4, %v1140_v54  ;;  %v1038_v18 = vcombine.high %v962_v16, %v962_v16  ;;  %v1045_v14 = vrot.slane %v962_v16, %v7490_v15 }
 0x5cb   :  { %v944_v44 = vmul.f32 %v7790_v0, %v932_v27  ;;  %v1156_v33 = vrot.slane %v1142_v34, %v7490_v15  ;;  %v963_v50 = vmax.f32 %v955_v4, 0.0 }
 0x5cc   :  { %v6979_v25 = vpop.eup %6978  ;;  %v1052_v47 = vrot.slane %v1038_v18, %v7490_v15  ;;  %v1053_v32 = vcombine.high %v1045_v14, %v1045_v14 }
 0x5cd   :  { %v933_v52 = vmul.f32 %v6979_v25, %v7702_v31  ;;  %v1157_v1 = vcombine.low %v1149_v29, %v1156_v33  ;;  %v1061_v51 = vrot.slane %v963_v50, %v7490_v15  ;;  %v956_v9 = vadd.f32 %v7794_v41, %v944_v44 }
 0x5ce   :  { %v1054_v26 = vcombine.high %v963_v50, %v963_v50  ;;  %v1158_v8 = vcombine.low %v1045_v14, %v1053_v32 }
 0x5cf   :  { %v945_v12 = vmul.f32 %v7790_v0, %v933_v52  ;;  %6752 = vmatprep.mubr.msk.f32.mxu0 %vm1209_vm4, %v1157_v1  ;;  %v1159_v54 = vcombine.low %v1052_v47, %v1061_v51  ;;  %v964_v46 = vmax.f32 %v956_v9, 0.0  ;;  %v1069_v17 = vcombine.high %v1061_v51, %v1061_v51 }
 0x5d0   :  { %v1068_v57 = vrot.slane %v1054_v26, %v7490_v15  ;;  %v1166_v6 = vrot.slane %v1158_v8, %v7490_v15 }
 0x5d1   :  { %v957_v31 = vadd.f32 %v7794_v41, %v945_v12  ;;  %v1173_v16 = vrot.slane %v1159_v54, %v7490_v15  ;;  %v1077_v27 = vrot.slane %v964_v46, %v7490_v15  ;;  %v1070_v34 = vcombine.high %v964_v46, %v964_v46 }
 0x5d2   :  { %v1175_v14 = vcombine.low %v1069_v17, %v1068_v57 }
 0x5d3   :  { %v965_v4 = vmax.f32 %v957_v31, 0.0  ;;  %v1174_v18 = vcombine.low %v1166_v6, %v1173_v16  ;;  %v1085_v0 = vcombine.high %v1077_v27, %v1077_v27  ;;  %v1084_v25 = vrot.slane %v1070_v34, %v7490_v15 }
 0x5d4   :  { %v1183_v47 = vrot.slane %v1175_v14, %v7490_v15 }
 0x5d5   :  { %v1086_v44 = vcombine.high %v965_v4, %v965_v4  ;;  %v1093_v29 = vrot.slane %v965_v4, %v7490_v15  ;;  %6753 = vmatmul.mubr.msk.f32.gmra.mrb[4].mxu0 %vm1209_vm4, %v1174_v18  ;;  %v1176_v33 = vcombine.low %v1077_v27, %v1085_v0  ;;  %v1785_v27 = vld [vmem:[#allocation8] sm:$0x3]  ;;  %v7863_v18 = vsub.s32 7, %v7409_v10 }
 0x5d6   :  { %v1801_v34 = vrot.slane %v1785_v27, %v7452_v38  ;;  %v1789_v4 = vrot.slane %v1785_v27, %v7412_v11 }
 0x5d7   :  { %v1100_v41 = vrot.slane %v1086_v44, %v7490_v15  ;;  %v1101_v50 = vcombine.high %v1093_v29, %v1093_v29  ;;  %v1192_v52 = vcombine.low %v1084_v25, %v1093_v29  ;;  %v1190_v32 = vrot.slane %v1176_v33, %v7490_v15  ;;  %10076 = vst [vmem:[#allocation29_spill] sm:$0xff] %v7863_v18  ;;  %v7046_v44 = vld [vmem:[#allocation5] sm:$0xff] }
 0x5d8   :  { %v1802_v0 = vmul.f32 %v1801_v34, %v7560_v20  ;;  %v1790_v14 = vmul.f32 %v1789_v4, %v7548_v13  ;;  %v1791_v25 = vmul.f32 %v1789_v4, %v7574_v28  ;;  %v2005_v29 = vrot.slane %v7046_v44, %v7863_v18 }
 0x5d9   :  { %v1193_v1 = vcombine.low %v1101_v50, %v1100_v41  ;;  %v1191_v51 = vcombine.low %v1183_v47, %v1190_v32  ;;  %v1200_v9 = vrot.slane %v1192_v52, %v7490_v15  ;;  %v1803_v41 = vmul.f32 %v1801_v34, %v7567_v24 }
 0x5da   :  { %v1810_v33 = vadd.f32 %v1802_v0, %v1790_v14  ;;  %v1804_v50 = vmul.f32 %v1801_v34, %v7593_v45  ;;  %v2007_v52 = vcombine.high %v2005_v29, %v2005_v29  ;;  %v1792_v32 = vmul.f32 %v1789_v4, %v7586_v36 }
 0x5db   :  { %v1207_v26 = vrot.slane %v1193_v1, %v7490_v15  ;;  %6755 = vmatprep.mubr.msk.f32.mxu0 %vm1209_vm4, %v1191_v51  ;;  %v1811_v47 = vadd.f32 %v1803_v41, %v1791_v25  ;;  %v1793_v1 = vmul.f32 %v1789_v4, %v7607_v3  ;;  %v1805_v13 = vmul.f32 %v1801_v34, %v7584_v35 }
 0x5dc   :  { %v1826_v51 = vcombine.high %v1810_v33, %v1810_v33  ;;  %v7876_v28 = vrot.slane %v1810_v33, %v7490_v15  ;;  %v7880_v45 = vrot.slane %v2005_v29, %v7490_v15  ;;  %v1806_v36 = vmul.f32 %v1801_v34, %v7597_v48 }
 0x5dd   :  { %v1208_v12 = vcombine.low %v1200_v9, %v1207_v26  ;;  %v1812_v9 = vadd.f32 %v1804_v50, %v1792_v32  ;;  %v1794_v26 = vmul.f32 %v1789_v4, %v7619_v23  ;;  %v1795_v3 = vmul.f32 %v1789_v4, %v7631_v40 }
 0x5de   :  { %v7888_v35 = vrot.slane %v1811_v47, %v7490_v15  ;;  %v1807_v23 = vmul.f32 %v1801_v34, %v7613_v7  ;;  %v1808_v25 = vmul.f32 %v1801_v34, %v7629_v37  ;;  %v1797_v33 = vmul.f32 %v1789_v4, %v7651_v30 }
 0x5df   :  { %6756 = vmatmul.mubr.msk.f32.gmra.mrb[6].mxu0 %vm1209_vm4, %v1208_v12  ;;  %v7883_v12 = vrot.slane %v2007_v52, %v7490_v15  ;;  %v7899_v40 = vrot.slane %v1812_v9, %v7490_v15  ;;  %v1814_v0 = vadd.f32 %v1806_v36, %v1794_v26  ;;  %v1858_v44 = vcombine.high %v1812_v9, %v1812_v9 }
 0x5e0   :  { %v1815_v29 = vadd.f32 %v1807_v23, %v1795_v3  ;;  %v1809_v52 = vmul.f32 %v1801_v34, %v7648_v21 }
 0x5e1   :  { %v1890_v30 = vcombine.high %v1814_v0, %v1814_v0  ;;  %v7921_v26 = vrot.slane %v1858_v44, %v7490_v15 }
 0x5e2   :  { %v7927_v34 = vrot.slane %v1815_v29, %v7490_v15 }
 0x5e3   :  { %v7938_v23 = vrot.slane %v1890_v30, %v7490_v15 }
 0x604   :  { %v1523_v8 = vpop.f32.mrb[6].mxu1 }
 0x605   :  { %v6768_v54 = vpop.f32.mrb[7].mxu1  ;;  %v1535_v20 = vrot.slane %v1523_v8, %v7544_v5  ;;  %v1528_v24 = vcombine.high %v1523_v8, %v1523_v8  ;;  %v1796_v8 = vmul.f32 %v1789_v4, %v7640_v2  ;;  %v7917_v4 = vrot.slane %v1814_v0, %v7490_v15 }
 0x606   :  { %v1842_v54 = vcombine.high %v1811_v47, %v1811_v47 }
 0x607   :  { %v1551_v27 = vrot.slane %v1535_v20, %v7544_v5  ;;  %v1542_v14 = vrot.slane %v1528_v24, %v7544_v5  ;;  %v1816_v32 = vadd.f32 %v1808_v25, %v1796_v8 }
 0x608   :  { %v7905_v7 = vrot.slane %v1842_v54, %v7490_v15 }
 0x609   :  { %v1573_v37 = vcombine.high %v1551_v27, %v1551_v27  ;;  %v1544_v9 = vcombine.high %v1542_v14, %v1542_v14  ;;  %v7933_v54 = vrot.slane %v1816_v32, %v7490_v15  ;;  %v1922_v0 = vcombine.high %v1816_v32, %v1816_v32 }
 0x60d   :  { %v7854_v46 = vpop.f32.mrb[8].mxu1 }
 0x60e   :  { %10073 = vst [vmem:[#allocation26_spill] sm:$0xff] %v7854_v46  ;;  %v6779_v57 = vpop.f32.mrb[9].mxu1 }
 0x60f   :  { %v1813_v57 = vadd.f32 %v1805_v13, %v1793_v1  ;;  %v1906_v13 = vcombine.high %v1815_v29, %v1815_v29 }
 0x611   :  { %v1874_v2 = vcombine.high %v1813_v57, %v1813_v57  ;;  %v7912_v47 = vrot.slane %v1813_v57, %v7490_v15  ;;  %v1580_v57 = vrot.slane %v1551_v27, %v7412_v11  ;;  %v7944_v25 = vrot.slane %v1906_v13, %v7490_v15 }
 0x612   :  { %v1572_v27 = vrot.slane %v1544_v9, %v7544_v5 }
 0x613   :  { %v7924_v21 = vrot.slane %v1874_v2, %v7490_v15  ;;  %v1616_v13 = vrot.slane %v1580_v57, %v7490_v15 }
 0x614   :  { %v1576_v32 = vcombine.high %v1572_v27, %v1572_v27  ;;  %v7970_v62 = vrot.slane %v1572_v27, %v7412_v11 }
 0x615   :  { %v7856_v17 = vpop.f32.mrb[10].mxu1 }
 0x616   :  { %10074 = vst [vmem:[#allocation27_spill] sm:$0xff] %v7856_v17  ;;  %v6809_v31 = vpop.f32.mrb[11].mxu1  ;;  %v1608_v18 = vrot.slane %v1576_v32, %v7412_v11 }
 0x617   :  { %v1543_v31 = vcombine.high %v1535_v20, %v1535_v20  ;;  %v1558_v20 = vrot.slane %v1542_v14, %v7544_v5 }
 0x618   :  { %v8008_v39 = vrot.slane %v1608_v18, %v7490_v15 }
 0x619   :  { %v1565_v41 = vrot.slane %v1543_v31, %v7544_v5  ;;  %v1588_v31 = vrot.slane %v1573_v37, %v7412_v11  ;;  %v1596_v14 = vrot.slane %v1558_v20, %v7412_v11  ;;  %v1609_v37 = vcombine.high %v1580_v57, %v1580_v57 }
 0x61b   :  { %v1575_v24 = vcombine.high %v1565_v41, %v1565_v41  ;;  %v1584_v36 = vrot.slane %v1565_v41, %v7412_v11  ;;  %v1648_v30 = vrot.slane %v1588_v31, %v7490_v15  ;;  %v1673_v61 = vcombine.high %v1596_v14, %v1596_v14 }
 0x61c   :  { %v7959_v9 = vrot.slane %v1596_v14, %v7490_v15  ;;  %v1641_v3 = vcombine.high %v1588_v31, %v1588_v31  ;;  %v1623_v1 = vrot.slane %v1609_v37, %v7490_v15 }
 0x61d   :  { %v7858_v6 = vpop.f32.mrb[12].mxu1  ;;  %v1632_v2 = vrot.slane %v1584_v36, %v7490_v15  ;;  %v1592_v41 = vrot.slane %v1575_v24, %v7412_v11  ;;  %v1656_v14 = vcombine.high %v1648_v30, %v1648_v30  ;;  %v7982_v27 = vrot.slane %v1673_v61, %v7490_v15 }
 0x61e   :  { %10075 = vst [vmem:[#allocation28_spill] sm:$0xff] %v7858_v6  ;;  %v6820_v16 = vpop.f32.mrb[13].mxu1  ;;  %v7995_v61 = vrot.slane %v1641_v3, %v7490_v15  ;;  %v1721_v3 = vcombine.high %v1608_v18, %v1608_v18  ;;  %v1689_v18 = vcombine.high %v7970_v62, %v7970_v62 }
 0x61f   :  { %v7891_v16 = vrot.slane %v1826_v51, %v7490_v15  ;;  %v1817_v51 = vadd.f32 %v1809_v52, %v1797_v33  ;;  %v1625_v33 = vcombine.high %v1584_v36, %v1584_v36  ;;  %v7962_v36 = vrot.slane %v1922_v0, %v7490_v15 }
 0x620   :  { %v1657_v8 = vcombine.high %v1592_v41, %v1592_v41  ;;  %v1624_v0 = vcombine.high %v1616_v13, %v1616_v13  ;;  %v7975_v48 = vrot.slane %v1592_v41, %v7490_v15  ;;  %v7979_v52 = vcombine.high %v7880_v45, %v7880_v45 }
 0x621   :  { %v1938_v44 = vcombine.high %v1817_v51, %v1817_v51  ;;  %v7947_v29 = vrot.slane %v1817_v51, %v7490_v15  ;;  %v1574_v51 = vcombine.high %v1558_v20, %v1558_v20  ;;  %v1639_v57 = vrot.slane %v1625_v33, %v7490_v15 }
 0x622   :  { %v1640_v20 = vcombine.high %v1632_v2, %v1632_v2  ;;  %v7990_v41 = vrot.slane %v7970_v62, %v7490_v15  ;;  %v7998_v33 = vrot.slane %v1657_v8, %v7490_v15 }
 0x623   :  { %v7965_v24 = vrot.slane %v1938_v44, %v7490_v15  ;;  %v1604_v31 = vrot.slane %v1574_v51, %v7412_v11 }
 0x625   :  { %v1705_v11 = vcombine.high %v1604_v31, %v1604_v31 }
 0x69d   :  { %v6751_v44 = vpop.f32.mrb[2].mxu0 }
 0x69e   :  { %v1344_v50 = vcombine.high %v6751_v44, %v6751_v44  ;;  %v1351_v37 = vrot.slane %v6751_v44, %v7490_v15  ;;  %v1292_v10 = vpop.f32.mrb[3].mxu0 }
 0x69f   :  { %v1327_v55 = vcombine.high %v1292_v10, %v1292_v10  ;;  %v1334_v17 = vrot.slane %v1292_v10, %v7490_v15 }
 0x6a0   :  { %v1358_v51 = vrot.slane %v1344_v50, %v7490_v15  ;;  %v1359_v22 = vcombine.high %v1351_v37, %v1351_v37  ;;  %v1765_v44 = vadd.f32 %v1640_v20, %v1351_v37 }
 0x6a1   :  { %v1341_v59 = vrot.slane %v1327_v55, %v7490_v15  ;;  %v1342_v19 = vcombine.high %v1334_v17, %v1334_v17  ;;  %v1761_v32 = vadd.f32 %v1616_v13, %v1334_v17  ;;  %v10077_v55 = vcombine.high %v7888_v35, %v7888_v35 }
 0x6a2   :  { %v1360_v38 = vcombine.high %v1358_v51, %v1358_v51  ;;  %v1766_v10 = vadd.f32 %v1639_v57, %v1359_v22  ;;  %v1767_v6 = vadd.f32 %v1648_v30, %v1358_v51  ;;  %v10078_v30 = vcombine.high %v7876_v28, %v7876_v28 }
 0x6a3   :  { %v1343_v46 = vcombine.high %v1341_v59, %v1341_v59  ;;  %v1762_v5 = vadd.f32 %v1624_v0, %v1342_v19  ;;  %v1763_v8 = vadd.f32 %v1623_v1, %v1341_v59  ;;  %v1978_v60 = vadd.f32 %v7876_v28, %v1761_v32 }
 0x6a4   :  { %v1768_v50 = vadd.f32 %v1656_v14, %v1360_v38  ;;  %v1983_v20 = vadd.f32 %v7905_v7, %v1766_v10  ;;  %v1984_v37 = vadd.f32 %v7899_v40, %v1767_v6  ;;  %v1982_v17 = vadd.f32 %v10077_v55, %v1765_v44 }
 0x6a5   :  { %v1764_v22 = vadd.f32 %v1632_v2, %v1343_v46  ;;  %v1979_v19 = vadd.f32 %v10078_v30, %v1762_v5  ;;  %v1980_v59 = vadd.f32 %v7891_v16, %v1763_v8  ;;  %v10079_v38 = vcombine.high %v7899_v40, %v7899_v40 }
 0x6a6   :  { %v8021_v6 = vrot.slane %v1705_v11, %v7490_v15  ;;  %v8026_v1 = vrot.slane %v1604_v31, %v7490_v15  ;;  %v2026_v28 = vadd.f32 %v7880_v45, %v1978_v60  ;;  %v2031_v40 = vadd.f32 %v7883_v12, %v1983_v20 }
 0x6a7   :  { %v1985_v7 = vadd.f32 %v10079_v38, %v1768_v50  ;;  %v1981_v46 = vadd.f32 %v7888_v35, %v1764_v22  ;;  %v2027_v5 = vadd.f32 %v7979_v52, %v1979_v19  ;;  %v2028_v16 = vadd.f32 %v7883_v12, %v1980_v59 }
 0x6a8   :  { %v2032_v2 = vadd.f32 %v7880_v45, %v1984_v37  ;;  %v8036_v13 = vrot.slane %v1721_v3, %v7490_v15  ;;  %v2030_v62 = vadd.f32 %v7979_v52, %v1982_v17  ;;  %v6754_v14 = vpop.f32.mrb[4].mxu0  ;;  %v1736_v60 = vcombine.high %v8008_v39, %v8008_v39 }
 0x6a9   :  { %v2033_v11 = vadd.f32 %v7979_v52, %v1985_v7  ;;  %v2029_v57 = vadd.f32 %v7880_v45, %v1981_v46  ;;  %v2074_v35 = vcombine.low %v2026_v28, %v2027_v5  ;;  %v2088_v31 = vrot.slane %v2028_v16, %v7490_v15  ;;  %v1302_v32 = vpop.f32.mrb[5].mxu0 }
 0x6aa   :  { %v1378_v51 = vcombine.high %v6754_v14, %v6754_v14  ;;  %v1385_v44 = vrot.slane %v6754_v14, %v7490_v15  ;;  %v1361_v8 = vcombine.high %v1302_v32, %v1302_v32  ;;  %v1368_v50 = vrot.slane %v1302_v32, %v7490_v15 }
 0x6ab   :  { %v2106_v0 = vcombine.low %v2032_v2, %v2033_v11  ;;  %v2081_v10 = vrot.slane %v2074_v35, %v7490_v15  ;;  %v2090_v3 = vcombine.low %v2029_v57, %v2030_v62  ;;  %v2104_v20 = vrot.slane %v2031_v40, %v7490_v15 }
 0x6ac   :  { %v1392_v37 = vrot.slane %v1378_v51, %v7490_v15  ;;  %v1393_v55 = vcombine.high %v1385_v44, %v1385_v44  ;;  %v1773_v17 = vadd.f32 %v7959_v9, %v1385_v44  ;;  %v1375_v19 = vrot.slane %v1361_v8, %v7490_v15 }
 0x6ad   :  { %v2089_v22 = vcombine.low %v2081_v10, %v2088_v31  ;;  %v2097_v30 = vrot.slane %v2090_v3, %v7490_v15  ;;  %v1376_v59 = vcombine.high %v1368_v50, %v1368_v50  ;;  %v10080_v7 = vcombine.high %v7959_v9, %v7959_v9 }
 0x6ae   :  { %v1394_v38 = vcombine.high %v1392_v37, %v1392_v37  ;;  %v1775_v28 = vadd.f32 %v7982_v27, %v1392_v37  ;;  %v1990_v5 = vadd.f32 %v7917_v4, %v1773_v17  ;;  %v1377_v2 = vcombine.high %v1375_v19, %v1375_v19 }
 0x6af   :  { %v1774_v46 = vadd.f32 %v10080_v7, %v1393_v55  ;;  %v8056_v16 = vcombine.low %v2097_v30, %v2104_v20  ;;  %v8059_v40 = vadd.f32 %v2089_v22, %v7505_v43  ;;  %v1769_v11 = vadd.f32 %v7995_v61, %v1368_v50 }
 0x6b0   :  { %v1776_v62 = vadd.f32 %v7990_v41, %v1394_v38  ;;  %v10081_v57 = vcombine.high %v7917_v4, %v7917_v4  ;;  %v1992_v9 = vadd.f32 %v7938_v23, %v1775_v28  ;;  %v8068_v27 = vrot.slane %v1689_v18, %v7490_v15 }
 0x6b1   :  { %v1770_v14 = vadd.f32 %v7975_v48, %v1376_v59  ;;  %v10082_v43 = vcombine.high %v7975_v48, %v7975_v48  ;;  %v1772_v51 = vadd.f32 %v7998_v33, %v1377_v2  ;;  %v2113_v61 = vrot.slane %v2106_v0, %v7490_v15  ;;  %2396 = vperm.xlu1 %6954, %v8059_v40  }
 0x6b2   :  { %v1991_v35 = vadd.f32 %v10081_v57, %v1774_v46  ;;  %v2038_v4 = vadd.f32 %v7880_v45, %v1990_v5  ;;  %v2040_v23 = vadd.f32 %v7883_v12, %v1992_v9  ;;  %v1986_v18 = vadd.f32 %v7921_v26, %v1769_v11  ;;  %2345 = vperm.xlu0 %6953, %v8059_v40   ;;  %v6757_v32 = vpop.f32.mrb[6].mxu0 }
 0x6b3   :  { %v1771_v31 = vadd.f32 %v10082_v43, %v1375_v19  ;;  %v1987_v48 = vadd.f32 %v7912_v47, %v1770_v14  ;;  %v10083_v33 = vcombine.high %v7912_v47, %v7912_v47  ;;  %v1989_v0 = vadd.f32 %v7924_v21, %v1772_v51  ;;  %v1312_v8 = vpop.f32.mrb[7].mxu0 }
 0x6b4   :  { %v2039_v44 = vadd.f32 %v7979_v52, %v1991_v35  ;;  %v1412_v3 = vcombine.high %v6757_v32, %v6757_v32  ;;  %v2152_v20 = vrot.slane %v2040_v23, %v7490_v15  ;;  %v2034_v37 = vadd.f32 %v7883_v12, %v1986_v18 }
 0x6b5   :  { %v1988_v10 = vadd.f32 %v10083_v33, %v1771_v31  ;;  %v1419_v26 = vrot.slane %v6757_v32, %v7490_v15  ;;  %v2035_v55 = vadd.f32 %v7880_v45, %v1987_v48  ;;  %v2037_v22 = vadd.f32 %v7883_v12, %v1989_v0 }
 0x6b6   :  { %v2138_v50 = vcombine.low %v2038_v4, %v2039_v44  ;;  %v1426_v47 = vrot.slane %v1412_v3, %v7490_v15  ;;  %v10084_v30 = vmov 0   ;;  %v2120_v19 = vrot.slane %v2034_v37, %v7490_v15 }
 0x6b7   :  { %v2036_v17 = vadd.f32 %v7979_v52, %v1988_v10  ;;  %6955 = vset.pattern.permute.xlu1 %v10084_v30  ;;  %v1427_v59 = vcombine.high %v1419_v26, %v1419_v26  ;;  %v1781_v38 = vadd.f32 %v8021_v6, %v1419_v26  ;;  %v2136_v46 = vrot.slane %v2037_v22, %v7490_v15 }
 0x6b8   :  { %v2145_v21 = vrot.slane %v2138_v50, %v7490_v15  ;;  %v1428_v28 = vcombine.high %v1426_v47, %v1426_v47  ;;  %v1783_v5 = vadd.f32 %v1736_v60, %v1426_v47  ;;  %v2121_v11 = vcombine.low %v2113_v61, %v2120_v19 }
 0x6b9   :  { %v2122_v7 = vcombine.low %v2035_v55, %v2036_v17  ;;  %v1782_v57 = vadd.f32 %v8008_v39, %v1427_v59  ;;  %v1704_v35 = vcombine.high %v7990_v41, %v7990_v41  ;;  %v10085_v43 = vcombine.high %v7947_v29, %v7947_v29 }
 0x6ba   :  { %v2153_v2 = vcombine.low %v2145_v21, %v2152_v20  ;;  %v1784_v14 = vadd.f32 %v8036_v13, %v1428_v28  ;;  %v1395_v31 = vcombine.high %v1312_v8, %v1312_v8  ;;  %v8111_v60 = vadd.f32 %v2121_v11, %v7524_v58 }
 0x6bb   :  { %v2129_v9 = vrot.slane %v2122_v7, %v7490_v15  ;;  %v2000_v6 = vadd.f32 %v10085_v43, %v1783_v5  ;;  %v1999_v39 = vadd.f32 %v7947_v29, %v1782_v57  ;;  %v1720_v41 = vcombine.high %v8026_v1, %v8026_v1 }
 0x6bc   :  { %v8108_v51 = vadd.f32 %v2153_v2, %v7516_v53  ;;  %v2001_v4 = vadd.f32 %v7965_v24, %v1784_v14  ;;  %v1402_v44 = vrot.slane %v1312_v8, %v7490_v15  ;;  %v1409_v53 = vrot.slane %v1395_v31, %v7490_v15  ;;  %2355 = vperm.xlu1 %6955, %v8111_v60  }
 0x6bd   :  { %v2137_v61 = vcombine.low %v2129_v9, %v2136_v46  ;;  %v2048_v13 = vadd.f32 %v7979_v52, %v2000_v6  ;;  %v2047_v23 = vadd.f32 %v7880_v45, %v1999_v39  ;;  %v1993_v58 = vadd.f32 %v7927_v34, %v1776_v62 }
 0x6be   :  { %v2049_v29 = vadd.f32 %v7883_v12, %v2001_v4  ;;  %v1410_v18 = vcombine.high %v1402_v44, %v1402_v44  ;;  %v1777_v32 = vadd.f32 %v1704_v35, %v1402_v44  ;;  %2365 = vperm.xlu0 %6953, %v8108_v51   ;;  %v8127_v24 = vadd.f32 %v8056_v16, %v7503_v42 }
 0x6bf   :  { %v2186_v48 = vcombine.low %v2047_v23, %v2048_v13  ;;  %v1411_v33 = vcombine.high %v1409_v53, %v1409_v53  ;;  %v1779_v10 = vadd.f32 %v8026_v1, %v1409_v53  ;;  %v8131_v0 = vadd.f32 %v2137_v61, %v7511_v49  ;;  %v10089_v53 = vld [vmem:[#allocation21_spill] sm:$0xff] }
 0x6c0   :  { %v2200_v3 = vrot.slane %v2049_v29, %v7490_v15  ;;  %v1778_v62 = vadd.f32 %v8068_v27, %v1410_v18  ;;  %v10086_v8 = vcombine.high %v7927_v34, %v7927_v34  ;;  %v1998_v20 = vadd.f32 %v7962_v36, %v1781_v38 }
 0x6c1   :  { %v2193_v42 = vrot.slane %v2186_v48, %v7490_v15  ;;  %v1780_v16 = vadd.f32 %v1720_v41, %v1411_v33  ;;  %v1996_v37 = vadd.f32 %v7933_v54, %v1779_v10  ;;  %v10087_v26 = vmov 1  }
 0x6c2   :  { %v1994_v50 = vadd.f32 %v10086_v8, %v1777_v32  ;;  %6956 = vset.pattern.permute.xlu1 %v10087_v26  ;;  %v1995_v49 = vadd.f32 %v7944_v25, %v1778_v62  ;;  %v2041_v1 = vadd.f32 %v7880_v45, %v1993_v58  ;;  %v10088_v36 = vcombine.high %v7933_v54, %v7933_v54 }
 0x6c3   :  { %2404 = vperm.xlu1 %6956, %v8111_v60   ;;  %v2201_v34 = vcombine.low %v2193_v42, %v2200_v3  ;;  %v6147_v17 = vrot.slane %v8127_v24, 7  ;;  %v6149_v25 = vrot.slane %v8111_v60, 6  ;;  %v6151_v21 = vrot.slane %v8131_v0, 5 }
 0x6c4   :  { %v2042_v55 = vadd.f32 %v7979_v52, %v1994_v50  ;;  %v1997_v27 = vadd.f32 %v10088_v36, %v1780_v16  ;;  %v2043_v22 = vadd.f32 %v7883_v12, %v1995_v49  ;;  %v2046_v19 = vadd.f32 %v7883_v12, %v1998_v20 }
 0x6c5   :  { %v2044_v59 = vadd.f32 %v7880_v45, %v1996_v37  ;;  %v6148_v54 = vsel %vm5890_vm5, %v6147_v17, %v8059_v40  ;;  %v6153_v5 = vrot.slane %v8108_v51, 4  ;;  %v6273_v12 = vrot.slane %v8059_v40, 2 }
 0x6c6   :  { %v2154_v47 = vcombine.low %v2041_v1, %v2042_v55  ;;  %v2045_v38 = vadd.f32 %v7979_v52, %v1997_v27  ;;  %v2168_v46 = vrot.slane %v2043_v22, %v7490_v15  ;;  %v6150_v28 = vsel %vm5892_vm6, %v6149_v25, %v6148_v54 }
 0x6c7   :  { %6957 = vset.pattern.permute.xlu1 %v10084_v30  ;;  %v6152_v45 = vsel %vm5894_vm7, %v6151_v21, %v6150_v28  ;;  %v6274_v52 = vrot.slane %v8127_v24, 1  ;;  %v6277_v35 = vrot.slane %v8131_v0, 7  ;;  %v2184_v9 = vrot.slane %v2046_v19, %v7490_v15 }
 0x6c8   :  { %v2161_v7 = vrot.slane %v2154_v47, %v7490_v15  ;;  %v2170_v2 = vcombine.low %v2044_v59, %v2045_v38  ;;  %2350 = vperm.xlu1 %6957, %v8127_v24   ;;  %v6154_v57 = vsel %vm5896_vm8, %v6153_v5, %v6152_v45  ;;  %v8173_v6 = vadd.f32 %v2201_v34, %v7531_v63 }
 0x6c9   :  { %v6275_v43 = vsel %vm5890_vm5, %v6274_v52, %v6273_v12  ;;  %v6279_v41 = vrot.slane %v8108_v51, 6  ;;  %v6399_v13 = vrot.slane %v8059_v40, 4  ;;  %v6400_v44 = vrot.slane %v8127_v24, 3 }
 0x6ca   :  { %v2169_v11 = vcombine.low %v2161_v7, %v2168_v46  ;;  %v2177_v14 = vrot.slane %v2170_v2, %v7490_v15  ;;  %v6276_v39 = vsel %vm5892_vm6, %v8111_v60, %v6275_v43  ;;  %v6402_v23 = vrot.slane %v8111_v60, 2 }
 0x6cb   :  { %v6278_v4 = vsel %vm5894_vm7, %v6277_v35, %v6276_v39  ;;  %v6401_v18 = vsel %vm5890_vm5, %v6400_v44, %v6399_v13  ;;  %v6404_v32 = vrot.slane %v8131_v0, 1  ;;  %v6159_v48 = vrot.slane %v8173_v6, 1 }
 0x6cc   :  { %v8176_v31 = vadd.f32 %v2169_v11, %v7521_v56  ;;  %v2185_v61 = vcombine.low %v2177_v14, %v2184_v9  ;;  %6958 = vset.pattern.permute.xlu1 %v10087_v26  ;;  %v6280_v63 = vsel %vm5896_vm8, %v6279_v41, %v6278_v4  ;;  %v6285_v8 = vrot.slane %v8173_v6, 3 }
 0x6cd   :  { %2400 = vperm.xlu1 %6958, %v8127_v24   ;;  %v6403_v50 = vsel %vm5892_vm6, %v6402_v23, %v6401_v18  ;;  %v6411_v36 = vrot.slane %v8173_v6, 5  ;;  %v6458_v17 = vrot.slane %v8059_v40, 5  ;;  %v6459_v22 = vrot.slane %v8127_v24, 4 }
 0x6ce   :  { %2370 = vperm.xlu0 %6953, %v8176_v31   ;;  %v6155_v56 = vrot.slane %v8176_v31, 3  ;;  %v8191_v58 = vadd.f32 %v2185_v61, %v10089_v53  ;;  %v6281_v29 = vrot.slane %v8176_v31, 5  ;;  %v6407_v20 = vrot.slane %v8176_v31, 7 }
 0x6cf   :  { %v6405_v49 = vsel %vm5894_vm7, %v6404_v32, %v6403_v50  ;;  %v6461_v47 = vrot.slane %v8111_v60, 3  ;;  %v6463_v21 = vrot.slane %v8131_v0, 2  ;;  %v6460_v59 = vsel %vm5890_vm5, %v6459_v22, %v6458_v17  ;;  %v2342_v50 = vld [vmem:[%s10007_s11] sm:$0x3]  ;;  %s7217_s11 = smov 102  }
 0x6d0   :  { %v6156_v33 = vsel %vm5898_vm9, %v6155_v56, %v6154_v57  ;;  %v6157_v10 = vrot.slane %v8191_v58, 2  ;;  %v6282_v3 = vsel %vm5898_vm9, %v6281_v29, %v6280_v63  ;;  %v6283_v62 = vrot.slane %v8191_v58, 4 }
 0x6d1   :  { %2412 = vperm.xlu1 %6958, %v8108_v51   ;;  %v6409_v42 = vrot.slane %v8191_v58, 6  ;;  %v6406_v34 = vsel %vm5896_vm8, %v8108_v51, %v6405_v49  ;;  %v6465_v38 = vrot.slane %v8108_v51, 1  ;;  %v6468_v54 = vrot.slane %v8191_v58, 7 }
 0x6d2   :  { %2375 = vperm.xlu0 %6953, %v8191_v58   ;;  %v6158_v16 = vsel %vm5900_vm10, %v6157_v10, %v6156_v33  ;;  %v6284_v37 = vsel %vm5900_vm10, %v6283_v62, %v6282_v3  ;;  %v6408_v27 = vsel %vm5898_vm9, %v6407_v20, %v6406_v34  ;;  %v6462_v7 = vsel %vm5892_vm6, %v6461_v47, %v6460_v59  ;;  %v10097_v10 = vld [vmem:[#allocation26_spill] sm:$0xff]  ;;  %v10098_v62 = vld [vmem:[#allocation28_spill] sm:$0xff] }
 0x6d3   :  { %v8211_v1 = vsel %vm5902_vm11, %v6159_v48, %v6158_v16  ;;  %v8214_v55 = vsel %vm5902_vm11, %v6285_v8, %v6284_v37  ;;  %v6410_v25 = vsel %vm5900_vm10, %v6409_v42, %v6408_v27  ;;  %v6332_v46 = vrot.slane %v8059_v40, 3  ;;  %v3849_v20 = vld [vmem:[%s10012_s16] sm:$0x3]  ;;  %v10099_v42 = vld [vmem:[#allocation18_spill] sm:$0xff]  ;;  %v10100_v37 = vld [vmem:[#allocation17_spill] sm:$0xff]  ;;  %s7218_s16 = smov 110  }
 0x6d4   :  { %10090 = vst [vmem:[#allocation21_spill] sm:$0xff] %v8211_v1  ;;  %10091 = vst [vmem:[#allocation30_spill] sm:$0xff] %v8214_v55  ;;  %v8229_v19 = vsel %vm5902_vm11, %v6411_v36, %v6410_v25  ;;  %v6333_v28 = vrot.slane %v8127_v24, 2  ;;  %v6335_v5 = vrot.slane %v8111_v60, 1  ;;  %v6464_v2 = vsel %vm5894_vm7, %v6463_v21, %v6462_v7  ;;  %v8312_v27 = vld [vmem:[#allocation5 + $0x8] sm:$0xff] }
 0x6d5   :  { %6959 = vset.pattern.permute.xlu1 %v10084_v30  ;;  %10092 = vst [vmem:[#allocation31_spill] sm:$0xff] %v8229_v19  ;;  %v6470_v45 = vrot.slane %v8173_v6, 6  ;;  %v6338_v12 = vrot.slane %v8108_v51, 7  ;;  %v6466_v52 = vsel %vm5896_vm8, %v6465_v38, %v6464_v2  ;;  %v6340_v57 = vrot.slane %v8176_v31, 6 }
 0x6d6   :  { %2380 = vperm.xlu0 %6953, %v8173_v6   ;;  %2360 = vperm.xlu1 %6959, %v8131_v0   ;;  %v6334_v11 = vsel %vm5890_vm5, %v6333_v28, %v6332_v46  ;;  %v6206_v35 = vrot.slane %v8059_v40, 1  ;;  %v6467_v9 = vsel %vm5898_vm9, %v8176_v31, %v6466_v52  ;;  %v6208_v43 = vrot.slane %v8111_v60, 7  ;;  %v10101_v28 = vld [vmem:[#allocation23_spill] sm:$0xff] }
 0x6d7   :  { %v6336_v14 = vsel %vm5892_vm6, %v6335_v5, %v6334_v11  ;;  %v6210_v39 = vrot.slane %v8131_v0, 6  ;;  %v6469_v41 = vsel %vm5900_vm10, %v6468_v54, %v6467_v9  ;;  %v6342_v40 = vrot.slane %v8191_v58, 5 }
 0x6d8   :  { %v6337_v61 = vsel %vm5894_vm7, %v8131_v0, %v6336_v14  ;;  %v8259_v4 = vsel %vm5902_vm11, %v6470_v45, %v6469_v41  ;;  %v6214_v44 = vrot.slane %v8176_v31, 4  ;;  %v6216_v23 = vrot.slane %v8191_v58, 3  ;;  %v3460_v14 = vld [vmem:[%s10010_s14] sm:$0x3]  ;;  %s7219_s14 = smov 52  }
 0x6d9   :  { %10093 = vst [vmem:[#allocation32_spill] sm:$0xff] %v8259_v4  ;;  %v6339_v13 = vsel %vm5896_vm8, %v6338_v12, %v6337_v61  ;;  %v6344_v53 = vrot.slane %v8173_v6, 4  ;;  %v6218_v48 = vrot.slane %v8173_v6, 2  ;;  %v8305_v49 = vrot.slane %v2342_v50, %v10100_v37 }
 0x6da   :  { %6960 = vset.pattern.permute.xlu1 %v10087_v26  ;;  %v6207_v26 = vsel %vm5890_vm5, %v8127_v24, %v6206_v35  ;;  %v6341_v56 = vsel %vm5898_vm9, %v6340_v57, %v6339_v13  ;;  %v8308_v34 = vrot.slane %v3849_v20, %v10100_v37  ;;  %v8329_v7 = vrot.slane %v8312_v27, %v10100_v37 }
 0x6db   :  { %2408 = vperm.xlu1 %6960, %v8131_v0   ;;  %v6209_v60 = vsel %vm5892_vm6, %v6208_v43, %v6207_v26  ;;  %v6212_v0 = vrot.slane %v8108_v51, 5  ;;  %v6343_v24 = vsel %vm5900_vm10, %v6342_v40, %v6341_v56  ;;  %v8333_v5 = vrot.slane %v8312_v27, %v10101_v28 }
 0x6dc   :  { %v6211_v63 = vsel %vm5894_vm7, %v6210_v39, %v6209_v60  ;;  %v8273_v18 = vsel %vm5902_vm11, %v6344_v53, %v6343_v24  ;;  %v8351_v43 = vrot.slane %v3460_v14, %v10099_v42  ;;  %v8354_v39 = vrot.slane %v3460_v14, %v10100_v37 }
 0x6dd   :  { %v6213_v29 = vsel %vm5896_vm8, %v6212_v0, %v6211_v63  ;;  %10094 = vst [vmem:[#allocation33_spill] sm:$0xff] %v8273_v18  ;;  %v2293_v53 = vcombine.high %v10097_v10, %v10097_v10 }
 0x6de   :  { %v6215_v32 = vsel %vm5898_vm9, %v6214_v44, %v6213_v29 }
 0x6df   :  { %2416 = vperm.xlu1 %6960, %v8176_v31   ;;  %v6217_v33 = vsel %vm5900_vm10, %v6216_v23, %v6215_v32  ;;  %v10096_v31 = vld [vmem:[#allocation22_spill] sm:$0xff] }
 0x6e0   :  { %v8279_v51 = vsel %vm5902_vm11, %v6218_v48, %v6217_v33  ;;  %v2300_v3 = vrot.slane %v10097_v10, %v10096_v31  ;;  %v3807_v8 = vrot.slane %v10098_v62, %v10096_v31 }
 0x6e1   :  { %10095 = vst [vmem:[#allocation34_spill] sm:$0xff] %v8279_v51 }
 0x6e2   :  { %v8302_v16 = vrot.slane %v3807_v8, %v10096_v31  ;;  %v3815_v63 = vcombine.high %v3807_v8, %v3807_v8  ;;  %v2308_v24 = vcombine.high %v2300_v3, %v2300_v3 }
 0x6e3   :  { %2420 = vperm.xlu1 %6960, %v8191_v58   ;;  %v8295_v58 = vrot.slane %v2342_v50, %v10099_v42  ;;  %v2307_v50 = vrot.slane %v2293_v53, %v10096_v31 }
 0x6e4   :  { %v3885_v21 = vrot.slane %v8302_v16, %v10100_v37  ;;  %v8375_v32 = vrot.slane %v3815_v63, %v10096_v31  ;;  %v2330_v8 = vrot.slane %v2308_v24, %v10096_v31 }
 0x6e7   :  { %2424 = vperm.xlu1 %6960, %v8173_v6   ;;  %v8298_v6 = vrot.slane %v3849_v20, %v10099_v42 }
 0x6eb   :  { %6961 = vset.pattern.permute.xlu1 %v10084_v30  ;;  %v2316_v30 = vrot.slane %v2300_v3, %v10096_v31 }
 0x6ed   :  { %v2450_v25 = vrot.slane %v2316_v30, %v10100_v37  ;;  %v2338_v9 = vcombine.high %v2316_v30, %v2316_v30 }
 0x6ef   :  { %v2458_v61 = vrot.slane %v2338_v9, %v10100_v37 }
 0x730   :  { %v8310_v36 = vpop.permute.xlu1 %2396 }
 0x731   :  { %v2431_v17 = vmul.f32 %v8295_v58, %v8310_v36  ;;  %v3866_v22 = vmul.f32 %v8298_v6, %v8310_v36  ;;  %v8318_v47 = vpop.permute.xlu0 %2345 }
 0x732   :  { %v2387_v59 = vmul.f32 %v8305_v49, %v8318_v47  ;;  %v3854_v38 = vmul.f32 %v8308_v34, %v8318_v47 }
 0x734   :  { %v2439_v54 = vadd.f32 %v2431_v17, %v2387_v59  ;;  %v3874_v46 = vadd.f32 %v3866_v22, %v3854_v38  ;;  %v3889_v59 = vrot.slane %v8375_v32, %v10100_v37 }
 0x736   :  { %v2487_v2 = vadd.f32 %v2450_v25, %v2439_v54  ;;  %v3922_v45 = vadd.f32 %v3885_v21, %v3874_v46 }
 0x738   :  { %v8336_v12 = vadd.f32 %v8329_v7, %v2487_v2  ;;  %v8339_v52 = vadd.f32 %v8333_v5, %v3922_v45  ;;  %v2323_v2 = vrot.slane %v2307_v50, %v10096_v31 }
 0x73a   :  { %v2507_v11 = vsel %vm828_vm2, %v8336_v12, 0.0  ;;  %v3942_v57 = vsel %vm828_vm2, %v8339_v52, 0.0 }
 0x73b   :  { %v8345_v35 = vpop.permute.xlu1 %2355  ;;  %2508 = vadd.xlane.f32.xlu0 %v2507_v11  ;;  %3943 = vadd.xlane.f32.xlu1 %v3942_v57  ;;  %v2454_v57 = vrot.slane %v2330_v8, %v10100_v37 }
 0x73c   :  { %v2389_v40 = vmul.f32 %v8305_v49, %v8345_v35  ;;  %v3467_v26 = vmul.f32 %v8354_v39, %v8345_v35 }
 0x73d   :  { %v8383_v3 = vpop.permute.xlu0 %2365 }
 0x73e   :  { %v2391_v45 = vmul.f32 %v8305_v49, %v8383_v3 }
 0x742   :  { %v8356_v41 = vpop.permute.xlu1 %2404 }
 0x743   :  { %v2433_v13 = vmul.f32 %v8295_v58, %v8356_v41  ;;  %v3479_v60 = vmul.f32 %v8351_v43, %v8356_v41 }
 0x745   :  { %v2441_v44 = vadd.f32 %v2433_v13, %v2389_v40  ;;  %v8367_v56 = vadd.f32 %v3479_v60, %v3467_v26  ;;  %v2466_v13 = vrot.slane %v2323_v2, %v10100_v37  ;;  %v3800_v60 = vcombine.high %v10098_v62, %v10098_v62 }
 0x747   :  { %v2351_v0 = vpop.permute.xlu1 %2350  ;;  %v2489_v23 = vadd.f32 %v2458_v61, %v2441_v44  ;;  %v3814_v62 = vrot.slane %v3800_v60, %v10096_v31 }
 0x748   :  { %v2388_v20 = vmul.f32 %v8305_v49, %v2351_v0  ;;  %v3466_v30 = vmul.f32 %v8354_v39, %v2351_v0  ;;  %v3855_v17 = vmul.f32 %v8308_v34, %v2351_v0 }
 0x749   :  { %v8372_v29 = vadd.f32 %v8329_v7, %v2489_v23 }
 0x74b   :  { %v2513_v48 = vsel %vm828_vm2, %v8372_v29, 0.0 }
 0x74c   :  { %v2401_v33 = vpop.permute.xlu1 %2400  ;;  %2514 = vadd.xlane.f32.xlu0 %v2513_v48  ;;  %v2309_v48 = vcombine.high %v2307_v50, %v2307_v50  ;;  %v3845_v50 = vcombine.high %v8302_v16, %v8302_v16 }
 0x74d   :  { %v2432_v10 = vmul.f32 %v8295_v58, %v2401_v33  ;;  %v3478_v22 = vmul.f32 %v8351_v43, %v2401_v33  ;;  %v3867_v25 = vmul.f32 %v8298_v6, %v2401_v33  ;;  %v8407_v44 = vpop.permute.xlu0 %2370  ;;  %v2340_v33 = vcombine.high %v2330_v8, %v2330_v8 }
 0x74e   :  { %v2392_v16 = vmul.f32 %v8305_v49, %v8407_v44 }
 0x74f   :  { %v2440_v21 = vadd.f32 %v2432_v10, %v2388_v20  ;;  %v8391_v38 = vadd.f32 %v3478_v22, %v3466_v30  ;;  %v3875_v54 = vadd.f32 %v3867_v25, %v3855_v17 }
 0x750   :  { %v8393_v46 = vpop.permute.xlu1 %2412 }
 0x751   :  { %v2435_v11 = vmul.f32 %v8295_v58, %v8393_v46  ;;  %v2488_v14 = vadd.f32 %v2454_v57, %v2440_v21  ;;  %v3923_v61 = vadd.f32 %v3889_v59, %v3875_v54  ;;  %v3816_v21 = vcombine.high %v3814_v62, %v3814_v62  ;;  %v8428_v8 = vpop.permute.xlu0 %2375 }
 0x753   :  { %v2443_v9 = vadd.f32 %v2435_v11, %v2391_v45  ;;  %v8402_v26 = vadd.f32 %v8329_v7, %v2488_v14  ;;  %v8412_v0 = vadd.f32 %v8333_v5, %v3923_v61  ;;  %v2337_v45 = vrot.slane %v2309_v48, %v10096_v31 }
 0x754   :  { %v3868_v11 = vmul.f32 %v8298_v6, %v8356_v41  ;;  %v2339_v14 = vcombine.high %v2323_v2, %v2323_v2  ;;  %v8439_v61 = vrot.slane %v3814_v62, %v10096_v31  ;;  %v8446_v60 = vrot.slane %v3816_v21, %v10096_v31 }
 0x755   :  { %v2361_v40 = vpop.permute.xlu1 %2360  ;;  %v2510_v63 = vsel %vm828_vm2, %v8402_v26, 0.0  ;;  %v2491_v23 = vadd.f32 %v2466_v13, %v2443_v9  ;;  %v3945_v53 = vsel %vm828_vm2, %v8412_v0, 0.0  ;;  %v2462_v9 = vrot.slane %v2340_v33, %v10100_v37 }
 0x756   :  { %2511 = vadd.xlane.f32.xlu1 %v2510_v63  ;;  %v2390_v20 = vmul.f32 %v8305_v49, %v2361_v40  ;;  %3946 = vadd.xlane.f32.xlu0 %v3945_v53  ;;  %v3468_v30 = vmul.f32 %v8354_v39, %v2361_v40  ;;  %v3856_v41 = vmul.f32 %v8308_v34, %v8345_v35 }
 0x757   :  { %v8417_v24 = vadd.f32 %v8329_v7, %v2491_v23  ;;  %v3846_v23 = vcombine.high %v8439_v61, %v8439_v61  ;;  %v3847_v2 = vcombine.high %v8375_v32, %v8375_v32  ;;  %v3893_v48 = vrot.slane %v3845_v50, %v10100_v37 }
 0x758   :  { %v3876_v33 = vadd.f32 %v3868_v11, %v3856_v41  ;;  %v3870_v62 = vmul.f32 %v8298_v6, %v8393_v46  ;;  %v2470_v35 = vrot.slane %v2337_v45, %v10100_v37  ;;  %v2474_v21 = vrot.slane %v2339_v14, %v10100_v37 }
 0x759   :  { %v2519_v25 = vsel %vm828_vm2, %v8417_v24, 0.0  ;;  %v3858_v50 = vmul.f32 %v8308_v34, %v8383_v3  ;;  %v3848_v41 = vcombine.high %v8446_v60, %v8446_v60 }
 0x75a   :  { %v2409_v10 = vpop.permute.xlu1 %2408  ;;  %2520 = vadd.xlane.f32.xlu1 %v2519_v25 }
 0x75b   :  { %v2434_v17 = vmul.f32 %v8295_v58, %v2409_v10  ;;  %v3480_v22 = vmul.f32 %v8351_v43, %v2409_v10  ;;  %v3869_v32 = vmul.f32 %v8298_v6, %v2409_v10  ;;  %v3901_v10 = vrot.slane %v8439_v61, %v10100_v37 }
 0x75d   :  { %v2442_v59 = vadd.f32 %v2434_v17, %v2390_v20  ;;  %v8430_v54 = vadd.f32 %v3480_v22, %v3468_v30  ;;  %v2393_v17 = vmul.f32 %v8305_v49, %v8428_v8  ;;  %v8465_v22 = vpop.permute.xlu0 %2380 }
 0x75e   :  { %v8435_v57 = vpop.permute.xlu1 %2416  ;;  %v2394_v14 = vmul.f32 %v8305_v49, %v8465_v22 }
 0x75f   :  { %v2436_v13 = vmul.f32 %v8295_v58, %v8435_v57  ;;  %v2490_v63 = vadd.f32 %v2462_v9, %v2442_v59  ;;  %v2341_v9 = vcombine.high %v2337_v45, %v2337_v45  ;;  %v3924_v45 = vadd.f32 %v3893_v48, %v3876_v33 }
 0x760   :  { %v3871_v61 = vmul.f32 %v8298_v6, %v8435_v57  ;;  %v3859_v33 = vmul.f32 %v8308_v34, %v8407_v44 }
 0x761   :  { %v2444_v53 = vadd.f32 %v2436_v13, %v2392_v16  ;;  %v8460_v30 = vadd.f32 %v8329_v7, %v2490_v63  ;;  %v3857_v16 = vmul.f32 %v8308_v34, %v2361_v40  ;;  %v3878_v63 = vadd.f32 %v3870_v62, %v3858_v50 }
 0x762   :  { %v8457_v20 = vpop.permute.xlu1 %2420  ;;  %v3861_v40 = vmul.f32 %v8308_v34, %v8465_v22  ;;  %v3897_v50 = vrot.slane %v3847_v2, %v10100_v37 }
 0x763   :  { %v2437_v25 = vmul.f32 %v8295_v58, %v8457_v20  ;;  %v2516_v59 = vsel %vm828_vm2, %v8460_v30, 0.0  ;;  %v2492_v11 = vadd.f32 %v2470_v35, %v2444_v53  ;;  %v3877_v53 = vadd.f32 %v3869_v32, %v3857_v16 }
 0x764   :  { %2517 = vadd.xlane.f32.xlu0 %v2516_v59  ;;  %v3872_v62 = vmul.f32 %v8298_v6, %v8457_v20  ;;  %v3879_v16 = vadd.f32 %v3871_v61, %v3859_v33  ;;  %v3926_v2 = vadd.f32 %v3901_v10, %v3878_v63 }
 0x765   :  { %v2445_v13 = vadd.f32 %v2437_v25, %v2393_v17  ;;  %v8485_v18 = vadd.f32 %v8329_v7, %v2492_v11  ;;  %v2478_v25 = vrot.slane %v2341_v9, %v10100_v37 }
 0x766   :  { %v8482_v51 = vpop.permute.xlu1 %2424 }
 0x767   :  { %v2438_v35 = vmul.f32 %v8295_v58, %v8482_v51  ;;  %v3873_v49 = vmul.f32 %v8298_v6, %v8482_v51  ;;  %v2522_v17 = vsel %vm828_vm2, %v8485_v18, 0.0  ;;  %v2493_v48 = vadd.f32 %v2474_v21, %v2445_v13 }
 0x768   :  { %2523 = vadd.xlane.f32.xlu0 %v2522_v17  ;;  %v3860_v58 = vmul.f32 %v8308_v34, %v8428_v8  ;;  %v3913_v6 = vrot.slane %v3848_v41, %v10100_v37  ;;  %v8510_v21 = vadd.f32 %v8333_v5, %v3924_v45  ;;  %v3909_v41 = vrot.slane %v3846_v23, %v10100_v37 }
 0x769   :  { %v2446_v32 = vadd.f32 %v2438_v35, %v2394_v14  ;;  %v3881_v59 = vadd.f32 %v3873_v49, %v3861_v40  ;;  %v8506_v11 = vadd.f32 %v8329_v7, %v2493_v48  ;;  %v3925_v14 = vadd.f32 %v3897_v50, %v3877_v53 }
 0x76a   :  { %v3880_v35 = vadd.f32 %v3872_v62, %v3860_v58  ;;  %v3905_v40 = vrot.slane %v8446_v60, %v10100_v37  ;;  %v3948_v63 = vsel %vm828_vm2, %v8510_v21, 0.0 }
 0x76b   :  { %v2494_v13 = vadd.f32 %v2478_v25, %v2446_v32  ;;  %v2525_v9 = vsel %vm828_vm2, %v8506_v11, 0.0  ;;  %v3929_v17 = vadd.f32 %v3913_v6, %v3881_v59  ;;  %v8526_v61 = vadd.f32 %v8333_v5, %v3925_v14 }
 0x76c   :  { %2526 = vadd.xlane.f32.xlu1 %v2525_v9  ;;  %v3927_v10 = vadd.f32 %v3905_v40, %v3879_v16  ;;  %v3928_v60 = vadd.f32 %v3909_v41, %v3880_v35 }
 0x76d   :  { %v8515_v34 = vadd.f32 %v8329_v7, %v2494_v13  ;;  %v8521_v45 = vadd.f32 %v8333_v5, %v3929_v17  ;;  %v8531_v7 = vadd.f32 %v8333_v5, %v3926_v2  ;;  %v3951_v23 = vsel %vm828_vm2, %v8526_v61, 0.0 }
 0x76e   :  { %v8536_v62 = vadd.f32 %v8333_v5, %v3927_v10  ;;  %v8541_v48 = vadd.f32 %v8333_v5, %v3928_v60 }
 0x76f   :  { %v2528_v53 = vsel %vm828_vm2, %v8515_v34, 0.0  ;;  %v3954_v49 = vsel %vm828_vm2, %v8531_v7, 0.0  ;;  %v3963_v25 = vsel %vm828_vm2, %v8521_v45, 0.0 }
 0x770   :  { %2529 = vadd.xlane.f32.xlu0 %v2528_v53  ;;  %3949 = vadd.xlane.f32.xlu1 %v3948_v63  ;;  %v3957_v33 = vsel %vm828_vm2, %v8536_v62, 0.0  ;;  %v3960_v32 = vsel %vm828_vm2, %v8541_v48, 0.0 }
 0x774   :  { %3952 = vadd.xlane.f32.xlu0 %v3951_v23  ;;  %3955 = vadd.xlane.f32.xlu1 %v3954_v49 }
 0x778   :  { %3958 = vadd.xlane.f32.xlu0 %v3957_v33  ;;  %3961 = vadd.xlane.f32.xlu1 %v3960_v32 }
 0x77c   :  { %3964 = vadd.xlane.f32.xlu0 %v3963_v25 }
 0x7c8   :  { %v2509_v50 = vpop.xlane.xlu0 %2508  ;;  %v3944_v58 = vpop.xlane.xlu1 %3943 }
 0x7c9   :  { %v2531_v59 = vmul.f32 0.029411765, %v2509_v50  ;;  %v3966_v6 = vmul.f32 0.029411765, %v3944_v58 }
 0x7cb   :  { %v8550_v5 = vsub.f32 %v8336_v12, %v2531_v59  ;;  %v8553_v16 = vsub.f32 %v8339_v52, %v3966_v6 }
 0x7cd   :  { %v2547_v13 = vmul.f32 %v8550_v5, %v8550_v5  ;;  %v3982_v35 = vmul.f32 %v8553_v16, %v8553_v16 }
 0x7cf   :  { %v2555_v14 = vsel %vm828_vm2, %v2547_v13, 0.0  ;;  %v3990_v9 = vsel %vm828_vm2, %v3982_v35, 0.0 }
 0x7d0   :  { %2556 = vadd.xlane.f32.xlu1 %v2555_v14 }
 0x7d4   :  { %3991 = vadd.xlane.f32.xlu1 %v3990_v9 }
 0x7d9   :  { %v2515_v2 = vpop.xlane.xlu0 %2514 }
 0x7da   :  { %v2533_v17 = vmul.f32 0.029411765, %v2515_v2 }
 0x7dc   :  { %v8562_v12 = vsub.f32 %v8372_v29, %v2533_v17 }
 0x7de   :  { %v2549_v52 = vmul.f32 %v8562_v12, %v8562_v12 }
 0x7e0   :  { %v2561_v40 = vsel %vm828_vm2, %v2549_v52, 0.0 }
 0x7e1   :  { %2562 = vadd.xlane.f32.xlu1 %v2561_v40 }
 0x7e3   :  { %v2512_v41 = vpop.xlane.xlu1 %2511  ;;  %v3947_v10 = vpop.xlane.xlu0 %3946 }
 0x7e4   :  { %v2532_v53 = vmul.f32 0.029411765, %v2512_v41  ;;  %v3967_v60 = vmul.f32 0.029411765, %v3947_v10 }
 0x7e6   :  { %v8568_v63 = vsub.f32 %v8402_v26, %v2532_v53  ;;  %v8571_v49 = vsub.f32 %v8412_v0, %v3967_v60 }
 0x7e7   :  { %v2521_v23 = vpop.xlane.xlu1 %2520 }
 0x7e8   :  { %v2535_v33 = vmul.f32 0.029411765, %v2521_v23  ;;  %v2548_v29 = vmul.f32 %v8568_v63, %v8568_v63  ;;  %v3983_v50 = vmul.f32 %v8571_v49, %v8571_v49 }
 0x7ea   :  { %v8576_v32 = vsub.f32 %v8417_v24, %v2535_v33  ;;  %v2558_v25 = vsel %vm828_vm2, %v2548_v29, 0.0  ;;  %v3993_v0 = vsel %vm828_vm2, %v3983_v50, 0.0 }
 0x7eb   :  { %2559 = vadd.xlane.f32.xlu0 %v2558_v25 }
 0x7ec   :  { %v2551_v26 = vmul.f32 %v8576_v32, %v8576_v32 }
 0x7ee   :  { %v2567_v58 = vsel %vm828_vm2, %v2551_v26, 0.0 }
 0x7ef   :  { %2568 = vadd.xlane.f32.xlu1 %v2567_v58  ;;  %3994 = vadd.xlane.f32.xlu0 %v3993_v0 }
 0x7f1   :  { %v2518_v59 = vpop.xlane.xlu0 %2517 }
 0x7f2   :  { %v2534_v6 = vmul.f32 0.029411765, %v2518_v59 }
 0x7f4   :  { %v8586_v24 = vsub.f32 %v8460_v30, %v2534_v6 }
 0x7f5   :  { %v2524_v13 = vpop.xlane.xlu0 %2523 }
 0x7f6   :  { %v2536_v14 = vmul.f32 0.029411765, %v2524_v13  ;;  %v2550_v35 = vmul.f32 %v8586_v24, %v8586_v24 }
 0x7f8   :  { %v8591_v9 = vsub.f32 %v8485_v18, %v2536_v14  ;;  %v2564_v2 = vsel %vm828_vm2, %v2550_v35, 0.0 }
 0x7f9   :  { %v2527_v17 = vpop.xlane.xlu1 %2526  ;;  %2565 = vadd.xlane.f32.xlu0 %v2564_v2 }
 0x7fa   :  { %v2537_v52 = vmul.f32 0.029411765, %v2527_v17  ;;  %v2552_v40 = vmul.f32 %v8591_v9, %v8591_v9 }
 0x7fc   :  { %v8597_v41 = vsub.f32 %v8506_v11, %v2537_v52  ;;  %v2570_v53 = vsel %vm828_vm2, %v2552_v40, 0.0 }
 0x7fd   :  { %v2530_v30 = vpop.xlane.xlu0 %2529  ;;  %v3950_v10 = vpop.xlane.xlu1 %3949  ;;  %2571 = vadd.xlane.f32.xlu0 %v2570_v53 }
 0x7fe   :  { %v2538_v60 = vmul.f32 0.029411765, %v2530_v30  ;;  %v3968_v23 = vmul.f32 0.029411765, %v3950_v10  ;;  %v2553_v18 = vmul.f32 %v8597_v41, %v8597_v41 }
 0x800   :  { %v8603_v33 = vsub.f32 %v8515_v34, %v2538_v60  ;;  %v8606_v29 = vsub.f32 %v8510_v21, %v3968_v23  ;;  %v2573_v11 = vsel %vm828_vm2, %v2553_v18, 0.0 }
 0x801   :  { %v3953_v25 = vpop.xlane.xlu0 %3952  ;;  %v3956_v26 = vpop.xlane.xlu1 %3955  ;;  %2574 = vadd.xlane.f32.xlu1 %v2573_v11 }
 0x802   :  { %v3969_v50 = vmul.f32 0.029411765, %v3953_v25  ;;  %v2554_v58 = vmul.f32 %v8603_v33, %v8603_v33  ;;  %v3970_v0 = vmul.f32 0.029411765, %v3956_v26  ;;  %v3984_v59 = vmul.f32 %v8606_v29, %v8606_v29  ;;  %v2779_v26 = vld [vmem:[%s10008_s12] sm:$0xff] }
 0x804   :  { %v8614_v6 = vsub.f32 %v8526_v61, %v3969_v50  ;;  %v2576_v34 = vsel %vm828_vm2, %v2554_v58, 0.0  ;;  %v8618_v21 = vsub.f32 %v8531_v7, %v3970_v0  ;;  %v3996_v13 = vsel %vm828_vm2, %v3984_v59, 0.0  ;;  %v2781_v0 = vld [vmem:[%s10008_s12 + $0x10] sm:$0xff]  ;;  %v2782_v59 = vld [vmem:[%s10008_s12 + $0x18] sm:$0xff] }
 0x805   :  { %v3959_v14 = vpop.xlane.xlu0 %3958  ;;  %2577 = vadd.xlane.f32.xlu0 %v2576_v34  ;;  %3997 = vadd.xlane.f32.xlu1 %v3996_v13  ;;  %v3962_v35 = vpop.xlane.xlu1 %3961  ;;  %v6888_v34 = vpack.c.bf16 %v2782_v59, %v2781_v0  ;;  %v2783_v13 = vld [vmem:[%s10008_s12 + $0x20] sm:$0x3]  ;;  %v10104_v0 = vld [vmem:[#allocation19_spill] sm:$0xff] }
 0x806   :  { %v3971_v2 = vmul.f32 0.029411765, %v3959_v14  ;;  %v3985_v17 = vmul.f32 %v8614_v6, %v8614_v6  ;;  %v3972_v52 = vmul.f32 0.029411765, %v3962_v35  ;;  %v3986_v61 = vmul.f32 %v8618_v21, %v8618_v21  ;;  %v4214_v14 = vld [vmem:[%s10102_s17] sm:$0xff]  ;;  %v4215_v35 = vld [vmem:[%s10102_s17 + $0x8] sm:$0xff] }
 0x807   :  { %v8683_v59 = vrot.slane %v8312_v27, %v10104_v0 }
 0x808   :  { %v8626_v40 = vsub.f32 %v8536_v62, %v3971_v2  ;;  %v3999_v7 = vsel %vm828_vm2, %v3985_v17, 0.0  ;;  %v8630_v30 = vsub.f32 %v8541_v48, %v3972_v52  ;;  %v4002_v53 = vsel %vm828_vm2, %v3986_v61, 0.0 }
 0x809   :  { %4000 = vadd.xlane.f32.xlu0 %v3999_v7  ;;  %v3965_v10 = vpop.xlane.xlu0 %3964  ;;  %4003 = vadd.xlane.f32.xlu1 %v4002_v53  ;;  %v8668_v2 = vpack.c.bf16 %v4215_v35, %v4214_v14 }
 0x80a   :  { %v3973_v60 = vmul.f32 0.029411765, %v3965_v10  ;;  %v3987_v23 = vmul.f32 %v8626_v40, %v8626_v40  ;;  %v3988_v18 = vmul.f32 %v8630_v30, %v8630_v30 }
 0x80c   :  { %v8638_v62 = vsub.f32 %v8521_v45, %v3973_v60  ;;  %v4005_v25 = vsel %vm828_vm2, %v3987_v23, 0.0  ;;  %v4008_v48 = vsel %vm828_vm2, %v3988_v18, 0.0  ;;  %v2780_v45 = vld [vmem:[%s10008_s12 + $0x8] sm:$0xff] }
 0x80d   :  { %4006 = vadd.xlane.f32.xlu0 %v4005_v25  ;;  %4009 = vadd.xlane.f32.xlu1 %v4008_v48  ;;  %v6884_v58 = vpack.c.bf16 %v2780_v45, %v2779_v26  ;;  %v10103_v26 = vld [vmem:[#allocation24_spill] sm:$0xff] }
 0x80e   :  { %v3989_v11 = vmul.f32 %v8638_v62, %v8638_v62  ;;  %v8678_v45 = vrot.slane %v8312_v27, %v10103_v26 }
 0x80f   :  { %6885 = vmatprep.subr.bf16.mxu0 %v6884_v58 }
 0x810   :  { %v4011_v50 = vsel %vm828_vm2, %v3989_v11, 0.0  ;;  %6887 = vmatpush3.bf16.msra.mxu0 %v6884_v58  ;;  %v8673_v11 = vrot.slane %v8312_v27, %v10099_v42 }
 0x811   :  { %4012 = vadd.xlane.f32.xlu0 %v4011_v50  ;;  %6889 = vmatprep.subr.bf16.mxu0 %v6888_v34 }
 0x814   :  { %6891 = vmatpush3.bf16.msra.mxu0 %v6888_v34 }
 0x815   :  { %6788 = vmatprep.subr.msk.mxu0 %vm1222_vm3, %v2783_v13 }
 0x818   :  { %6789 = vmatpush3.msk.msra.mxu0 %vm1222_vm3, %v2783_v13 }
 0x819   :  { %6905 = vmatprep.subr.bf16.mxu0 %v8668_v2 }
 0x85d   :  { %v2557_v17 = vpop.xlane.xlu1 %2556 }
 0x85e   :  { %v2579_v52 = vmul.f32 0.029411765, %v2557_v17  ;;  %v10105_v17 = vld [vmem:[#allocation25_spill] sm:$0xff] }
 0x860   :  { %v2587_v7 = vadd.f32 1e-05, %v2579_v52  ;;  %v8689_v52 = vrot.slane %v8312_v27, %v10105_v17 }
 0x861   :  { %v3992_v61 = vpop.xlane.xlu1 %3991 }
 0x862   :  { %v4014_v53 = vmul.f32 0.029411765, %v3992_v61  ;;  %6980 = vrsqrt.f32 %v2587_v7 }
 0x864   :  { %v4022_v10 = vadd.f32 1e-05, %v4014_v53 }
 0x866   :  { %6982 = vrsqrt.f32 %v4022_v10 }
 0x86c   :  { %v6981_v25 = vpop.eup %6980 }
 0x86d   :  { %v2603_v50 = vmul.f32 %v6981_v25, %v8550_v5 }
 0x86e   :  { %v2563_v60 = vpop.xlane.xlu1 %2562 }
 0x86f   :  { %v2581_v23 = vmul.f32 0.029411765, %v2563_v60  ;;  %v2615_v34 = vmul.f32 %v8673_v11, %v2603_v50 }
 0x870   :  { %v6983_v48 = vpop.eup %6982 }
 0x871   :  { %v2589_v18 = vadd.f32 1e-05, %v2581_v23  ;;  %v4038_v58 = vmul.f32 %v6983_v48, %v8553_v16  ;;  %v2627_v7 = vadd.f32 %v8683_v59, %v2615_v34 }
 0x873   :  { %6984 = vrsqrt.f32 %v2589_v18  ;;  %v4050_v14 = vmul.f32 %v8678_v45, %v4038_v58  ;;  %v2635_v58 = vmax.f32 %v2627_v7, 0.0 }
 0x875   :  { %v4062_v18 = vadd.f32 %v8689_v52, %v4050_v14 }
 0x878   :  { %v2560_v13 = vpop.xlane.xlu0 %2559 }
 0x879   :  { %v2580_v35 = vmul.f32 0.029411765, %v2560_v13  ;;  %v4070_v13 = vmax.f32 %v4062_v18, 0.0  ;;  %v4216_v18 = vld [vmem:[%s10102_s17 + $0x10] sm:$0xff] }
 0x87b   :  { %v2588_v61 = vadd.f32 1e-05, %v2580_v35  ;;  %v4086_v26 = vcombine.high %v4070_v13, %v4070_v13 }
 0x87c   :  { %v2569_v53 = vpop.xlane.xlu1 %2568  ;;  %v3995_v10 = vpop.xlane.xlu0 %3994 }
 0x87d   :  { %v6985_v5 = vpop.eup %6984  ;;  %6986 = vrsqrt.f32 %v2588_v61  ;;  %v2583_v60 = vmul.f32 0.029411765, %v2569_v53  ;;  %v4015_v23 = vmul.f32 0.029411765, %v3995_v10 }
 0x87e   :  { %v2605_v16 = vmul.f32 %v6985_v5, %v8562_v12  ;;  %v2658_v12 = vrot.slane %v2635_v58, %v7490_v15  ;;  %v4093_v5 = vrot.slane %v4070_v13, %v7490_v15 }
 0x87f   :  { %v2591_v48 = vadd.f32 1e-05, %v2583_v60  ;;  %v4023_v50 = vadd.f32 1e-05, %v4015_v23  ;;  %v2651_v23 = vcombine.high %v2635_v58, %v2635_v58 }
 0x880   :  { %v2617_v25 = vmul.f32 %v8673_v11, %v2605_v16  ;;  %v2666_v10 = vcombine.high %v2658_v12, %v2658_v12 }
 0x881   :  { %6988 = vrsqrt.f32 %v2591_v48  ;;  %v4101_v48 = vcombine.high %v4093_v5, %v4093_v5  ;;  %v2665_v28 = vrot.slane %v2651_v23, %v7490_v15 }
 0x882   :  { %v2629_v27 = vadd.f32 %v8683_v59, %v2617_v25  ;;  %6990 = vrsqrt.f32 %v4023_v50  ;;  %v4217_v25 = vld [vmem:[%s10102_s17 + $0x18] sm:$0xff]  ;;  %v2784_v19 = vcombine.low %v2658_v12, %v2666_v10 }
 0x883   :  { %v8709_v55 = vpack.c.bf16 %v4217_v25, %v4216_v18 }
 0x884   :  { %v2637_v34 = vmax.f32 %v2629_v27, 0.0 }
 0x886   :  { %v2566_v35 = vpop.xlane.xlu0 %2565  ;;  %v2690_v14 = vrot.slane %v2637_v34, %v7490_v15  ;;  %v2683_v18 = vcombine.high %v2637_v34, %v2637_v34 }
 0x887   :  { %v2582_v61 = vmul.f32 0.029411765, %v2566_v35  ;;  %v6987_v53 = vpop.eup %6986 }
 0x888   :  { %v2604_v16 = vmul.f32 %v6987_v53, %v8568_v63  ;;  %v2698_v4 = vcombine.high %v2690_v14, %v2690_v14 }
 0x889   :  { %v2590_v60 = vadd.f32 1e-05, %v2582_v61 }
 0x88a   :  { %v2572_v7 = vpop.xlane.xlu0 %2571  ;;  %v2616_v50 = vmul.f32 %v8673_v11, %v2604_v16  ;;  %v8713_v16 = vcombine.low %v4093_v5, %v4101_v48 }
 0x88b   :  { %6992 = vrsqrt.f32 %v2590_v60  ;;  %v2584_v27 = vmul.f32 0.029411765, %v2572_v7  ;;  %v6989_v35 = vpop.eup %6988  ;;  %v2802_v7 = vcombine.low %v2690_v14, %v2698_v4 }
 0x88c   :  { %v6991_v63 = vpop.eup %6990  ;;  %v2607_v61 = vmul.f32 %v6989_v35, %v8576_v32  ;;  %v2628_v53 = vadd.f32 %v8683_v59, %v2616_v50  ;;  %v2792_v50 = vrot.slane %v2784_v19, %v7490_v15 }
 0x88d   :  { %v2592_v58 = vadd.f32 1e-05, %v2584_v27  ;;  %v4039_v1 = vmul.f32 %v6991_v63, %v8571_v49 }
 0x88e   :  { %v2575_v17 = vpop.xlane.xlu1 %2574  ;;  %v2619_v60 = vmul.f32 %v8673_v11, %v2607_v61  ;;  %v2636_v10 = vmax.f32 %v2628_v53, 0.0  ;;  %v8728_v61 = vrot.slane %v2683_v18, %v7490_v15 }
 0x88f   :  { %6994 = vrsqrt.f32 %v2592_v58  ;;  %v2585_v12 = vmul.f32 0.029411765, %v2575_v17  ;;  %v4051_v32 = vmul.f32 %v8678_v45, %v4039_v1  ;;  %v8722_v17 = vrot.slane %v4086_v26, %v7490_v15 }
 0x890   :  { %v2667_v49 = vcombine.high %v2636_v10, %v2636_v10  ;;  %v2674_v35 = vrot.slane %v2636_v10, %v7490_v15  ;;  %v2631_v13 = vadd.f32 %v8683_v59, %v2619_v60  ;;  %v4227_v1 = vrot.slane %v8713_v16, %v7490_v15 }
 0x891   :  { %v2593_v25 = vadd.f32 1e-05, %v2585_v12  ;;  %v4063_v48 = vadd.f32 %v8689_v52, %v4051_v32  ;;  %v2816_v26 = vrot.slane %v2802_v7, %v7490_v15 }
 0x892   :  { %v2578_v27 = vpop.xlane.xlu0 %2577  ;;  %v3998_v5 = vpop.xlane.xlu1 %3997  ;;  %v2681_v4 = vrot.slane %v2667_v49, %v7490_v15  ;;  %v2682_v34 = vcombine.high %v2674_v35, %v2674_v35  ;;  %v2785_v63 = vcombine.low %v2665_v28, %v2674_v35  ;;  %v2639_v58 = vmax.f32 %v2631_v13, 0.0 }
 0x893   :  { %v2586_v23 = vmul.f32 0.029411765, %v2578_v27  ;;  %6996 = vrsqrt.f32 %v2593_v25  ;;  %v4016_v19 = vmul.f32 0.029411765, %v3998_v5  ;;  %v4071_v32 = vmax.f32 %v4063_v48, 0.0 }
 0x894   :  { %v2801_v10 = vcombine.low %v2682_v34, %v2681_v4  ;;  %v2799_v49 = vrot.slane %v2785_v63, %v7490_v15  ;;  %v2715_v35 = vcombine.high %v2639_v58, %v2639_v58  ;;  %v2722_v4 = vrot.slane %v2639_v58, %v7490_v15 }
 0x895   :  { %v2594_v14 = vadd.f32 1e-05, %v2586_v23  ;;  %v6993_v53 = vpop.eup %6992  ;;  %v4024_v60 = vadd.f32 1e-05, %v4016_v19 }
 0x896   :  { %v4001_v12 = vpop.xlane.xlu0 %4000  ;;  %v2606_v27 = vmul.f32 %v6993_v53, %v8586_v24  ;;  %v4004_v25 = vpop.xlane.xlu1 %4003  ;;  %v2809_v18 = vrot.slane %v2801_v10, %v7490_v15  ;;  %v2800_v19 = vcombine.low %v2792_v50, %v2799_v49  ;;  %v4102_v53 = vcombine.high %v4071_v32, %v4071_v32 }
 0x897   :  { %6998 = vrsqrt.f32 %v2594_v14  ;;  %v4017_v5 = vmul.f32 0.029411765, %v4001_v12  ;;  %v4018_v28 = vmul.f32 0.029411765, %v4004_v25  ;;  %v8737_v14 = vrot.slane %v2715_v35, %v7490_v15 }
 0x898   :  { %7000 = vrsqrt.f32 %v4024_v60  ;;  %v2618_v13 = vmul.f32 %v8673_v11, %v2606_v27  ;;  %v2817_v34 = vcombine.low %v2809_v18, %v2816_v26  ;;  %6790 = vmatprep.mubr.msk.f32.mxu0 %vm1209_vm4, %v2800_v19  ;;  %v2730_v58 = vcombine.high %v2722_v4, %v2722_v4 }
 0x899   :  { %v4025_v23 = vadd.f32 1e-05, %v4017_v5  ;;  %v6995_v7 = vpop.eup %6994  ;;  %v4026_v48 = vadd.f32 1e-05, %v4018_v28  ;;  %v4109_v26 = vrot.slane %v4071_v32, %v7490_v15 }
 0x89a   :  { %v4007_v24 = vpop.xlane.xlu0 %4006  ;;  %v2608_v63 = vmul.f32 %v6995_v7, %v8591_v9  ;;  %v4010_v60 = vpop.xlane.xlu1 %4009  ;;  %v2630_v10 = vadd.f32 %v8683_v59, %v2618_v13  ;;  %6791 = vmatmul.mubr.msk.f32.vlgmr.msra.gmra.mrb[8].mxu0 %vm1209_vm4, %v2817_v34  ;;  %v4116_v9 = vrot.slane %v4102_v53, %v7490_v15  ;;  %v2835_v35 = vcombine.low %v2722_v4, %v2730_v58 }
 0x89b   :  { %7002 = vrsqrt.f32 %v4025_v23  ;;  %v4019_v12 = vmul.f32 0.029411765, %v4007_v24  ;;  %v4020_v50 = vmul.f32 0.029411765, %v4010_v60  ;;  %6907 = vmatpush3.bf16.msra.mxu0 %v8668_v2  ;;  %v4117_v13 = vcombine.high %v4109_v26, %v4109_v26  ;;  %v4218_v2 = vld [vmem:[%s10102_s17 + $0x20] sm:$0x3] }
 0x89c   :  { %7004 = vrsqrt.f32 %v4026_v48  ;;  %v2620_v27 = vmul.f32 %v8673_v11, %v2608_v63  ;;  %v2638_v5 = vmax.f32 %v2630_v10, 0.0  ;;  %6909 = vmatprep.subr.bf16.mxu0 %v8709_v55  ;;  %v4220_v23 = vcombine.low %v8722_v17, %v4109_v26 }
 0x89d   :  { %v4027_v25 = vadd.f32 1e-05, %v4019_v12  ;;  %v6997_v49 = vpop.eup %6996  ;;  %v4028_v28 = vadd.f32 1e-05, %v4020_v50  ;;  %v2843_v4 = vrot.slane %v2835_v35, %v7490_v15  ;;  %v4236_v35 = vcombine.low %v4117_v13, %v4116_v9 }
 0x89e   :  { %v4013_v18 = vpop.xlane.xlu0 %4012  ;;  %v2609_v19 = vmul.f32 %v6997_v49, %v8597_v41  ;;  %v2699_v7 = vcombine.high %v2638_v5, %v2638_v5  ;;  %v2706_v48 = vrot.slane %v2638_v5, %v7490_v15  ;;  %v2632_v34 = vadd.f32 %v8683_v59, %v2620_v27 }
 0x89f   :  { %7006 = vrsqrt.f32 %v4027_v25  ;;  %v4021_v32 = vmul.f32 0.029411765, %v4013_v18  ;;  %6911 = vmatpush3.bf16.msra.mxu0 %v8709_v55  ;;  %v4234_v63 = vrot.slane %v4220_v23, %v7490_v15 }
 0x8a0   :  { %7008 = vrsqrt.f32 %v4028_v28  ;;  %v2621_v53 = vmul.f32 %v8673_v11, %v2609_v19  ;;  %v2713_v41 = vrot.slane %v2699_v7, %v7490_v15  ;;  %v2714_v10 = vcombine.high %v2706_v48, %v2706_v48  ;;  %6829 = vmatprep.subr.msk.mxu0 %vm1222_vm3, %v4218_v2 }
 0x8a1   :  { %v6999_v24 = vpop.eup %6998  ;;  %v4029_v17 = vadd.f32 1e-05, %v4021_v32  ;;  %v2818_v50 = vcombine.low %v8728_v61, %v2706_v48  ;;  %v2640_v58 = vmax.f32 %v2632_v34, 0.0  ;;  %v8768_v55 = vcombine.low %v4227_v1, %v4234_v63 }
 0x8a2   :  { %v7001_v60 = vpop.eup %7000  ;;  %v2610_v12 = vmul.f32 %v6999_v24, %v8603_v33  ;;  %v2633_v27 = vadd.f32 %v8683_v59, %v2621_v53  ;;  %v2819_v5 = vcombine.low %v2714_v10, %v2713_v41 }
 0x8a3   :  { %v4040_v26 = vmul.f32 %v7001_v60, %v8606_v29  ;;  %7010 = vrsqrt.f32 %v4029_v17  ;;  %v2826_v33 = vrot.slane %v2818_v50, %v7490_v15  ;;  %v2738_v61 = vrot.slane %v2640_v58, %v7490_v15  ;;  %6830 = vmatpush3.msk.msra.mxu0 %vm1222_vm3, %v4218_v2 }
 0x8a4   :  { %v2622_v25 = vmul.f32 %v8673_v11, %v2610_v12  ;;  %v2641_v18 = vmax.f32 %v2633_v27, 0.0  ;;  %v2731_v29 = vcombine.high %v2640_v58, %v2640_v58  ;;  %v2833_v1 = vrot.slane %v2819_v5, %v7490_v15 }
 0x8a5   :  { %v7003_v49 = vpop.eup %7002  ;;  %v4052_v28 = vmul.f32 %v8678_v45, %v4040_v26  ;;  %v2836_v11 = vcombine.low %v8737_v14, %v2738_v61  ;;  %v2746_v19 = vcombine.high %v2738_v61, %v2738_v61  ;;  %vm6560_vm3 = vcmask 900096  }
 0x8a6   :  { %v7005_v23 = vpop.eup %7004  ;;  %v4041_v16 = vmul.f32 %v7003_v49, %v8614_v6  ;;  %v2745_v48 = vrot.slane %v2731_v29, %v7490_v15  ;;  %v2754_v34 = vrot.slane %v2641_v18, %v7490_v15  ;;  %v2834_v2 = vcombine.low %v2826_v33, %v2833_v1 }
 0x8a7   :  { %v4064_v32 = vadd.f32 %v8689_v52, %v4052_v28  ;;  %v4042_v7 = vmul.f32 %v7005_v23, %v8618_v21  ;;  %v2850_v9 = vrot.slane %v2836_v11, %v7490_v15  ;;  %v2634_v6 = vadd.f32 %v8683_v59, %v2622_v25 }
 0x8a8   :  { %v4053_v24 = vmul.f32 %v8678_v45, %v4041_v16  ;;  %v2762_v17 = vcombine.high %v2754_v34, %v2754_v34  ;;  %v2852_v41 = vcombine.low %v2746_v19, %v2745_v48  ;;  %6793 = vmatprep.mubr.msk.f32.mxu0 %vm1209_vm4, %v2834_v2  ;;  %v2747_v10 = vcombine.high %v2641_v18, %v2641_v18 }
 0x8a9   :  { %v7007_v13 = vpop.eup %7006  ;;  %v4072_v53 = vmax.f32 %v4064_v32, 0.0  ;;  %v4054_v14 = vmul.f32 %v8678_v45, %v4042_v7  ;;  %v2851_v60 = vcombine.low %v2843_v4, %v2850_v9  ;;  %v2642_v12 = vmax.f32 %v2634_v6, 0.0 }
 0x8aa   :  { %v7009_v63 = vpop.eup %7008  ;;  %v4043_v21 = vmul.f32 %v7007_v13, %v8626_v40  ;;  %v2853_v26 = vcombine.low %v2754_v34, %v2762_v17  ;;  %v2860_v59 = vrot.slane %v2852_v41, %v7490_v15  ;;  %v2761_v25 = vrot.slane %v2747_v10, %v7490_v15 }
 0x8ab   :  { %v4125_v50 = vrot.slane %v4072_v53, %v7490_v15  ;;  %v4044_v58 = vmul.f32 %v7009_v63, %v8630_v30  ;;  %6794 = vmatmul.mubr.msk.f32.gmra.mrb[10].mxu0 %vm1209_vm4, %v2851_v60  ;;  %v2763_v5 = vcombine.high %v2642_v12, %v2642_v12  ;;  %v2770_v40 = vrot.slane %v2642_v12, %v7490_v15 }
 0x8ac   :  { %v4055_v27 = vmul.f32 %v8678_v45, %v4043_v21  ;;  %v2867_v49 = vrot.slane %v2853_v26, %v7490_v15  ;;  %v4244_v30 = vrot.slane %v4236_v35, %v7490_v15  ;;  %v4065_v11 = vadd.f32 %v8689_v52, %v4053_v24 }
 0x8ad   :  { %v7011_v33 = vpop.eup %7010  ;;  %v4133_v4 = vcombine.high %v4125_v50, %v4125_v50  ;;  %v4056_v61 = vmul.f32 %v8678_v45, %v4044_v58  ;;  %v2777_v18 = vrot.slane %v2763_v5, %v7490_v15  ;;  %v2778_v29 = vcombine.high %v2770_v40, %v2770_v40 }
 0x8ae   :  { %v4045_v28 = vmul.f32 %v7011_v33, %v8638_v62  ;;  %v2869_v23 = vcombine.low %v2761_v25, %v2770_v40  ;;  %v2868_v1 = vcombine.low %v2860_v59, %v2867_v49  ;;  %v4118_v19 = vcombine.high %v4072_v53, %v4072_v53 }
 0x8af   :  { %v4237_v16 = vcombine.low %v4125_v50, %v4133_v4  ;;  %v2870_v7 = vcombine.low %v2778_v29, %v2777_v18  ;;  %v4066_v34 = vadd.f32 %v8689_v52, %v4054_v14  ;;  %v4073_v35 = vmax.f32 %v4065_v11, 0.0 }
 0x8b0   :  { %v4057_v32 = vmul.f32 %v8678_v45, %v4045_v28  ;;  %v2877_v48 = vrot.slane %v2869_v23, %v7490_v15  ;;  %6796 = vmatprep.mubr.msk.f32.mxu0 %vm1209_vm4, %v2868_v1  ;;  %v4132_v2 = vrot.slane %v4118_v19, %v7490_v15  ;;  %v4067_v9 = vadd.f32 %v8689_v52, %v4055_v27 }
 0x8b1   :  { %v4251_v62 = vrot.slane %v4237_v16, %v7490_v15  ;;  %v2884_v6 = vrot.slane %v2870_v7, %v7490_v15  ;;  %v4074_v24 = vmax.f32 %v4066_v34, 0.0  ;;  %v4068_v13 = vadd.f32 %v8689_v52, %v4056_v61 }
 0x8b2   :  { %v4069_v45 = vadd.f32 %v8689_v52, %v4057_v32  ;;  %v4134_v17 = vcombine.high %v4073_v35, %v4073_v35  ;;  %v4141_v14 = vrot.slane %v4073_v35, %v7490_v15  ;;  %v4075_v41 = vmax.f32 %v4067_v9, 0.0 }
 0x8b3   :  { %v4252_v53 = vcombine.low %v4244_v30, %v4251_v62  ;;  %v2885_v63 = vcombine.low %v2877_v48, %v2884_v6  ;;  %v4150_v21 = vcombine.high %v4074_v24, %v4074_v24  ;;  %v4157_v60 = vrot.slane %v4074_v24, %v7490_v15 }
 0x8b4   :  { %v4076_v12 = vmax.f32 %v4068_v13, 0.0  ;;  %v4148_v10 = vrot.slane %v4134_v17, %v7490_v15  ;;  %v4149_v50 = vcombine.high %v4141_v14, %v4141_v14  ;;  %v4253_v58 = vcombine.low %v4132_v2, %v4141_v14  ;;  %v10106_v17 = vld [vmem:[#allocation27_spill] sm:$0xff] }
 0x8b5   :  { %v4173_v26 = vrot.slane %v4075_v41, %v7490_v15  ;;  %6797 = vmatmul.mubr.msk.f32.gmra.mrb[12].mxu0 %vm1209_vm4, %v2885_v63  ;;  %v4164_v52 = vrot.slane %v4150_v21, %v7490_v15  ;;  %v4165_v59 = vcombine.high %v4157_v60, %v4157_v60  ;;  %v4166_v27 = vcombine.high %v4075_v41, %v4075_v41 }
 0x8b6   :  { %v4189_v25 = vrot.slane %v4076_v12, %v7490_v15  ;;  %6831 = vmatprep.mubr.msk.f32.mxu0 %vm1209_vm4, %v8768_v55  ;;  %v4254_v5 = vcombine.low %v4149_v50, %v4148_v10  ;;  %v4261_v40 = vrot.slane %v4253_v58, %v7490_v15  ;;  %v4077_v4 = vmax.f32 %v4069_v45, 0.0 }
 0x8b7   :  { %v4181_v33 = vcombine.high %v4173_v26, %v4173_v26  ;;  %v4270_v61 = vcombine.low %v4157_v60, %v4165_v59  ;;  %v4271_v49 = vcombine.low %v4164_v52, %v4173_v26  ;;  %v4180_v30 = vrot.slane %v4166_v27, %v7490_v15  ;;  %v8847_v59 = vld [vmem:[#allocation5 + $0x8] sm:$0xff]  ;;  %v10107_v27 = vld [vmem:[#allocation20_spill] sm:$0xff] }
 0x8b8   :  { %v4197_v28 = vcombine.high %v4189_v25, %v4189_v25  ;;  %v4268_v18 = vrot.slane %v4254_v5, %v7490_v15  ;;  %v4182_v29 = vcombine.high %v4076_v12, %v4076_v12  ;;  %v4198_v23 = vcombine.high %v4077_v4, %v4077_v4 }
 0x8b9   :  { %v4205_v16 = vrot.slane %v4077_v4, %v7490_v15  ;;  %6832 = vmatmul.mubr.msk.f32.vlgmr.msra.gmra.mrb[14].mxu0 %vm1209_vm4, %v4252_v53  ;;  %v4278_v55 = vrot.slane %v4270_v61, %v7490_v15  ;;  %v4285_v1 = vrot.slane %v4271_v49, %v7490_v15  ;;  %v4287_v11 = vcombine.low %v4181_v33, %v4180_v30 }
 0x8ba   :  { %v4288_v19 = vcombine.low %v4189_v25, %v4197_v28  ;;  %v4269_v32 = vcombine.low %v4261_v40, %v4268_v18  ;;  %v4196_v7 = vrot.slane %v4182_v29, %v7490_v15  ;;  %v4212_v48 = vrot.slane %v4198_v23, %v7490_v15 }
 0x8bb   :  { %v4213_v34 = vcombine.high %v4205_v16, %v4205_v16  ;;  %v4286_v62 = vcombine.low %v4278_v55, %v4285_v1  ;;  %v4295_v35 = vrot.slane %v4287_v11, %v7490_v15  ;;  %v3203_v14 = vcombine.high %v10106_v17, %v10106_v17 }
 0x8bc   :  { %v4302_v2 = vrot.slane %v4288_v19, %v7490_v15  ;;  %6834 = vmatprep.mubr.msk.f32.mxu0 %vm1209_vm4, %v4269_v32  ;;  %v4304_v9 = vcombine.low %v4196_v7, %v4205_v16  ;;  %v3210_v41 = vrot.slane %v10106_v17, %v10096_v31  ;;  %v3680_v25 = vrot.slane %v8847_v59, %v10107_v27 }
 0x8bd   :  { %v4305_v6 = vcombine.low %v4213_v34, %v4212_v48  ;;  %6835 = vmatmul.mubr.msk.f32.gmra.mrb[16].mxu0 %vm1209_vm4, %v4286_v62  ;;  %v3217_v63 = vrot.slane %v3203_v14, %v10096_v31 }
 0x8be   :  { %v4303_v24 = vcombine.low %v4295_v35, %v4302_v2  ;;  %v4312_v13 = vrot.slane %v4304_v9, %v7490_v15  ;;  %v3218_v21 = vcombine.high %v3210_v41, %v3210_v41  ;;  %v3226_v60 = vrot.slane %v3210_v41, %v10096_v31 }
 0x8bf   :  { %v4319_v45 = vrot.slane %v4305_v6, %v7490_v15  ;;  %v3219_v12 = vcombine.high %v3217_v63, %v3217_v63  ;;  %v3233_v50 = vrot.slane %v3217_v63, %v10096_v31  ;;  %v3682_v61 = vcombine.high %v3680_v25, %v3680_v25 }
 0x8c0   :  { %6837 = vmatprep.mubr.msk.f32.mxu0 %vm1209_vm4, %v4303_v24  ;;  %v3240_v10 = vrot.slane %v3218_v21, %v10096_v31  ;;  %v3248_v58 = vcombine.high %v3226_v60, %v3226_v60  ;;  %v3255_v26 = vrot.slane %v3226_v60, %v10100_v37  ;;  %v8866_v11 = vrot.slane %v3680_v25, %v7490_v15 }
 0x8c1   :  { %v4320_v53 = vcombine.low %v4312_v13, %v4319_v45  ;;  %v3247_v52 = vrot.slane %v3219_v12, %v10096_v31  ;;  %v3271_v4 = vrot.slane %v3233_v50, %v10100_v37  ;;  %v3249_v30 = vcombine.high %v3233_v50, %v3233_v50 }
 0x8c2   :  { %v3259_v5 = vrot.slane %v3240_v10, %v10100_v37  ;;  %v3250_v40 = vcombine.high %v3240_v10, %v3240_v10  ;;  %v3263_v33 = vrot.slane %v3248_v58, %v10100_v37  ;;  %v3284_v49 = vcombine.high %v3255_v26, %v3255_v26 }
 0x8c3   :  { %6838 = vmatmul.mubr.msk.f32.gmra.mrb[18].mxu0 %vm1209_vm4, %v4320_v53  ;;  %v3251_v28 = vcombine.high %v3247_v52, %v3247_v52  ;;  %v8855_v18 = vrot.slane %v3255_v26, %v7490_v15  ;;  %v3275_v23 = vrot.slane %v3247_v52, %v10100_v37  ;;  %v3348_v55 = vcombine.high %v3271_v4, %v3271_v4 }
 0x8c4   :  { %v3300_v31 = vcombine.high %v3259_v5, %v3259_v5  ;;  %v8858_v29 = vrot.slane %v3259_v5, %v7490_v15  ;;  %v8862_v16 = vrot.slane %v3263_v33, %v7490_v15  ;;  %v3267_v1 = vrot.slane %v3250_v40, %v10100_v37 }
 0x8c5   :  { %v8869_v19 = vrot.slane %v3682_v61, %v7490_v15  ;;  %v8872_v32 = vrot.slane %v3284_v49, %v7490_v15  ;;  %v8875_v7 = vrot.slane %v3271_v4, %v7490_v15  ;;  %v3299_v48 = vcombine.high %v8855_v18, %v8855_v18  ;;  %v10108_v49 = vld [vmem:[#allocation29_spill] sm:$0xff] }
 0x8c6   :  { %v3316_v34 = vcombine.high %v3263_v33, %v3263_v33  ;;  %v3279_v62 = vrot.slane %v3249_v30, %v10100_v37  ;;  %v3283_v35 = vrot.slane %v3251_v28, %v10100_v37  ;;  %v3477_v2 = vmul.f32 %v8351_v43, %v8310_v36 }
 0x8c7   :  { %v3465_v9 = vmul.f32 %v8354_v39, %v8318_v47  ;;  %v8886_v6 = vrot.slane %v3300_v31, %v7490_v15  ;;  %v3315_v24 = vcombine.high %v8858_v29, %v8858_v29  ;;  %v3331_v13 = vcombine.high %v8862_v16, %v8862_v16 }
 0x8c8   :  { %v8893_v45 = vrot.slane %v3348_v55, %v7490_v15  ;;  %v8896_v53 = vrot.slane %v3275_v23, %v7490_v15  ;;  %v3332_v17 = vcombine.high %v3267_v1, %v3267_v1  ;;  %v3481_v36 = vmul.f32 %v8351_v43, %v8393_v46 }
 0x8c9   :  { %v8903_v14 = vrot.slane %v3267_v1, %v7490_v15  ;;  %v3364_v41 = vcombine.high %v3275_v23, %v3275_v23  ;;  %v3482_v63 = vmul.f32 %v8351_v43, %v8435_v57  ;;  %v8908_v21 = vrot.slane %v3316_v34, %v7490_v15 }
 0x8ca   :  { %v3380_v60 = vcombine.high %v3279_v62, %v3279_v62  ;;  %v3396_v12 = vcombine.high %v3283_v35, %v3283_v35  ;;  %v3485_v10 = vadd.f32 %v3477_v2, %v3465_v9  ;;  %v3469_v50 = vmul.f32 %v8354_v39, %v8383_v3 }
 0x8cb   :  { %v3483_v46 = vmul.f32 %v8351_v43, %v8457_v20  ;;  %v8915_v58 = vrot.slane %v3283_v35, %v7490_v15  ;;  %v3470_v26 = vmul.f32 %v8354_v39, %v8407_v44  ;;  %v3484_v57 = vmul.f32 %v8351_v43, %v8482_v51 }
 0x8cc   :  { %v8922_v52 = vrot.slane %v3332_v17, %v7490_v15  ;;  %v3471_v3 = vmul.f32 %v8354_v39, %v8428_v8  ;;  %v3489_v5 = vadd.f32 %v3481_v36, %v3469_v50  ;;  %v8931_v40 = vrot.slane %v3364_v41, %v7490_v15 }
 0x8cd   :  { %v3472_v44 = vmul.f32 %v8354_v39, %v8465_v22  ;;  %v3490_v51 = vadd.f32 %v3482_v63, %v3470_v26  ;;  %v8936_v43 = vrot.slane %v3380_v60, %v7490_v15  ;;  %v8939_v33 = vrot.slane %v3279_v62, %v7490_v15 }
 0x8ce   :  { %v3501_v4 = vcombine.high %v3485_v10, %v3485_v10  ;;  %v3491_v61 = vadd.f32 %v3483_v46, %v3471_v3  ;;  %v8942_v8 = vrot.slane %v3396_v12, %v7490_v15  ;;  %v3533_v30 = vcombine.high %v8367_v56, %v8367_v56 }
 0x8cf   :  { %v8950_v39 = vrot.slane %v8367_v56, %v7490_v15  ;;  %v3492_v22 = vadd.f32 %v3484_v57, %v3472_v44  ;;  %v3508_v28 = vrot.slane %v3485_v10, %v7490_v15  ;;  %v3517_v31 = vcombine.high %v8391_v38, %v8391_v38 }
 0x8d0   :  { %v3524_v23 = vrot.slane %v8391_v38, %v7490_v15  ;;  %v3565_v55 = vcombine.high %v3489_v5, %v3489_v5  ;;  %v8958_v1 = vrot.slane %v3489_v5, %v7490_v15  ;;  %v3549_v34 = vcombine.high %v8430_v54, %v8430_v54 }
 0x8d1   :  { %v8964_v56 = vrot.slane %v8430_v54, %v7490_v15  ;;  %v3581_v62 = vcombine.high %v3490_v51, %v3490_v51  ;;  %v8967_v35 = vrot.slane %v3490_v51, %v7490_v15  ;;  %v3597_v2 = vcombine.high %v3491_v61, %v3491_v61 }
 0x8d2   :  { %v8970_v9 = vrot.slane %v3491_v61, %v7490_v15  ;;  %v3515_v38 = vrot.slane %v3501_v4, %v7490_v15  ;;  %v3548_v36 = vcombine.high %v8950_v39, %v8950_v39  ;;  %v3613_v41 = vcombine.high %v3492_v22, %v3492_v22 }
 0x8d3   :  { %v3516_v63 = vcombine.high %v3508_v28, %v3508_v28  ;;  %v8978_v54 = vrot.slane %v3533_v30, %v7490_v15  ;;  %v3531_v60 = vrot.slane %v3517_v31, %v7490_v15  ;;  %v8982_v12 = vrot.slane %v3565_v55, %v7490_v15 }
 0x8d4   :  { %v3532_v50 = vcombine.high %v3524_v23, %v3524_v23  ;;  %v8987_v46 = vrot.slane %v3549_v34, %v7490_v15  ;;  %v8992_v57 = vrot.slane %v3581_v62, %v7490_v15  ;;  %v9000_v30 = vrot.slane %v3597_v2, %v7490_v15 }
 0x8d5   :  { %v9003_v31 = vrot.slane %v3492_v22, %v7490_v15  ;;  %v9006_v55 = vrot.slane %v3613_v41, %v7490_v15  ;;  %v9015_v2 = vcombine.high %v8866_v11, %v8866_v11  ;;  %v9021_v25 = vrot.slane %v8847_v59, %v10108_v49 }
 0x8d6   :  { %vm6548_vm4 = vcmask 474112  }
 0x96d   :  { %v6792_v3 = vpop.f32.mrb[8].mxu0 }
 0x96e   :  { %v3019_v51 = vcombine.high %v6792_v3, %v6792_v3  ;;  %v3026_v4 = vrot.slane %v6792_v3, %v7490_v15  ;;  %v2967_v61 = vpop.f32.mrb[9].mxu0 }
 0x96f   :  { %v3002_v34 = vcombine.high %v2967_v61, %v2967_v61  ;;  %v3009_v62 = vrot.slane %v2967_v61, %v7490_v15 }
 0x970   :  { %v3033_v17 = vrot.slane %v3019_v51, %v7490_v15  ;;  %v3034_v5 = vcombine.high %v3026_v4, %v3026_v4  ;;  %v3440_v3 = vadd.f32 %v3315_v24, %v3026_v4 }
 0x971   :  { %v3016_v22 = vrot.slane %v3002_v34, %v7490_v15  ;;  %v3017_v44 = vcombine.high %v3009_v62, %v3009_v62  ;;  %v3436_v41 = vadd.f32 %v8855_v18, %v3009_v62  ;;  %v3628_v18 = vcombine.high %v9003_v31, %v9003_v31 }
 0x972   :  { %v3035_v61 = vcombine.high %v3033_v17, %v3033_v17  ;;  %v3441_v51 = vadd.f32 %v8886_v6, %v3034_v5  ;;  %v3442_v26 = vadd.f32 %v8862_v16, %v3033_v17  ;;  %v3657_v10 = vadd.f32 %v3532_v50, %v3440_v3 }
 0x973   :  { %v3018_v24 = vcombine.high %v3016_v22, %v3016_v22  ;;  %v3437_v4 = vadd.f32 %v3299_v48, %v3017_v44  ;;  %v3438_v34 = vadd.f32 %v8872_v32, %v3016_v22  ;;  %v3653_v20 = vadd.f32 %v3508_v28, %v3436_v41 }
 0x974   :  { %v3443_v62 = vadd.f32 %v3331_v13, %v3035_v61  ;;  %v3658_v59 = vadd.f32 %v3531_v60, %v3441_v51  ;;  %v3659_v47 = vadd.f32 %v8950_v39, %v3442_v26  ;;  %v3705_v6 = vadd.f32 %v9015_v2, %v3657_v10 }
 0x975   :  { %v3439_v17 = vadd.f32 %v8858_v29, %v3018_v24  ;;  %v3654_v50 = vadd.f32 %v3516_v63, %v3437_v4  ;;  %v3655_v5 = vadd.f32 %v3515_v38, %v3438_v34  ;;  %v3701_v3 = vadd.f32 %v8866_v11, %v3653_v20 }
 0x976   :  { %v3660_v32 = vadd.f32 %v3548_v36, %v3443_v62  ;;  %v3706_v48 = vadd.f32 %v8869_v19, %v3658_v59  ;;  %v4568_v16 = vcombine.high %v9021_v25, %v9021_v25  ;;  %v3707_v13 = vadd.f32 %v8866_v11, %v3659_v47 }
 0x977   :  { %v3656_v39 = vadd.f32 %v3524_v23, %v3439_v17  ;;  %v3702_v28 = vadd.f32 %v9015_v2, %v3654_v50  ;;  %v3703_v29 = vadd.f32 %v8869_v19, %v3655_v5  ;;  %v6238_v20 = vrot.slane %v3705_v6, %v10100_v37 }
 0x978   :  { %v3708_v38 = vadd.f32 %v9015_v2, %v3660_v32  ;;  %v6297_v63 = vrot.slane %v3705_v6, %v10099_v42  ;;  %v6364_v36 = vrot.slane %v3706_v48, %v10100_v37  ;;  %v6423_v60 = vrot.slane %v3706_v48, %v10099_v42 }
 0x979   :  { %v3704_v10 = vadd.f32 %v8866_v11, %v3656_v39  ;;  %v6110_v26 = vrot.slane %v3701_v3, %v10100_v37  ;;  %v6167_v47 = vrot.slane %v3701_v3, %v10099_v42  ;;  %v6234_v22 = vrot.slane %v3702_v28, %v10100_v37 }
 0x97a   :  { %v6242_v23 = vrot.slane %v3708_v38, %v10100_v37  ;;  %v6301_v44 = vrot.slane %v3708_v38, %v10099_v42  ;;  %v6293_v41 = vrot.slane %v3702_v28, %v10099_v42  ;;  %v6360_v24 = vrot.slane %v3703_v29, %v10100_v37 }
 0x97b   :  { %v6114_v61 = vrot.slane %v3704_v10, %v10100_v37  ;;  %v6171_v51 = vrot.slane %v3704_v10, %v10099_v42  ;;  %v6419_v4 = vrot.slane %v3703_v29, %v10099_v42  ;;  %v6118_v34 = vrot.slane %v3707_v13, %v10100_v37 }
 0x97c   :  { %v6175_v62 = vrot.slane %v3707_v13, %v10099_v42  ;;  %v6263_v59 = vsel %vm5890_vm5, %v6238_v20, %v6234_v22  ;;  %v6322_v6 = vsel %vm5890_vm5, %v6297_v63, %v6293_v41  ;;  %v9067_v5 = vsel %vm5890_vm5, %v6364_v36, %v6360_v24 }
 0x97d   :  { %v6139_v17 = vsel %vm5890_vm5, %v6114_v61, %v6110_v26  ;;  %v6196_v50 = vsel %vm5890_vm5, %v6171_v51, %v6167_v47  ;;  %v9070_v3 = vsel %vm5890_vm5, %v6423_v60, %v6419_v4  ;;  %v9074_v13 = vsel %vm5892_vm6, %v6242_v23, %v6263_v59 }
 0x97e   :  { %v6795_v32 = vpop.f32.mrb[10].mxu0  ;;  %v9077_v29 = vsel %vm5892_vm6, %v6118_v34, %v6139_v17  ;;  %v9081_v63 = vsel %vm5892_vm6, %v6175_v62, %v6196_v50  ;;  %v9084_v36 = vsel %vm5892_vm6, %v6301_v44, %v6322_v6  ;;  %v9090_v47 = vrot.slane %v9021_v25, %v7490_v15 }
 0x97f   :  { %v3053_v48 = vcombine.high %v6795_v32, %v6795_v32  ;;  %v3060_v39 = vrot.slane %v6795_v32, %v7490_v15  ;;  %v2977_v28 = vpop.f32.mrb[11].mxu0  ;;  %v9095_v61 = vrot.slane %v4568_v16, %v7490_v15  ;;  %v10109_v44 = vcombine.high %v8875_v7, %v8875_v7 }
 0x980   :  { %v3036_v38 = vcombine.high %v2977_v28, %v2977_v28  ;;  %v3043_v20 = vrot.slane %v2977_v28, %v7490_v15  ;;  %v10110_v59 = vcombine.high %v8903_v14, %v8903_v14  ;;  %v10111_v17 = vcombine.high %v8958_v1, %v8958_v1 }
 0x981   :  { %v3067_v60 = vrot.slane %v3053_v48, %v7490_v15  ;;  %v3068_v10 = vcombine.high %v3060_v39, %v3060_v39  ;;  %v3448_v26 = vadd.f32 %v8875_v7, %v3060_v39 }
 0x982   :  { %v3050_v23 = vrot.slane %v3036_v38, %v7490_v15  ;;  %v3051_v22 = vcombine.high %v3043_v20, %v3043_v20  ;;  %v3444_v41 = vadd.f32 %v8908_v21, %v3043_v20 }
 0x983   :  { %v3069_v51 = vcombine.high %v3067_v60, %v3067_v60  ;;  %v3449_v24 = vadd.f32 %v10109_v44, %v3068_v10  ;;  %v3450_v4 = vadd.f32 %v8893_v45, %v3067_v60  ;;  %v3665_v34 = vadd.f32 %v8958_v1, %v3448_v26 }
 0x984   :  { %v3052_v62 = vcombine.high %v3050_v23, %v3050_v23  ;;  %v3445_v25 = vadd.f32 %v8903_v14, %v3051_v22  ;;  %v3446_v6 = vadd.f32 %v10110_v59, %v3050_v23  ;;  %v3661_v21 = vadd.f32 %v8978_v54, %v3444_v41 }
 0x985   :  { %v3451_v16 = vadd.f32 %v8896_v53, %v3069_v51  ;;  %v3666_v7 = vadd.f32 %v10111_v17, %v3449_v24  ;;  %v3667_v50 = vadd.f32 %v8982_v12, %v3450_v4  ;;  %v9113_v45 = vadd.f32 %v8866_v11, %v3665_v34 }
 0x986   :  { %v3447_v32 = vadd.f32 %v8922_v52, %v3052_v62  ;;  %v3662_v48 = vadd.f32 %v8964_v56, %v3445_v25  ;;  %v10112_v14 = vcombine.high %v8964_v56, %v8964_v56  ;;  %v9122_v54 = vcombine.high %v9090_v47, %v9090_v47 }
 0x987   :  { %v3668_v1 = vadd.f32 %v8967_v35, %v3451_v16  ;;  %v9126_v28 = vadd.f32 %v9015_v2, %v3666_v7  ;;  %v9129_v12 = vadd.f32 %v8869_v19, %v3667_v50  ;;  %v3709_v52 = vadd.f32 %v8869_v19, %v3661_v21 }
 0x988   :  { %v3663_v39 = vadd.f32 %v10112_v14, %v3446_v6  ;;  %v3664_v56 = vadd.f32 %v8987_v46, %v3447_v32  ;;  %v9136_v20 = vadd.f32 %v8866_v11, %v3662_v48  ;;  %v6798_v10 = vpop.f32.mrb[12].mxu0 }
 0x989   :  { %v9142_v26 = vadd.f32 %v8866_v11, %v3668_v1  ;;  %v2987_v46 = vpop.f32.mrb[13].mxu0  ;;  %v6368_v25 = vrot.slane %v3709_v52, %v10100_v37  ;;  %v6427_v59 = vrot.slane %v3709_v52, %v10099_v42  ;;  %v3087_v16 = vcombine.high %v6798_v10, %v6798_v10 }
 0x98a   :  { %v9139_v60 = vadd.f32 %v9015_v2, %v3663_v39  ;;  %v9155_v24 = vadd.f32 %v8869_v19, %v3664_v56  ;;  %v3094_v17 = vrot.slane %v6798_v10, %v7490_v15  ;;  %v3070_v48 = vcombine.high %v2987_v46, %v2987_v46 }
 0x98b   :  { %v9172_v50 = vsel %vm5892_vm6, %v6368_v25, %v9067_v5  ;;  %v9176_v32 = vsel %vm5892_vm6, %v6427_v59, %v9070_v3  ;;  %v3077_v14 = vrot.slane %v2987_v46, %v7490_v15  ;;  %v3101_v1 = vrot.slane %v3087_v16, %v7490_v15 }
 0x98c   :  { %v6833_v7 = vpop.f32.mrb[14].mxu0  ;;  %v3102_v52 = vcombine.high %v3094_v17, %v3094_v17  ;;  %v3456_v56 = vadd.f32 %v8936_v43, %v3094_v17  ;;  %v3084_v10 = vrot.slane %v3070_v48, %v7490_v15  ;;  %v10113_v5 = vcombine.high %v8896_v53, %v8896_v53 }
 0x98d   :  { %v4402_v39 = vpop.f32.mrb[15].mxu0  ;;  %v4454_v41 = vcombine.high %v6833_v7, %v6833_v7  ;;  %v3085_v6 = vcombine.high %v3077_v14, %v3077_v14  ;;  %v4461_v3 = vrot.slane %v6833_v7, %v7490_v15  ;;  %v3103_v59 = vcombine.high %v3101_v1, %v3101_v1 }
 0x98e   :  { %v3452_v25 = vadd.f32 %v10113_v5, %v3077_v14  ;;  %v3457_v23 = vadd.f32 %v8915_v58, %v3102_v52  ;;  %v10114_v46 = vcombine.high %v8915_v58, %v8915_v58  ;;  %v3673_v34 = vadd.f32 %v9000_v30, %v3456_v56 }
 0x98f   :  { %v3086_v17 = vcombine.high %v3084_v10, %v3084_v10  ;;  %v3453_v48 = vadd.f32 %v8931_v40, %v3085_v6  ;;  %v3454_v38 = vadd.f32 %v8939_v33, %v3084_v10  ;;  %v10115_v53 = vcombine.high %v8967_v35, %v8967_v35 }
 0x990   :  { %v3458_v16 = vadd.f32 %v10114_v46, %v3101_v1  ;;  %v6836_v43 = vpop.f32.mrb[16].mxu0  ;;  %v3459_v5 = vadd.f32 %v8942_v8, %v3103_v59  ;;  %v3674_v52 = vadd.f32 %v9003_v31, %v3457_v23  ;;  %v9202_v30 = vadd.f32 %v8869_v19, %v3673_v34 }
 0x991   :  { %v3669_v14 = vadd.f32 %v10115_v53, %v3452_v25  ;;  %v4412_v7 = vpop.f32.mrb[17].mxu0  ;;  %v10116_v40 = vcombine.high %v8939_v33, %v8939_v33  ;;  %v3670_v1 = vadd.f32 %v8992_v57, %v3453_v48  ;;  %v3671_v35 = vadd.f32 %v8970_v9, %v3454_v38 }
 0x992   :  { %v3675_v58 = vadd.f32 %v3628_v18, %v3458_v16  ;;  %v9215_v31 = vadd.f32 %v9006_v55, %v3459_v5  ;;  %v9218_v18 = vadd.f32 %v8866_v11, %v3674_v52  ;;  %v10117_v38 = vcombine.high %v8970_v9, %v8970_v9 }
 0x993   :  { %v3455_v6 = vadd.f32 %v10116_v40, %v3086_v17  ;;  %v9210_v56 = vadd.f32 %v9015_v2, %v3669_v14  ;;  %v9231_v10 = vadd.f32 %v8869_v19, %v3670_v1  ;;  %v9234_v25 = vadd.f32 %v8866_v11, %v3671_v35 }
 0x994   :  { %v9221_v23 = vadd.f32 %v9015_v2, %v3675_v58  ;;  %v4468_v46 = vrot.slane %v4454_v41, %v7490_v15  ;;  %v4469_v16 = vcombine.high %v4461_v3, %v4461_v3  ;;  %v9247_v14 = vadd.f32 %v9122_v54, %v4461_v3 }
 0x995   :  { %v3672_v34 = vadd.f32 %v10117_v38, %v3455_v6  ;;  %v4437_v52 = vcombine.high %v4402_v39, %v4402_v39  ;;  %v4488_v58 = vcombine.high %v6836_v43, %v6836_v43  ;;  %v4495_v40 = vrot.slane %v6836_v43, %v7490_v15 }
 0x996   :  { %v6839_v55 = vpop.f32.mrb[18].mxu0  ;;  %v4470_v11 = vcombine.high %v4468_v46, %v4468_v46  ;;  %v9250_v5 = vadd.f32 %v9095_v61, %v4469_v16  ;;  %v9253_v41 = vadd.f32 %v9090_v47, %v4468_v46  ;;  %v4471_v6 = vcombine.high %v4412_v7, %v4412_v7 }
 0x997   :  { %v4422_v17 = vpop.f32.mrb[19].mxu0  ;;  %v9240_v48 = vadd.f32 %v9015_v2, %v3672_v34  ;;  %v4444_v2 = vrot.slane %v4402_v39, %v7490_v15  ;;  %v4451_v3 = vrot.slane %v4437_v52, %v7490_v15  ;;  %v4478_v35 = vrot.slane %v4412_v7, %v7490_v15 }
 0x998   :  { %v9258_v1 = vadd.f32 %v9122_v54, %v4470_v11  ;;  %v4522_v38 = vcombine.high %v6839_v55, %v6839_v55  ;;  %v4502_v46 = vrot.slane %v4488_v58, %v7490_v15  ;;  %v4503_v9 = vcombine.high %v4495_v40, %v4495_v40 }
 0x999   :  { %v4452_v34 = vcombine.high %v4444_v2, %v4444_v2  ;;  %v9263_v16 = vadd.f32 %v9090_v47, %v4444_v2  ;;  %v4453_v39 = vcombine.high %v4451_v3, %v4451_v3  ;;  %v9267_v4 = vadd.f32 %v9095_v61, %v4451_v3 }
 0x99a   :  { %v9270_v43 = vadd.f32 %v9090_v47, %v4495_v40  ;;  %v4485_v11 = vrot.slane %v4471_v6, %v7490_v15  ;;  %v4504_v7 = vcombine.high %v4502_v46, %v4502_v46  ;;  %v9277_v57 = vadd.f32 %v9122_v54, %v4503_v9 }
 0x99b   :  { %v9274_v52 = vadd.f32 %v9122_v54, %v4452_v34  ;;  %v9280_v2 = vadd.f32 %v9095_v61, %v4502_v46  ;;  %v9283_v58 = vadd.f32 %v9090_v47, %v4453_v39  ;;  %v4486_v3 = vcombine.high %v4478_v35, %v4478_v35 }
 0x99c   :  { %10118 = vst [vmem:[#allocation22_spill] sm:$0xff] %v9277_v57  ;;  %v4487_v44 = vcombine.high %v4485_v11, %v4485_v11  ;;  %v9286_v40 = vadd.f32 %v9095_v61, %v4478_v35  ;;  %v4699_v34 = vcombine.low %v9270_v43, %v9277_v57  ;;  %v9293_v9 = vadd.f32 %v9122_v54, %v4485_v11 }
 0x99d   :  { %10119 = vst [vmem:[#allocation26_spill] sm:$0xff] %v9280_v2  ;;  %v4635_v6 = vcombine.low %v9263_v16, %v9274_v52  ;;  %v4529_v46 = vrot.slane %v6839_v55, %v7490_v15  ;;  %v9297_v59 = vadd.f32 %v9090_v47, %v4486_v3  ;;  %v4536_v39 = vrot.slane %v4522_v38, %v7490_v15 }
 0x99e   :  { %v4505_v8 = vcombine.high %v4422_v17, %v4422_v17  ;;  %v4512_v35 = vrot.slane %v4422_v17, %v7490_v15  ;;  %v9305_v62 = vadd.f32 %v9090_v47, %v4504_v7  ;;  %v4651_v7 = vcombine.low %v9283_v58, %v9247_v14 }
 0x99f   :  { %v4537_v22 = vcombine.high %v4529_v46, %v4529_v46  ;;  %v9302_v33 = vadd.f32 %v9095_v61, %v4529_v46  ;;  %v4642_v11 = vrot.slane %v4635_v6, %v7490_v15  ;;  %v4538_v53 = vcombine.high %v4536_v39, %v4536_v39 }
 0x9a0   :  { %10120 = vst [vmem:[#allocation28_spill] sm:$0xff] %v9305_v62  ;;  %v9309_v55 = vadd.f32 %v9122_v54, %v4536_v39  ;;  %v4519_v3 = vrot.slane %v4505_v8, %v7490_v15  ;;  %v4520_v51 = vcombine.high %v4512_v35, %v4512_v35  ;;  %v9316_v17 = vadd.f32 %v9122_v54, %v4512_v35 }
 0x9a1   :  { %v9313_v38 = vadd.f32 %v9090_v47, %v4537_v22  ;;  %v4649_v46 = vrot.slane %v9267_v4, %v7490_v15  ;;  %v4665_v22 = vrot.slane %v9250_v5, %v7490_v15  ;;  %v4658_v49 = vrot.slane %v4651_v7, %v7490_v15 }
 0x9a2   :  { %10121 = vst [vmem:[#allocation18_spill] sm:$0xff] %v9316_v17  ;;  %v4521_v6 = vcombine.high %v4519_v3, %v4519_v3  ;;  %v9323_v21 = vadd.f32 %v9095_v61, %v4520_v51  ;;  %v9326_v39 = vadd.f32 %v9090_v47, %v4519_v3  ;;  %v4715_v8 = vcombine.low %v9305_v62, %v9316_v17 }
 0x9a3   :  { %v4650_v35 = vcombine.low %v4642_v11, %v4649_v46  ;;  %v4667_v27 = vcombine.low %v9253_v41, %v9258_v1  ;;  %v4681_v51 = vrot.slane %v9286_v40, %v7490_v15  ;;  %v9341_v47 = vadd.f32 %v9095_v61, %v4487_v44 }
 0x9a4   :  { %10122 = vst [vmem:[#allocation17_spill] sm:$0xff] %v9326_v39  ;;  %v9336_v0 = vadd.f32 %v9122_v54, %v4521_v6  ;;  %v4683_v3 = vcombine.low %v9297_v59, %v9293_v9  ;;  %v4666_v11 = vcombine.low %v4658_v49, %v4665_v22  ;;  %v4706_v7 = vrot.slane %v4699_v34, %v7490_v15 }
 0x9a5   :  { %v4771_v17 = vsel %vm828_vm2, %v4650_v35, 0.0  ;;  %v4674_v46 = vrot.slane %v4667_v27, %v7490_v15  ;;  %v4697_v44 = vrot.slane %v9341_v47, %v7490_v15  ;;  %v4713_v62 = vrot.slane %v9280_v2, %v7490_v15 }
 0x9a6   :  { %10123 = vst [vmem:[#allocation27_spill] sm:$0xff] %v9336_v0  ;;  %v4731_v54 = vcombine.low %v9326_v39, %v9336_v0  ;;  %4772 = vadd.xlane.f32.xlu1 %v4771_v17  ;;  %v4690_v6 = vrot.slane %v4683_v3, %v7490_v15  ;;  %v4774_v57 = vsel %vm828_vm2, %v4666_v11, 0.0  ;;  %v4722_v49 = vrot.slane %v4715_v8, %v7490_v15 }
 0x9a7   :  { %v4682_v35 = vcombine.low %v4674_v46, %v4681_v51  ;;  %v4729_v27 = vrot.slane %v9323_v21, %v7490_v15  ;;  %4775 = vadd.xlane.f32.xlu0 %v4774_v57  ;;  %v4714_v22 = vcombine.low %v4706_v7, %v4713_v62  ;;  %v4745_v3 = vrot.slane %v9302_v33, %v7490_v15 }
 0x9a8   :  { %v4698_v34 = vcombine.low %v4690_v6, %v4697_v44  ;;  %v4738_v17 = vrot.slane %v4731_v54, %v7490_v15  ;;  %v9364_v2 = vadd.f32 %v9095_v61, %v4538_v53  ;;  %v4747_v8 = vcombine.low %v9313_v38, %v9309_v55 }
 0x9a9   :  { %v4777_v0 = vsel %vm828_vm2, %v4682_v35, 0.0  ;;  %v4730_v39 = vcombine.low %v4722_v49, %v4729_v27  ;;  %v6439_v51 = vrot.slane %v9231_v10, %v10099_v42  ;;  %v3724_v11 = vadd.f32 %v8869_v19, %v9215_v31 }
 0x9aa   :  { %4778 = vadd.xlane.f32.xlu1 %v4777_v0  ;;  %v4780_v62 = vsel %vm828_vm2, %v4698_v34, 0.0  ;;  %v4746_v57 = vcombine.low %v4738_v17, %v4745_v3  ;;  %v4783_v46 = vsel %vm828_vm2, %v4714_v22, 0.0  ;;  %v4754_v7 = vrot.slane %v4747_v8, %v7490_v15 }
 0x9ab   :  { %v4761_v61 = vrot.slane %v9364_v2, %v7490_v15  ;;  %v10124_v53 = vrot.slane %v9155_v24, %v10100_v37  ;;  %4781 = vadd.xlane.f32.xlu0 %v4780_v62  ;;  %v4786_v0 = vsel %vm828_vm2, %v4730_v39, 0.0  ;;  %v6388_v6 = vrot.slane %v3724_v11, %v10100_v37 }
 0x9ac   :  { %v10125_v19 = vrot.slane %v9129_v12, %v10100_v37  ;;  %v6258_v44 = vrot.slane %v9240_v48, %v10100_v37  ;;  %v4789_v35 = vsel %vm828_vm2, %v4746_v57, 0.0  ;;  %v10126_v27 = vrot.slane %v9231_v10, %v10100_v37 }
 0x9ad   :  { %v6391_v54 = vsel %vm5894_vm7, %v10124_v53, %v9172_v50  ;;  %v4762_v49 = vcombine.low %v4754_v7, %v4761_v61  ;;  %v10127_v39 = vrot.slane %v9139_v60, %v10100_v37  ;;  %v10128_v22 = vrot.slane %v9202_v30, %v10100_v37 }
 0x9ae   :  { %v6392_v31 = vsel %vm5896_vm8, %v10125_v19, %v6391_v54  ;;  %4784 = vadd.xlane.f32.xlu1 %v4783_v46  ;;  %v10129_v3 = vrot.slane %v9126_v28, %v10100_v37  ;;  %v6447_v10 = vrot.slane %v3724_v11, %v10099_v42  ;;  %v10130_v62 = vrot.slane %v9155_v24, %v10099_v42 }
 0x9af   :  { %v6393_v50 = vsel %vm5898_vm9, %v10126_v27, %v6392_v31  ;;  %v6265_v34 = vsel %vm5894_vm7, %v10127_v39, %v9074_v13  ;;  %v6262_v46 = vrot.slane %v9221_v23, %v10100_v37  ;;  %v10131_v7 = vrot.slane %v9210_v56, %v10100_v37  ;;  %4787 = vadd.xlane.f32.xlu0 %v4786_v0 }
 0x9b0   :  { %v6394_v17 = vsel %vm5900_vm10, %v10128_v22, %v6393_v50  ;;  %v6266_v8 = vsel %vm5896_vm8, %v10129_v3, %v6265_v34  ;;  %v6450_v57 = vsel %vm5894_vm7, %v10130_v62, %v9176_v32  ;;  %v10132_v11 = vrot.slane %v9129_v12, %v10099_v42 }
 0x9b1   :  { %v9415_v13 = vsel %vm5902_vm11, %v6388_v6, %v6394_v17  ;;  %v6267_v61 = vsel %vm5898_vm9, %v10131_v7, %v6266_v8  ;;  %v6130_v54 = vrot.slane %v9142_v26, %v10100_v37  ;;  %v6134_v6 = vrot.slane %v9234_v25, %v10100_v37 }
 0x9b2   :  { %v6451_v53 = vsel %vm5896_vm8, %v10132_v11, %v6450_v57  ;;  %v6268_v24 = vsel %vm5900_vm10, %v6258_v44, %v6267_v61  ;;  %v4792_v19 = vsel %vm828_vm2, %v4762_v49, 0.0  ;;  %v10133_v12 = vrot.slane %v9202_v30, %v10099_v42  ;;  %4790 = vadd.xlane.f32.xlu1 %v4789_v35 }
 0x9b3   :  { %v6452_v32 = vsel %vm5898_vm9, %v6439_v51, %v6451_v53  ;;  %v9435_v31 = vsel %vm5902_vm11, %v6262_v46, %v6268_v24  ;;  %v10134_v51 = vrot.slane %v9136_v20, %v10100_v37  ;;  %v10135_v49 = vrot.slane %v9113_v45, %v10100_v37  ;;  %4793 = vadd.xlane.f32.xlu0 %v4792_v19 }
 0x9b4   :  { %v6453_v0 = vsel %vm5900_vm10, %v10133_v12, %v6452_v32  ;;  %v6187_v30 = vrot.slane %v9142_v26, %v10099_v42  ;;  %v6191_v39 = vrot.slane %v9234_v25, %v10099_v42  ;;  %v6138_v34 = vrot.slane %v9218_v18, %v10100_v37 }
 0x9b5   :  { %v6141_v44 = vsel %vm5894_vm7, %v10134_v51, %v9077_v29  ;;  %v9447_v27 = vsel %vm5902_vm11, %v6447_v10, %v6453_v0  ;;  %v10136_v35 = vrot.slane %v9136_v20, %v10099_v42  ;;  %v6317_v17 = vrot.slane %v9240_v48, %v10099_v42 }
 0x9b6   :  { %v6142_v50 = vsel %vm5896_vm8, %v10135_v49, %v6141_v44  ;;  %v10137_v25 = vrot.slane %v9113_v45, %v10099_v42  ;;  %v10138_v8 = vrot.slane %v9139_v60, %v10099_v42  ;;  %v10139_v62 = vrot.slane %v9126_v28, %v10099_v42 }
 0x9b7   :  { %v6143_v29 = vsel %vm5898_vm9, %v6130_v54, %v6142_v50  ;;  %v6198_v22 = vsel %vm5894_vm7, %v10136_v35, %v9081_v63  ;;  %v6195_v63 = vrot.slane %v9218_v18, %v10099_v42  ;;  %v6321_v60 = vrot.slane %v9221_v23, %v10099_v42 }
 0x9b8   :  { %v6144_v26 = vsel %vm5900_vm10, %v6134_v6, %v6143_v29  ;;  %v6199_v3 = vsel %vm5896_vm8, %v10137_v25, %v6198_v22  ;;  %v6324_v10 = vsel %vm5894_vm7, %v10138_v8, %v9084_v36  ;;  %v10140_v36 = vrot.slane %v9210_v56, %v10099_v42  ;;  %v10141_v56 = vld [vmem:[#allocation16_spill] sm:$0xff] }
 0x9b9   :  { %v9478_v20 = vsel %vm5902_vm11, %v6138_v34, %v6144_v26  ;;  %v6200_v48 = vsel %vm5898_vm9, %v6187_v30, %v6199_v3  ;;  %v6325_v45 = vsel %vm5896_vm8, %v10139_v62, %v6324_v10  ;;  %v7208_v28 = vmov 269488144  }
 0x9ba   :  { %v6201_v57 = vsel %vm5900_vm10, %v6191_v39, %v6200_v48  ;;  %v6326_v46 = vsel %vm5898_vm9, %v10140_v36, %v6325_v45  ;;  %v4812_v11 = vunpack.c.l.s4 %v7208_v28  ;;  %v7209_v53 = vmov 842150450  }
 0x9bb   :  { %v9495_v7 = vsel %vm5902_vm11, %v6195_v63, %v6201_v57  ;;  %v6327_v18 = vsel %vm5900_vm10, %v6317_v17, %v6326_v46  ;;  %v4819_v24 = vunpack.c.l.s4 %v7209_v53  ;;  %v7210_v32 = vmov 1414812756  }
 0x9bc   :  { %v9499_v61 = vsel %vm5902_vm11, %v6321_v60, %v6327_v18  ;;  %v4826_v54 = vunpack.c.l.s4 %v7210_v32  ;;  %v4813_v23 = vunpack.c.0.s8 %v4812_v11 }
 0x9bd   :  { %v4820_v6 = vunpack.c.0.s8 %v4819_v24 }
 0x9be   :  { %v4827_v19 = vunpack.c.0.s8 %v4826_v54  ;;  %v9502_v12 = vsub.s32 %v4813_v23, %v10141_v56 }
 0x9bf   :  { %v9505_v0 = vsub.s32 %v4820_v6, %v10141_v56 }
 0x9c0   :  { %v9508_v51 = vsub.s32 %v4827_v19, %v10141_v56 }
 0xa33   :  { %v4773_v44 = vpop.xlane.xlu1 %4772 }
 0xa34   :  { %v4795_v49 = vmul.f32 0.029411765, %v4773_v44  ;;  %v4776_v50 = vpop.xlane.xlu0 %4775 }
 0xa35   :  { %v4796_v29 = vmul.f32 0.029411765, %v4776_v50 }
 0xa36   :  { %v4817_v30 = vrot.slane %v4795_v49, %v9502_v12  ;;  %v4824_v39 = vrot.slane %v4795_v49, %v9505_v0  ;;  %v4831_v34 = vrot.slane %v4795_v49, %v9508_v51 }
 0xa37   :  { %v4779_v35 = vpop.xlane.xlu1 %4778  ;;  %v4838_v26 = vrot.slane %v4796_v29, %v9502_v12  ;;  %v4845_v3 = vrot.slane %v4796_v29, %v9505_v0  ;;  %v4852_v8 = vrot.slane %v4796_v29, %v9508_v51 }
 0xa38   :  { %v9514_v22 = vsub.f32 %v9263_v16, %v4817_v30  ;;  %v9517_v17 = vsub.f32 %v9274_v52, %v4824_v39  ;;  %v9521_v25 = vsub.f32 %v9267_v4, %v4831_v34  ;;  %v4797_v10 = vmul.f32 0.029411765, %v4779_v35  ;;  %v4782_v63 = vpop.xlane.xlu0 %4781  ;;  %v10143_v35 = vld [vmem:[#allocation26_spill] sm:$0xff] }
 0xa39   :  { %v9530_v52 = vsub.f32 %v9283_v58, %v4838_v26  ;;  %v4798_v62 = vmul.f32 0.029411765, %v4782_v63  ;;  %v9533_v45 = vsub.f32 %v9247_v14, %v4845_v3  ;;  %v9536_v4 = vsub.f32 %v9250_v5, %v4852_v8 }
 0xa3a   :  { %v5027_v48 = vmul.f32 %v9514_v22, %v9514_v22  ;;  %v5028_v16 = vmul.f32 %v9517_v17, %v9517_v17  ;;  %v4859_v57 = vrot.slane %v4797_v10, %v9502_v12  ;;  %v4866_v60 = vrot.slane %v4797_v10, %v9505_v0 }
 0xa3b   :  { %v4785_v36 = vpop.xlane.xlu1 %4784  ;;  %v4873_v46 = vrot.slane %v4797_v10, %v9508_v51  ;;  %v4880_v18 = vrot.slane %v4798_v62, %v9502_v12  ;;  %v4887_v28 = vrot.slane %v4798_v62, %v9505_v0  ;;  %v4894_v58 = vrot.slane %v4798_v62, %v9508_v51 }
 0xa3c   :  { %v9545_v11 = vsub.f32 %v9253_v41, %v4859_v57  ;;  %v9548_v14 = vsub.f32 %v9258_v1, %v4866_v60  ;;  %v4799_v5 = vmul.f32 0.029411765, %v4785_v36  ;;  %v4788_v53 = vpop.xlane.xlu0 %4787  ;;  %v5029_v24 = vmul.f32 %v9521_v25, %v9521_v25  ;;  %v10144_v57 = vld [vmem:[#allocation28_spill] sm:$0xff]  ;;  %v10145_v36 = vld [vmem:[#allocation18_spill] sm:$0xff] }
 0xa3d   :  { %v9553_v32 = vsub.f32 %v9286_v40, %v4873_v46  ;;  %v9556_v54 = vsub.f32 %v9297_v59, %v4880_v18  ;;  %v9559_v23 = vsub.f32 %v9293_v9, %v4887_v28  ;;  %v9562_v41 = vsub.f32 %v9341_v47, %v4894_v58  ;;  %v10142_v47 = vld [vmem:[#allocation22_spill] sm:$0xff]  ;;  %v10146_v58 = vld [vmem:[#allocation17_spill] sm:$0xff] }
 0xa3e   :  { %v5033_v1 = vmul.f32 %v9545_v11, %v9545_v11  ;;  %v5034_v6 = vmul.f32 %v9548_v14, %v9548_v14  ;;  %v4901_v19 = vrot.slane %v4799_v5, %v9502_v12  ;;  %v4908_v40 = vrot.slane %v4799_v5, %v9505_v0 }
 0xa3f   :  { %v4791_v44 = vpop.xlane.xlu1 %4790  ;;  %v4915_v59 = vrot.slane %v4799_v5, %v9508_v51  ;;  %v4800_v49 = vmul.f32 0.029411765, %v4788_v53  ;;  %v5075_v9 = vcombine.low %v5027_v48, %v5028_v16  ;;  %v5089_v34 = vrot.slane %v5029_v24, %v7490_v15  ;;  %v10147_v53 = vld [vmem:[#allocation27_spill] sm:$0xff] }
 0xa40   :  { %v4801_v50 = vmul.f32 0.029411765, %v4791_v44  ;;  %v9572_v30 = vsub.f32 %v9270_v43, %v4901_v19  ;;  %v9575_v39 = vsub.f32 %v10142_v47, %v4908_v40  ;;  %v5030_v29 = vmul.f32 %v9530_v52, %v9530_v52  ;;  %v4794_v63 = vpop.xlane.xlu0 %4793 }
 0xa41   :  { %v9581_v26 = vsub.f32 %v10143_v35, %v4915_v59  ;;  %v4922_v3 = vrot.slane %v4800_v49, %v9502_v12  ;;  %v4929_v8 = vrot.slane %v4800_v49, %v9505_v0  ;;  %v4936_v10 = vrot.slane %v4800_v49, %v9508_v51 }
 0xa42   :  { %v5039_v43 = vmul.f32 %v9572_v30, %v9572_v30  ;;  %v5040_v48 = vmul.f32 %v9575_v39, %v9575_v39  ;;  %v4943_v16 = vrot.slane %v4801_v50, %v9502_v12  ;;  %v4950_v62 = vrot.slane %v4801_v50, %v9505_v0 }
 0xa43   :  { %v9593_v60 = vsub.f32 %v10144_v57, %v4922_v3  ;;  %v9596_v46 = vsub.f32 %v10145_v36, %v4929_v8  ;;  %v9599_v18 = vsub.f32 %v9323_v21, %v4936_v10  ;;  %v4957_v28 = vrot.slane %v4801_v50, %v9508_v51 }
 0xa44   :  { %v9603_v5 = vsub.f32 %v10146_v58, %v4943_v16  ;;  %v9606_v24 = vsub.f32 %v10147_v53, %v4950_v62  ;;  %v4802_v19 = vmul.f32 0.029411765, %v4794_v63  ;;  %v5082_v40 = vrot.slane %v5075_v9, %v7490_v15 }
 0xa45   :  { %v9610_v44 = vsub.f32 %v9302_v33, %v4957_v28  ;;  %v5031_v59 = vmul.f32 %v9533_v45, %v9533_v45  ;;  %v5032_v21 = vmul.f32 %v9536_v4, %v9536_v4  ;;  %v5035_v49 = vmul.f32 %v9553_v32, %v9553_v32 }
 0xa46   :  { %v5045_v50 = vmul.f32 %v9603_v5, %v9603_v5  ;;  %v5046_v47 = vmul.f32 %v9606_v24, %v9606_v24  ;;  %v4964_v9 = vrot.slane %v4802_v19, %v9502_v12  ;;  %v4971_v33 = vrot.slane %v4802_v19, %v9505_v0 }
 0xa47   :  { %v4978_v35 = vrot.slane %v4802_v19, %v9508_v51  ;;  %v5090_v3 = vcombine.low %v5082_v40, %v5089_v34  ;;  %v5091_v8 = vcombine.low %v5030_v29, %v5031_v59  ;;  %v5105_v10 = vrot.slane %v5032_v21, %v7490_v15 }
 0xa48   :  { %v9627_v63 = vsub.f32 %v9313_v38, %v4964_v9  ;;  %v9630_v16 = vsub.f32 %v9309_v55, %v4971_v33  ;;  %v5107_v62 = vcombine.low %v5033_v1, %v5034_v6  ;;  %v5121_v57 = vrot.slane %v5035_v49, %v7490_v15 }
 0xa49   :  { %v9634_v36 = vsub.f32 %v9364_v2, %v4978_v35  ;;  %v5211_v28 = vsel %vm828_vm2, %v5090_v3, 0.0  ;;  %v5098_v58 = vrot.slane %v5091_v8, %v7490_v15  ;;  %v5036_v34 = vmul.f32 %v9556_v54, %v9556_v54 }
 0xa4a   :  { %5212 = vadd.xlane.f32.xlu1 %v5211_v28  ;;  %v5114_v38 = vrot.slane %v5107_v62, %v7490_v15  ;;  %v5037_v55 = vmul.f32 %v9559_v23, %v9559_v23  ;;  %v5038_v1 = vmul.f32 %v9562_v41, %v9562_v41  ;;  %v5041_v2 = vmul.f32 %v9581_v26, %v9581_v26 }
 0xa4b   :  { %v5106_v6 = vcombine.low %v5098_v58, %v5105_v10  ;;  %v5139_v29 = vcombine.low %v5039_v43, %v5040_v48  ;;  %v5042_v53 = vmul.f32 %v9593_v60, %v9593_v60  ;;  %v5043_v19 = vmul.f32 %v9596_v46, %v9596_v46 }
 0xa4c   :  { %v5122_v40 = vcombine.low %v5114_v38, %v5121_v57  ;;  %v5123_v59 = vcombine.low %v5036_v34, %v5037_v55  ;;  %v5137_v21 = vrot.slane %v5038_v1, %v7490_v15  ;;  %v5153_v49 = vrot.slane %v5041_v2, %v7490_v15 }
 0xa4d   :  { %v5214_v9 = vsel %vm828_vm2, %v5106_v6, 0.0  ;;  %v5146_v33 = vrot.slane %v5139_v29, %v7490_v15  ;;  %v5044_v35 = vmul.f32 %v9599_v18, %v9599_v18  ;;  %v5155_v43 = vcombine.low %v5042_v53, %v5043_v19 }
 0xa4e   :  { %5215 = vadd.xlane.f32.xlu0 %v5214_v9  ;;  %v5217_v48 = vsel %vm828_vm2, %v5122_v40, 0.0  ;;  %v5130_v3 = vrot.slane %v5123_v59, %v7490_v15  ;;  %v5047_v8 = vmul.f32 %v9610_v44, %v9610_v44  ;;  %v5171_v10 = vcombine.low %v5045_v50, %v5046_v47 }
 0xa4f   :  { %5218 = vadd.xlane.f32.xlu1 %v5217_v48  ;;  %v5154_v62 = vcombine.low %v5146_v33, %v5153_v49  ;;  %v5162_v57 = vrot.slane %v5155_v43, %v7490_v15  ;;  %v5169_v28 = vrot.slane %v5044_v35, %v7490_v15  ;;  %v5048_v58 = vmul.f32 %v9627_v63, %v9627_v63  ;;  %v125_v33 = vld [vmem:[#allocation5 + $0x10] sm:$0xf] }
 0xa50   :  { %v5138_v34 = vcombine.low %v5130_v3, %v5137_v21  ;;  %v5178_v38 = vrot.slane %v5171_v10, %v7490_v15  ;;  %v5185_v55 = vrot.slane %v5047_v8, %v7490_v15  ;;  %v5049_v1 = vmul.f32 %v9630_v16, %v9630_v16 }
 0xa51   :  { %v5223_v2 = vsel %vm828_vm2, %v5154_v62, 0.0  ;;  %v5170_v50 = vcombine.low %v5162_v57, %v5169_v28  ;;  %v5050_v47 = vmul.f32 %v9634_v36, %v9634_v36  ;;  %v5836_v35 = vrot.slane %v125_v33, 3 }
 0xa52   :  { %v5220_v6 = vsel %vm828_vm2, %v5138_v34, 0.0  ;;  %v5186_v29 = vcombine.low %v5178_v38, %v5185_v55  ;;  %v5187_v53 = vcombine.low %v5048_v58, %v5049_v1  ;;  %v5486_v28 = vrot.slane %v125_v33, %v10100_v37  ;;  %v10148_v58 = vld [vmem:[#allocation19_spill] sm:$0xff] }
 0xa53   :  { %5221 = vadd.xlane.f32.xlu0 %v5220_v6  ;;  %5224 = vadd.xlane.f32.xlu1 %v5223_v2  ;;  %v5226_v19 = vsel %vm828_vm2, %v5170_v50, 0.0  ;;  %v5201_v21 = vrot.slane %v5050_v47, %v7490_v15  ;;  %6912 = vpush %v5836_v35  ;;  %v5606_v34 = vrot.slane %v125_v33, %v10148_v58 }
 0xa54   :  { %v5229_v40 = vsel %vm828_vm2, %v5186_v29, 0.0  ;;  %v5194_v59 = vrot.slane %v5187_v53, %v7490_v15  ;;  %v5534_v1 = vrot.slane %v125_v33, %v10099_v42  ;;  %v9682_v29 = vrot.slane %v5486_v28, %v7490_v15 }
 0xa55   :  { %v5608_v53 = vcombine.high %v5606_v34, %v5606_v34  ;;  %v9688_v33 = vrot.slane %v5606_v34, %v7490_v15 }
 0xa56   :  { %v5202_v49 = vcombine.low %v5194_v59, %v5201_v21  ;;  %v9685_v59 = vrot.slane %v5534_v1, %v7490_v15 }
 0xa57   :  { %5227 = vadd.xlane.f32.xlu0 %v5226_v19  ;;  %5230 = vadd.xlane.f32.xlu1 %v5229_v40  ;;  %v5488_v40 = vcombine.high %v5486_v28, %v5486_v28 }
 0xa58   :  { %v5232_v9 = vsel %vm828_vm2, %v5202_v49, 0.0 }
 0xa5b   :  { %5233 = vadd.xlane.f32.xlu0 %v5232_v9 }
 0xa84   :  { %s6913_s10 = spop %6912 }
 0xad7   :  { %v5213_v43 = vpop.xlane.xlu1 %5212 }
 0xad8   :  { %v5235_v48 = vmul.f32 0.029411765, %v5213_v43 }
 0xada   :  { %v5243_v3 = vadd.f32 1e-05, %v5235_v48 }
 0xadb   :  { %v5216_v8 = vpop.xlane.xlu0 %5215 }
 0xadc   :  { %7012 = vrsqrt.f32 %v5243_v3  ;;  %v5236_v10 = vmul.f32 0.029411765, %v5216_v8  ;;  %v5219_v62 = vpop.xlane.xlu1 %5218  ;;  %v9691_v3 = vrot.slane %v5608_v53, %v7490_v15  ;;  %v9695_v8 = vcombine.high %v9682_v29, %v9682_v29 }
 0xadd   :  { %v5237_v57 = vmul.f32 0.029411765, %v5219_v62 }
 0xade   :  { %v5244_v38 = vadd.f32 1e-05, %v5236_v10  ;;  %v5536_v10 = vcombine.high %v5534_v1, %v5534_v1 }
 0xadf   :  { %v5245_v55 = vadd.f32 1e-05, %v5237_v57 }
 0xae0   :  { %7014 = vrsqrt.f32 %v5244_v38  ;;  %v5222_v2 = vpop.xlane.xlu0 %5221  ;;  %v5225_v50 = vpop.xlane.xlu1 %5224 }
 0xae1   :  { %7016 = vrsqrt.f32 %v5245_v55  ;;  %v5238_v47 = vmul.f32 0.029411765, %v5222_v2  ;;  %v5239_v6 = vmul.f32 0.029411765, %v5225_v50  ;;  %v9701_v2 = vrot.slane %v5488_v40, %v7490_v15 }
 0xae2   :  { %v9705_v50 = vcombine.high %v9685_v59, %v9685_v59  ;;  %v9715_v40 = vcombine.high %v9688_v33, %v9688_v33 }
 0xae3   :  { %v5246_v19 = vadd.f32 1e-05, %v5238_v47  ;;  %v5247_v21 = vadd.f32 1e-05, %v5239_v6 }
 0xae4   :  { %v5228_v49 = vpop.xlane.xlu0 %5227  ;;  %v5231_v9 = vpop.xlane.xlu1 %5230 }
 0xae5   :  { %v5240_v35 = vmul.f32 0.029411765, %v5228_v49  ;;  %v5241_v43 = vmul.f32 0.029411765, %v5231_v9  ;;  %7018 = vrsqrt.f32 %v5246_v19 }
 0xae6   :  { %v7013_v48 = vpop.eup %7012  ;;  %7020 = vrsqrt.f32 %v5247_v21  ;;  %v9711_v21 = vrot.slane %v5536_v10, %v7490_v15 }
 0xae7   :  { %v5248_v62 = vadd.f32 1e-05, %v5240_v35  ;;  %v5249_v57 = vadd.f32 1e-05, %v5241_v43  ;;  %v5273_v28 = vrot.slane %v7013_v48, %v9502_v12  ;;  %v5280_v38 = vrot.slane %v7013_v48, %v9505_v0 }
 0xae8   :  { %v5234_v34 = vpop.xlane.xlu0 %5233  ;;  %v5287_v55 = vrot.slane %v7013_v48, %v9508_v51 }
 0xae9   :  { %7022 = vrsqrt.f32 %v5248_v62  ;;  %v5242_v47 = vmul.f32 0.029411765, %v5234_v34  ;;  %v5459_v1 = vmul.f32 %v5273_v28, %v9514_v22  ;;  %v5460_v6 = vmul.f32 %v5280_v38, %v9517_v17 }
 0xaea   :  { %v7015_v53 = vpop.eup %7014  ;;  %7024 = vrsqrt.f32 %v5249_v57  ;;  %v5461_v19 = vmul.f32 %v5287_v55, %v9521_v25 }
 0xaeb   :  { %v7017_v49 = vpop.eup %7016  ;;  %v5250_v9 = vadd.f32 1e-05, %v5242_v47  ;;  %v5507_v35 = vmul.f32 %v9682_v29, %v5459_v1  ;;  %v5508_v43 = vmul.f32 %v9695_v8, %v5460_v6  ;;  %v5294_v22 = vrot.slane %v7015_v53, %v9502_v12 }
 0xaec   :  { %v5509_v17 = vmul.f32 %v9701_v2, %v5461_v19  ;;  %v5301_v48 = vrot.slane %v7015_v53, %v9505_v0  ;;  %v5308_v25 = vrot.slane %v7015_v53, %v9508_v51  ;;  %v5315_v10 = vrot.slane %v7017_v49, %v9502_v12 }
 0xaed   :  { %7026 = vrsqrt.f32 %v5250_v9  ;;  %v5555_v62 = vadd.f32 %v9685_v59, %v5507_v35  ;;  %v5556_v57 = vadd.f32 %v9705_v50, %v5508_v43  ;;  %v5462_v28 = vmul.f32 %v5294_v22, %v9530_v52 }
 0xaee   :  { %v5557_v38 = vadd.f32 %v9711_v21, %v5509_v17  ;;  %v5463_v34 = vmul.f32 %v5301_v48, %v9533_v45  ;;  %v5464_v55 = vmul.f32 %v5308_v25, %v9536_v4  ;;  %v5322_v47 = vrot.slane %v7017_v49, %v9505_v0 }
 0xaef   :  { %v5579_v1 = vmax.f32 %v5555_v62, 0.0  ;;  %v5580_v6 = vmax.f32 %v5556_v57, 0.0  ;;  %v5510_v53 = vmul.f32 %v9682_v29, %v5462_v28  ;;  %v5329_v19 = vrot.slane %v7017_v49, %v9508_v51  ;;  %v7019_v9 = vpop.eup %7018 }
 0xaf0   :  { %v5581_v35 = vmax.f32 %v5557_v38, 0.0  ;;  %v5511_v43 = vmul.f32 %v9695_v8, %v5463_v34  ;;  %v5512_v52 = vmul.f32 %v9701_v2, %v5464_v55  ;;  %v5465_v22 = vmul.f32 %v5315_v10, %v9545_v11  ;;  %v7021_v25 = vpop.eup %7020 }
 0xaf1   :  { %v5627_v45 = vmul.f32 %v9688_v33, %v5579_v1  ;;  %v5628_v4 = vmul.f32 %v9715_v40, %v5580_v6  ;;  %v5558_v17 = vadd.f32 %v9685_v59, %v5510_v53  ;;  %v5466_v48 = vmul.f32 %v5322_v47, %v9548_v14 }
 0xaf2   :  { %v5629_v62 = vmul.f32 %v9691_v3, %v5581_v35  ;;  %v5559_v49 = vadd.f32 %v9705_v50, %v5511_v43  ;;  %v5560_v57 = vadd.f32 %v9711_v21, %v5512_v52  ;;  %v5467_v28 = vmul.f32 %v5329_v19, %v9553_v32 }
 0xaf3   :  { %v9744_v38 = vpop.eup %7022  ;;  %v5675_v11 = vcombine.low %v5627_v45, %v5628_v4  ;;  %v5582_v10 = vmax.f32 %v5558_v17, 0.0  ;;  %v5513_v34 = vmul.f32 %v9682_v29, %v5465_v22  ;;  %v5514_v55 = vmul.f32 %v9695_v8, %v5466_v48 }
 0xaf4   :  { %v9748_v1 = vpop.eup %7024  ;;  %v5689_v14 = vrot.slane %v5629_v62, %v7490_v15  ;;  %v5583_v47 = vmax.f32 %v5559_v49, 0.0  ;;  %v5584_v6 = vmax.f32 %v5560_v57, 0.0  ;;  %v5515_v53 = vmul.f32 %v9701_v2, %v5467_v28 }
 0xaf5   :  { %v5682_v35 = vrot.slane %v5675_v11, %v7490_v15  ;;  %v5630_v32 = vmul.f32 %v9688_v33, %v5582_v10  ;;  %v5561_v19 = vadd.f32 %v9685_v59, %v5513_v34  ;;  %v5562_v43 = vadd.f32 %v9705_v50, %v5514_v55 }
 0xaf6   :  { %v5631_v52 = vmul.f32 %v9715_v40, %v5583_v47  ;;  %v5632_v22 = vmul.f32 %v9691_v3, %v5584_v6  ;;  %v5563_v45 = vadd.f32 %v9711_v21, %v5515_v53  ;;  %v5336_v4 = vrot.slane %v7019_v9, %v9502_v12 }
 0xaf7   :  { %v9760_v17 = vpop.eup %7026  ;;  %v5690_v48 = vcombine.low %v5682_v35, %v5689_v14  ;;  %v5585_v62 = vmax.f32 %v5561_v19, 0.0  ;;  %v5586_v49 = vmax.f32 %v5562_v43, 0.0  ;;  %v5343_v57 = vrot.slane %v7019_v9, %v9505_v0 }
 0xaf8   :  { %v5691_v28 = vcombine.low %v5630_v32, %v5631_v52  ;;  %v5705_v11 = vrot.slane %v5632_v22, %v7490_v15  ;;  %v5587_v10 = vmax.f32 %v5563_v45, 0.0  ;;  %v5350_v34 = vrot.slane %v7019_v9, %v9508_v51 }
 0xaf9   :  { %v5811_v55 = vsel %vm828_vm2, %v5690_v48, 0.0  ;;  %v5633_v47 = vmul.f32 %v9688_v33, %v5585_v62  ;;  %v5634_v6 = vmul.f32 %v9715_v40, %v5586_v49  ;;  %v5468_v53 = vmul.f32 %v5336_v4, %v9556_v54 }
 0xafa   :  { %5812 = vadd.xlane.f32.xlu1 %v5811_v55  ;;  %v5698_v14 = vrot.slane %v5691_v28, %v7490_v15  ;;  %v5635_v35 = vmul.f32 %v9691_v3, %v5587_v10  ;;  %v5469_v32 = vmul.f32 %v5343_v57, %v9559_v23  ;;  %v5470_v19 = vmul.f32 %v5350_v34, %v9562_v41 }
 0xafb   :  { %v5707_v43 = vcombine.low %v5633_v47, %v5634_v6  ;;  %v5516_v9 = vmul.f32 %v9682_v29, %v5468_v53  ;;  %v5357_v52 = vrot.slane %v7021_v25, %v9502_v12  ;;  %v5364_v22 = vrot.slane %v7021_v25, %v9505_v0 }
 0xafc   :  { %v5706_v45 = vcombine.low %v5698_v14, %v5705_v11  ;;  %v5721_v48 = vrot.slane %v5635_v35, %v7490_v15  ;;  %v5517_v54 = vmul.f32 %v9695_v8, %v5469_v32  ;;  %v5518_v4 = vmul.f32 %v9701_v2, %v5470_v19 }
 0xafd   :  { %v5714_v62 = vrot.slane %v5707_v43, %v7490_v15  ;;  %v5564_v23 = vadd.f32 %v9685_v59, %v5516_v9  ;;  %v5371_v41 = vrot.slane %v7021_v25, %v9508_v51  ;;  %v5471_v49 = vmul.f32 %v5357_v52, %v9572_v30 }
 0xafe   :  { %v5814_v57 = vsel %vm828_vm2, %v5706_v45, 0.0  ;;  %v5565_v28 = vadd.f32 %v9705_v50, %v5517_v54  ;;  %v5566_v11 = vadd.f32 %v9711_v21, %v5518_v4  ;;  %v5472_v10 = vmul.f32 %v5364_v22, %v9575_v39 }
 0xaff   :  { %5815 = vadd.xlane.f32.xlu0 %v5814_v57  ;;  %v5722_v34 = vcombine.low %v5714_v62, %v5721_v48  ;;  %v5588_v55 = vmax.f32 %v5564_v23, 0.0  ;;  %v5473_v47 = vmul.f32 %v5371_v41, %v9581_v26  ;;  %v5519_v6 = vmul.f32 %v9682_v29, %v5471_v49 }
 0xb00   :  { %v5589_v53 = vmax.f32 %v5565_v28, 0.0  ;;  %v5590_v14 = vmax.f32 %v5566_v11, 0.0  ;;  %v5520_v25 = vmul.f32 %v9695_v8, %v5472_v10  ;;  %v5378_v30 = vrot.slane %v9744_v38, %v9502_v12 }
 0xb01   :  { %v5817_v35 = vsel %vm828_vm2, %v5722_v34, 0.0  ;;  %v5636_v32 = vmul.f32 %v9688_v33, %v5588_v55  ;;  %v5521_v39 = vmul.f32 %v9701_v2, %v5473_v47  ;;  %v5567_v19 = vadd.f32 %v9685_v59, %v5519_v6 }
 0xb02   :  { %5818 = vadd.xlane.f32.xlu1 %v5817_v35  ;;  %v5637_v26 = vmul.f32 %v9715_v40, %v5589_v53  ;;  %v5638_v43 = vmul.f32 %v9691_v3, %v5590_v14  ;;  %v5568_v9 = vadd.f32 %v9705_v50, %v5520_v25  ;;  %v5385_v52 = vrot.slane %v9744_v38, %v9505_v0 }
 0xb03   :  { %v5569_v22 = vadd.f32 %v9711_v21, %v5521_v39  ;;  %v5591_v45 = vmax.f32 %v5567_v19, 0.0  ;;  %v5392_v48 = vrot.slane %v9744_v38, %v9508_v51  ;;  %v5474_v54 = vmul.f32 %v5378_v30, %v9593_v60 }
 0xb04   :  { %v5723_v4 = vcombine.low %v5636_v32, %v5637_v26  ;;  %v5737_v62 = vrot.slane %v5638_v43, %v7490_v15  ;;  %v5592_v23 = vmax.f32 %v5568_v9, 0.0  ;;  %v5475_v41 = vmul.f32 %v5385_v52, %v9596_v46 }
 0xb05   :  { %v5593_v49 = vmax.f32 %v5569_v22, 0.0  ;;  %v5639_v57 = vmul.f32 %v9688_v33, %v5591_v45  ;;  %v5476_v28 = vmul.f32 %v5392_v48, %v9599_v18  ;;  %v5522_v11 = vmul.f32 %v9682_v29, %v5474_v54 }
 0xb06   :  { %v5730_v10 = vrot.slane %v5723_v4, %v7490_v15  ;;  %v5640_v34 = vmul.f32 %v9715_v40, %v5592_v23  ;;  %v5523_v38 = vmul.f32 %v9695_v8, %v5475_v41  ;;  %v5399_v60 = vrot.slane %v9748_v1, %v9502_v12 }
 0xb07   :  { %v5641_v55 = vmul.f32 %v9691_v3, %v5593_v49  ;;  %v5524_v46 = vmul.f32 %v9701_v2, %v5476_v28  ;;  %v5570_v47 = vadd.f32 %v9685_v59, %v5522_v11  ;;  %v5406_v18 = vrot.slane %v9748_v1, %v9505_v0 }
 0xb08   :  { %v5738_v6 = vcombine.low %v5730_v10, %v5737_v62  ;;  %v5739_v53 = vcombine.low %v5639_v57, %v5640_v34  ;;  %v5571_v14 = vadd.f32 %v9705_v50, %v5523_v38  ;;  %v5413_v25 = vrot.slane %v9748_v1, %v9508_v51 }
 0xb09   :  { %v5753_v30 = vrot.slane %v5641_v55, %v7490_v15  ;;  %v5572_v35 = vadd.f32 %v9711_v21, %v5524_v46  ;;  %v5594_v32 = vmax.f32 %v5570_v47, 0.0  ;;  %v5477_v39 = vmul.f32 %v5399_v60, %v9603_v5 }
 0xb0a   :  { %v5820_v19 = vsel %vm828_vm2, %v5738_v6, 0.0  ;;  %v5746_v26 = vrot.slane %v5739_v53, %v7490_v15  ;;  %v5595_v43 = vmax.f32 %v5571_v14, 0.0  ;;  %v5478_v9 = vmul.f32 %v5406_v18, %v9606_v24 }
 0xb0b   :  { %5821 = vadd.xlane.f32.xlu0 %v5820_v19  ;;  %v5596_v52 = vmax.f32 %v5572_v35, 0.0  ;;  %v5642_v22 = vmul.f32 %v9688_v33, %v5594_v32  ;;  %v5479_v1 = vmul.f32 %v5413_v25, %v9610_v44  ;;  %v5525_v45 = vmul.f32 %v9682_v29, %v5477_v39 }
 0xb0c   :  { %v5754_v48 = vcombine.low %v5746_v26, %v5753_v30  ;;  %v5643_v54 = vmul.f32 %v9715_v40, %v5595_v43  ;;  %v5526_v5 = vmul.f32 %v9695_v8, %v5478_v9  ;;  %v5420_v4 = vrot.slane %v9760_v17, %v9502_v12 }
 0xb0d   :  { %v5644_v62 = vmul.f32 %v9691_v3, %v5596_v52  ;;  %v5527_v24 = vmul.f32 %v9701_v2, %v5479_v1  ;;  %v5573_v23 = vadd.f32 %v9685_v59, %v5525_v45  ;;  %v5427_v41 = vrot.slane %v9760_v17, %v9505_v0 }
 0xb0e   :  { %v5823_v44 = vsel %vm828_vm2, %v5754_v48, 0.0  ;;  %v5755_v49 = vcombine.low %v5642_v22, %v5643_v54  ;;  %v5574_v57 = vadd.f32 %v9705_v50, %v5526_v5  ;;  %v5434_v28 = vrot.slane %v9760_v17, %v9508_v51 }
 0xb0f   :  { %5824 = vadd.xlane.f32.xlu1 %v5823_v44  ;;  %v5769_v12 = vrot.slane %v5644_v62, %v7490_v15  ;;  %v5575_v11 = vadd.f32 %v9711_v21, %v5527_v24  ;;  %v5597_v10 = vmax.f32 %v5573_v23, 0.0  ;;  %v5480_v34 = vmul.f32 %v5420_v4, %v9627_v63 }
 0xb10   :  { %v5762_v38 = vrot.slane %v5755_v49, %v7490_v15  ;;  %v5598_v60 = vmax.f32 %v5574_v57, 0.0  ;;  %v5481_v0 = vmul.f32 %v5427_v41, %v9630_v16  ;;  %v5482_v55 = vmul.f32 %v5434_v28, %v9634_v36 }
 0xb11   :  { %v5599_v46 = vmax.f32 %v5575_v11, 0.0  ;;  %v5645_v47 = vmul.f32 %v9688_v33, %v5597_v10  ;;  %v5528_v51 = vmul.f32 %v9682_v29, %v5480_v34  ;;  %v10149_v45 = vlaneseq }
 0xb12   :  { %v5770_v17 = vcombine.low %v5762_v38, %v5769_v12  ;;  %v5646_v18 = vmul.f32 %v9715_v40, %v5598_v60  ;;  %v5529_v6 = vmul.f32 %v9695_v8, %v5481_v0  ;;  %v5530_v53 = vmul.f32 %v9701_v2, %v5482_v55 }
 0xb13   :  { %v5647_v63 = vmul.f32 %v9691_v3, %v5599_v46  ;;  %v5576_v14 = vadd.f32 %v9685_v59, %v5528_v51  ;;  %v9871_v48 = vand.u32 127, %v10149_v45  ;;  %v10154_v45 = vld [vmem:[#allocation25_spill] sm:$0xff] }
 0xb14   :  { %v5826_v16 = vsel %vm828_vm2, %v5770_v17, 0.0  ;;  %v5771_v25 = vcombine.low %v5645_v47, %v5646_v18  ;;  %v5577_v36 = vadd.f32 %v9705_v50, %v5529_v6  ;;  %v5578_v30 = vadd.f32 %v9711_v21, %v5530_v53 }
 0xb15   :  { %5827 = vadd.xlane.f32.xlu0 %v5826_v16  ;;  %v5600_v29 = vmax.f32 %v5576_v14, 0.0  ;;  %v5785_v32 = vrot.slane %v5647_v63, %v7490_v15  ;;  %v9875_v5 = vsub.s32 %v9871_v48, %v10141_v56 }
 0xb16   :  { %v5778_v35 = vrot.slane %v5771_v25, %v7490_v15  ;;  %v5601_v8 = vmax.f32 %v5577_v36, 0.0  ;;  %v5602_v39 = vmax.f32 %v5578_v30, 0.0 }
 0xb17   :  { %v5648_v2 = vmul.f32 %v9688_v33, %v5600_v29 }
 0xb18   :  { %v5786_v19 = vcombine.low %v5778_v35, %v5785_v32  ;;  %v5649_v59 = vmul.f32 %v9715_v40, %v5601_v8  ;;  %v5650_v26 = vmul.f32 %v9691_v3, %v5602_v39  ;;  %v5838_v40 = vstv %s6913_s10  ;;  %v10150_v35 = vld [vmem:[#allocation20_spill] sm:$0xff] }
 0xb19   :  { %v10151_v8 = vld [vmem:[#allocation24_spill] sm:$0xff] }
 0xb1a   :  { %v5829_v43 = vsel %vm828_vm2, %v5786_v19, 0.0  ;;  %v5787_v50 = vcombine.low %v5648_v2, %v5649_v59  ;;  %v5801_v9 = vrot.slane %v5650_v26, %v7490_v15  ;;  %v10152_v26 = vld [vmem:[#allocation23_spill] sm:$0xff] }
 0xb1b   :  { %5830 = vadd.xlane.f32.xlu1 %v5829_v43 }
 0xb1c   :  { %v5794_v21 = vrot.slane %v5787_v50, %v7490_v15 }
 0xb1e   :  { %v5802_v52 = vcombine.low %v5794_v21, %v5801_v9 }
 0xb20   :  { %v5832_v22 = vsel %vm828_vm2, %v5802_v52, 0.0  ;;  %v10153_v52 = vld [vmem:[#allocation29_spill] sm:$0xff]  ;;  %vm6558_vm2 = vcmask 424960  }
 0xb21   :  { %5833 = vadd.xlane.f32.xlu0 %v5832_v22 }
 0xb87   :  { %v5813_v1 = vpop.xlane.xlu1 %5812 }
 0xb88   :  { %v5840_v4 = vadd.f32 %v5838_v40, %v5813_v1 }
 0xb8a   :  { %v5861_v23 = vrot.slane %v5840_v4, %v9875_v5 }
 0xb8c   :  { %v5816_v33 = vpop.xlane.xlu0 %5815 }
 0xb8d   :  { %v5841_v3 = vadd.f32 %v5838_v40, %v5816_v33 }
 0xb8f   :  { %v5819_v54 = vpop.xlane.xlu1 %5818  ;;  %v5865_v24 = vrot.slane %v5841_v3, %v9875_v5 }
 0xb90   :  { %v5842_v62 = vadd.f32 %v5838_v40, %v5819_v54 }
 0xb91   :  { %v5891_v57 = vsel %vm5890_vm5, %v5865_v24, %v5861_v23 }
 0xb92   :  { %v5869_v49 = vrot.slane %v5842_v62, %v9875_v5 }
 0xb94   :  { %v5893_v10 = vsel %vm5892_vm6, %v5869_v49, %v5891_v57 }
 0xb98   :  { %v5822_v15 = vpop.xlane.xlu0 %5821 }
 0xb99   :  { %v5843_v41 = vadd.f32 %v5838_v40, %v5822_v15 }
 0xb9b   :  { %v5873_v11 = vrot.slane %v5843_v41, %v9875_v5 }
 0xb9c   :  { %v5825_v44 = vpop.xlane.xlu1 %5824 }
 0xb9d   :  { %v5844_v28 = vadd.f32 %v5838_v40, %v5825_v44  ;;  %v5895_v60 = vsel %vm5894_vm7, %v5873_v11, %v5893_v10 }
 0xb9f   :  { %v5877_v38 = vrot.slane %v5844_v28, %v9875_v5 }
 0xba1   :  { %v5897_v47 = vsel %vm5896_vm8, %v5877_v38, %v5895_v60  ;;  %v10155_v38 = vld [vmem:[#allocation21_spill] sm:$0xff]  ;;  %v10156_v60 = vld [vmem:[#allocation30_spill] sm:$0xff] }
 0xba2   :  { %v5828_v12 = vpop.xlane.xlu0 %5827 }
 0xba3   :  { %v5845_v34 = vadd.f32 %v5838_v40, %v5828_v12 }
 0xba5   :  { %v5881_v55 = vrot.slane %v5845_v34, %v9875_v5 }
 0xba7   :  { %v5899_v17 = vsel %vm5898_vm9, %v5881_v55, %v5897_v47 }
 0xba8   :  { %v5831_v0 = vpop.xlane.xlu1 %5830 }
 0xba9   :  { %v5846_v46 = vadd.f32 %v5838_v40, %v5831_v0 }
 0xbab   :  { %v5885_v51 = vrot.slane %v5846_v46, %v9875_v5 }
 0xbad   :  { %v5901_v53 = vsel %vm5900_vm10, %v5885_v51, %v5899_v17 }
 0xbae   :  { %v5834_v18 = vpop.xlane.xlu0 %5833 }
 0xbaf   :  { %v5847_v6 = vadd.f32 %v5838_v40, %v5834_v18 }
 0xbb1   :  { %v5889_v63 = vrot.slane %v5847_v6, %v9875_v5 }
 0xbb3   :  { %v5903_v14 = vsel %vm5902_vm11, %v5889_v63, %v5901_v53 }
 0xbb4   :  { %v5906_v16 = vsel %vm5905_vm12, %v5903_v14, -inf }
 0xbb5   :  { %5907 = vmax.xlane.f32.xlu1 %v5906_v16 }
 0xc42   :  { %v5908_v25 = vpop.xlane.xlu1 %5907 }
 0xc43   :  { %v5913_v36 = vrot.slane %v5908_v25, %v10100_v37  ;;  %v5917_v30 = vrot.slane %v5908_v25, %v10099_v42  ;;  %v5921_v29 = vrot.slane %v5908_v25, %v10148_v58  ;;  %v5925_v32 = vrot.slane %v5908_v25, %v10150_v35 }
 0xc44   :  { %v5933_v39 = vrot.slane %v5908_v25, %v10151_v8  ;;  %v5929_v43 = vrot.slane %v5908_v25, %v10152_v26  ;;  %v5941_v22 = vrot.slane %v5908_v25, %v10153_v52  ;;  %v5937_v40 = vrot.slane %v5908_v25, %v10154_v45 }
 0xc45   :  { %v5950_v2 = vsub.f32 %v5840_v4, %v5913_v36  ;;  %v5951_v19 = vsub.f32 %v5841_v3, %v5917_v30  ;;  %v5953_v59 = vsub.f32 %v5843_v41, %v5925_v32  ;;  %v5952_v50 = vsub.f32 %v5842_v62, %v5921_v29 }
 0xc46   :  { %v5955_v1 = vsub.f32 %v5845_v34, %v5933_v39  ;;  %v5954_v54 = vsub.f32 %v5844_v28, %v5929_v43  ;;  %v5957_v24 = vsub.f32 %v5847_v6, %v5941_v22  ;;  %v5956_v3 = vsub.f32 %v5846_v46, %v5937_v40  ;;  %v10157_v43 = vld [vmem:[#allocation31_spill] sm:$0xff] }
 0xc47   :  { %v5958_v21 = vmul.f32 1.442695, %v5950_v2  ;;  %v5960_v9 = vmul.f32 1.442695, %v5951_v19  ;;  %v5964_v33 = vmul.f32 1.442695, %v5953_v59 }
 0xc48   :  { %v5962_v15 = vmul.f32 1.442695, %v5952_v50  ;;  %v5968_v4 = vmul.f32 1.442695, %v5955_v1  ;;  %v5966_v23 = vmul.f32 1.442695, %v5954_v54 }
 0xc49   :  { %7028 = vpow2.f32 %v5958_v21  ;;  %v5972_v62 = vmul.f32 1.442695, %v5957_v24  ;;  %v5970_v41 = vmul.f32 1.442695, %v5956_v3  ;;  %v10158_v50 = vld [vmem:[#allocation32_spill] sm:$0xff] }
 0xc4a   :  { %7030 = vpow2.f32 %v5960_v9 }
 0xc4b   :  { %7032 = vpow2.f32 %v5964_v33 }
 0xc4c   :  { %7034 = vpow2.f32 %v5962_v15 }
 0xc4d   :  { %7036 = vpow2.f32 %v5968_v4 }
 0xc4e   :  { %7038 = vpow2.f32 %v5966_v23 }
 0xc4f   :  { %7040 = vpow2.f32 %v5972_v62 }
 0xc50   :  { %7042 = vpow2.f32 %v5970_v41 }
 0xc53   :  { %v9901_v44 = vpop.eup %7028 }
 0xc54   :  { %v9903_v49 = vpop.eup %7030  ;;  %5983 = vperm.xlu0 %6953, %v9901_v44  }
 0xc55   :  { %5986 = vperm.xlu1 %6961, %v9903_v49   ;;  %v9907_v57 = vpop.eup %7032 }
 0xc56   :  { %v9909_v28 = vpop.eup %7034 }
 0xc57   :  { %v9913_v12 = vpop.eup %7036 }
 0xc58   :  { %5992 = vperm.xlu0 %6953, %v9907_v57   ;;  %v9915_v11 = vpop.eup %7038 }
 0xc59   :  { %5989 = vperm.xlu1 %6961, %v9909_v28   ;;  %v9919_v10 = vpop.eup %7040 }
 0xc5a   :  { %v9921_v34 = vpop.eup %7042 }
 0xc5c   :  { %5998 = vperm.xlu0 %6953, %v9913_v12  }
 0xc5d   :  { %5995 = vperm.xlu1 %6961, %v9915_v11  }
 0xc60   :  { %6004 = vperm.xlu0 %6953, %v9919_v10  }
 0xc61   :  { %6001 = vperm.xlu1 %6961, %v9921_v34  }
 0xc64   :  { %6396 = vrot.lane.b32.xlu0 %v9415_v13, %s7211_s18 }
 0xc68   :  { %6161 = vrot.lane.b32.xlu0 %v10155_v38, %s7212_s13 }
 0xc6c   :  { %6270 = vrot.lane.b32.xlu0 %v9435_v31, %s7203_s0  ;;  %s7215_s0 = smov 42  }
 0xc70   :  { %6287 = vrot.lane.b32.xlu0 %v10156_v60, %s7213_s3 }
 0xc74   :  { %6455 = vrot.lane.b32.xlu0 %v9447_v27, %s7214_s4 }
 0xcd3   :  { %v5984_v0 = vpop.permute.xlu0 %5983 }
 0xcd4   :  { %v5987_v55 = vpop.permute.xlu1 %5986  ;;  %v6009_v47 = vrot.slane %v5984_v0, %v9875_v5 }
 0xcd5   :  { %v6013_v46 = vrot.slane %v5987_v55, %v9875_v5 }
 0xcd7   :  { %v5993_v51 = vpop.permute.xlu0 %5992  ;;  %v6038_v18 = vsel %vm5890_vm5, %v6013_v46, %v6009_v47 }
 0xcd8   :  { %v5990_v13 = vpop.permute.xlu1 %5989  ;;  %v6021_v31 = vrot.slane %v5993_v51, %v9875_v5 }
 0xcd9   :  { %v6017_v17 = vrot.slane %v5990_v13, %v9875_v5 }
 0xcdb   :  { %v6039_v6 = vsel %vm5892_vm6, %v6017_v17, %v6038_v18  ;;  %v5999_v53 = vpop.permute.xlu0 %5998 }
 0xcdc   :  { %v5996_v63 = vpop.permute.xlu1 %5995  ;;  %v6040_v14 = vsel %vm5894_vm7, %v6021_v31, %v6039_v6  ;;  %v6029_v16 = vrot.slane %v5999_v53, %v9875_v5 }
 0xcdd   :  { %v6025_v27 = vrot.slane %v5996_v63, %v9875_v5 }
 0xcdf   :  { %v6041_v25 = vsel %vm5896_vm8, %v6025_v27, %v6040_v14  ;;  %v6005_v36 = vpop.permute.xlu0 %6004 }
 0xce0   :  { %v6002_v30 = vpop.permute.xlu1 %6001  ;;  %v6037_v29 = vrot.slane %v6005_v36, %v9875_v5  ;;  %v6042_v39 = vsel %vm5898_vm9, %v6029_v16, %v6041_v25 }
 0xce1   :  { %v6033_v32 = vrot.slane %v6002_v30, %v9875_v5  ;;  %v10159_v5 = vld [vmem:[#allocation33_spill] sm:$0xff] }
 0xce3   :  { %v6043_v2 = vsel %vm5900_vm10, %v6033_v32, %v6042_v39 }
 0xce4   :  { %v6044_v19 = vsel %vm5902_vm11, %v6037_v29, %v6043_v2 }
 0xce5   :  { %v6046_v59 = vsel %vm5905_vm12, %v6044_v19, 0.0 }
 0xce6   :  { %6047 = vadd.xlane.f32.xlu1 %v6046_v59 }
 0xcf7   :  { %6413 = vrot.lane.b32.xlu1 %v10157_v43, %s7215_s0 }
 0xcfb   :  { %6203 = vrot.lane.b32.xlu1 %v9495_v7, %s7216_s20 }
 0xcff   :  { %6472 = vrot.lane.b32.xlu1 %v10158_v50, %s7217_s11 }
 0xd03   :  { %6346 = vrot.lane.b32.xlu1 %v10159_v5, %s7218_s16 }
 0xd73   :  { %v6048_v21 = vpop.xlane.xlu1 %6047 }
 0xd74   :  { %7044 = vrcp.f32 %v6048_v21 }
 0xd7e   :  { %v7045_v9 = vpop.eup %7044 }
 0xd7f   :  { %v6054_v22 = vrot.slane %v7045_v9, %v10100_v37  ;;  %v6058_v33 = vrot.slane %v7045_v9, %v10099_v42  ;;  %v6062_v7 = vrot.slane %v7045_v9, %v10148_v58  ;;  %v6066_v15 = vrot.slane %v7045_v9, %v10150_v35 }
 0xd80   :  { %v6070_v4 = vrot.slane %v7045_v9, %v10152_v26  ;;  %v6074_v42 = vrot.slane %v7045_v9, %v10151_v8  ;;  %v6078_v58 = vrot.slane %v7045_v9, %v10154_v45  ;;  %v6082_v35 = vrot.slane %v7045_v9, %v10153_v52  ;;  %v10160_v26 = vld [vmem:[#allocation34_spill] sm:$0xff]  ;;  %v6397_v8 = vpop.permute.xlu0 %6396 }
 0xd81   :  { %v6091_v1 = vmul.f32 %v9901_v44, %v6054_v22  ;;  %v6092_v40 = vmul.f32 %v9903_v49, %v6058_v33  ;;  %v6093_v54 = vmul.f32 %v9909_v28, %v6062_v7  ;;  %v6094_v24 = vmul.f32 %v9907_v57, %v6066_v15 }
 0xd82   :  { %v6095_v37 = vmul.f32 %v9915_v11, %v6070_v4  ;;  %v6096_v3 = vmul.f32 %v9913_v12, %v6074_v42  ;;  %v6097_v23 = vmul.f32 %v9921_v34, %v6078_v58  ;;  %v6098_v62 = vmul.f32 %v9919_v10, %v6082_v35  ;;  %v6414_v11 = vpop.permute.xlu1 %6413 }
 0xd83   :  { %6484 = vperm.xlu0 %6953, %v6091_v1   ;;  %v6507_v10 = vadd.s32 4294967192, %v9871_v48  ;;  %v6565_v53 = vsel %vm6564_vm13, %v6397_v8, %v6414_v11 }
 0xd84   :  { %v6162_v41 = vpop.permute.xlu0 %6161 }
 0xd85   :  { %v6510_v38 = vsub.s32 %v6507_v10, %v10141_v56  ;;  %v6549_v5 = vsel %vm6548_vm4, %v9478_v20, %v6162_v41 }
 0xd86   :  { %v6204_v60 = vpop.permute.xlu1 %6203 }
 0xd87   :  { %6487 = vperm.xlu0 %6953, %v6092_v40  }
 0xd88   :  { %v9970_v44 = vpop.permute.xlu0 %6270 }
 0xd8a   :  { %v6473_v48 = vpop.permute.xlu1 %6472 }
 0xd8b   :  { %6490 = vperm.xlu0 %6953, %v6093_v54  }
 0xd8c   :  { %v6288_v45 = vpop.permute.xlu0 %6287 }
 0xd8d   :  { %v6557_v32 = vsel %vm6556_vm0, %v9970_v44, %v6288_v45 }
 0xd8e   :  { %v6347_v19 = vpop.permute.xlu1 %6346 }
 0xd8f   :  { %6493 = vperm.xlu0 %6953, %v6094_v24  }
 0xd90   :  { %v6456_v49 = vpop.permute.xlu0 %6455 }
 0xd91   :  { %v6567_v25 = vsel %vm6566_vm14, %v6565_v53, %v6456_v49 }
 0xd92   :  { %v6569_v30 = vsel %vm6568_vm15, %v6567_v25, %v6473_v48 }
 0xd93   :  { %6496 = vperm.xlu0 %6953, %v6095_v37  }
 0xd97   :  { %6499 = vperm.xlu0 %6953, %v6096_v3  }
 0xd9b   :  { %6502 = vperm.xlu0 %6953, %v6097_v23  }
 0xd9f   :  { %6505 = vperm.xlu0 %6953, %v6098_v62  }
 0xda3   :  { %6329 = vrot.lane.b32.xlu0 %v9499_v61, %s7219_s14 }
 0xda7   :  { %6220 = vrot.lane.b32.xlu0 %v10160_v26, %s7204_s26  ;;  %s7220_s26 = smov [#allocation11]  }
 0xda8   :  { %s6582_s8 = sshll.u32 %s7220_s26, 4  ;;  %s6583_s8 = int_to_ptr.vmem [resolvable:$true] %s6582_s8 }
 0xda9   :  { %s7158_s21 = scalar_lea.vmem %s6583_s8, 384  ;;  %p7163_p13 = scmp.lt.s32.totalorder %s6583_s8, %s6583_s8 }
 0xdaa   :  { %p7159_p12 = scmp.ne.s32.totalorder %s6583_s8, %s7158_s21  ;;  %p7164_p0 = scmp.lt.s32.totalorder %s7158_s21, %s7158_s21 }
 0xdac   :  { %p7165_p1 = por %p7164_p0, %p7163_p13 }
 0xdae   :  { %p7166_p2 = pnand %p7165_p1, %p7159_p12 }
 0xe02   :  { %v6485_v57 = vpop.permute.xlu0 %6484 }
 0xe03   :  { %v6511_v46 = vrot.slane %v6485_v57, %v6510_v38 }
 0xe06   :  { %v6488_v28 = vpop.permute.xlu0 %6487 }
 0xe07   :  { %v6515_v0 = vrot.slane %v6488_v28, %v6510_v38 }
 0xe09   :  { %v6540_v17 = vsel %vm5890_vm5, %v6515_v0, %v6511_v46  ;;  %vm6562_vm5 = vcmask 916480  }
 0xe0a   :  { %v6491_v12 = vpop.permute.xlu0 %6490 }
 0xe0b   :  { %v6519_v55 = vrot.slane %v6491_v12, %v6510_v38 }
 0xe0d   :  { %v6541_v31 = vsel %vm5892_vm6, %v6519_v55, %v6540_v17  ;;  %vm6550_vm6 = vcmask 490496  }
 0xe0e   :  { %v6494_v52 = vpop.permute.xlu0 %6493  ;;  %v6551_v9 = vsel %vm6550_vm6, %v6549_v5, %v6204_v60 }
 0xe0f   :  { %v6523_v47 = vrot.slane %v6494_v52, %v6510_v38 }
 0xe11   :  { %v6542_v56 = vsel %vm5894_vm7, %v6523_v47, %v6541_v31  ;;  %vm6552_vm7 = vcmask 965632  }
 0xe12   :  { %v6497_v34 = vpop.permute.xlu0 %6496 }
 0xe13   :  { %v6527_v51 = vrot.slane %v6497_v34, %v6510_v38 }
 0xe15   :  { %v6543_v63 = vsel %vm5896_vm8, %v6527_v51, %v6542_v56  ;;  %vm6554_vm8 = vcmask 982016  }
 0xe16   :  { %v6500_v61 = vpop.permute.xlu0 %6499 }
 0xe17   :  { %v6531_v18 = vrot.slane %v6500_v61, %v6510_v38 }
 0xe19   :  { %v6544_v14 = vsel %vm5898_vm9, %v6531_v18, %v6543_v63 }
 0xe1a   :  { %v6503_v13 = vpop.permute.xlu0 %6502 }
 0xe1b   :  { %v6535_v6 = vrot.slane %v6503_v13, %v6510_v38 }
 0xe1d   :  { %v6545_v36 = vsel %vm5900_vm10, %v6535_v6, %v6544_v14 }
 0xe1e   :  { %v6506_v27 = vpop.permute.xlu0 %6505 }
 0xe1f   :  { %v6539_v16 = vrot.slane %v6506_v27, %v6510_v38 }
 0xe21   :  { %v6546_v29 = vsel %vm5902_vm11, %v6539_v16, %v6545_v36 }
 0xe22   :  { %v6571_v39 = vsel %vm6570_vm1, %v6569_v30, %v6546_v29  ;;  %v6330_v2 = vpop.permute.xlu0 %6329 }
 0xe23   :  { %v6559_v59 = vsel %vm6558_vm2, %v6557_v32, %v6330_v2  ;;  %v6572_v43 = vsel %vm6560_vm3, %v6571_v39, 0.0 }
 0xe24   :  { %v6561_v50 = vsel %vm6560_vm3, %v6559_v59, %v6347_v19  ;;  %6575 = vst [vmem:[#allocation11 + $0x10] sm:$0xff] %v6572_v43 }
 0xe25   :  { %v6563_v21 = vsel %vm6562_vm5, %v6561_v50, %v6397_v8 }
 0xe26   :  { %6574 = vst [vmem:[#allocation11 + $0x8] sm:$0xff] %v6563_v21  ;;  %v6221_v22 = vpop.permute.xlu0 %6220 }
 0xe27   :  { %v6553_v1 = vsel %vm6552_vm7, %v6551_v9, %v6221_v22 }
 0xe28   :  { %v6555_v33 = vsel %vm6554_vm8, %v6553_v1, %v9970_v44 }
 0xe29   :  { %6573 = vst [vmem:[#allocation11] sm:$0xff] %v6555_v33 }
 0xe2a   :  { %7169 = shalt.err (!%p7166_p2)
}
 0xe2b   :  { %s10161_s22 = sld [smem:[#allocation39_spill]] }
 0xe31   :  { %s7170_s9 = scalar_lea.hbm %s10161_s22, 384 }
 0xe32   :  { %p7171_p3 = scmp.ne.s32.totalorder %s10161_s22, %s7170_s9  ;;  %p7174_p4 = scmp.lt.u32.totalorder %s7170_s9, %s10161_s22 }
 0xe34   :  { %p7176_p5 = pnand %p7174_p4, %p7171_p3 }
 0xe36   :  { %7179 = shalt.err (!%p7176_p5)
}
 0xe37   :  { %6585 = dma.vmem_to_hbm [thread:$0]  %s6583_s8, 384, %s10161_s22, [#allocation4]  }
 0xe38   :  { %7186 = dma.done.wait [#allocation4], 384  }
 0xe39   :  { %7187 = vsyncadd [#allocation4], 4294966912 }
 0xe3a   :  { %6589 = vsyncpa [#allocation3], 1 }
 0xe3b   :  { %6590 = vsyncpa [#allocation6], 1 }
 0xe3c   :  { %6591 = vsyncpa [#allocation9], 1 }
 0xe3d   :  { %6592 = vsyncpa [#allocation4], 1 }

</bundles_post_ra>
